<compile_context>
chip_gen: v5e
topology: v5e:2x2
jax: 0.10.0
libtpu: 0.0.40
codegen_flags: <defaults>
</compile_context>

<pallas_src>
import functools

import jax
import jax.numpy as jnp
from jax import lax
from jax.experimental import pallas as pl
from jax.experimental.pallas import tpu as pltpu


_LANE = 128
# TODO(synk): on v6e/v7x, Cout tiles of 256 would better fill the 256-wide MXU
#             for large-channel stages; 128 kept here (test channels are small).


def _round_up(x, m):
    return (x + m - 1) // m * m


def _vmem_limit_bytes():
    # Per-generation VMEM budget (review item): ~75% of physical capacity
    # (~96 MiB on v5e/v6e, ~48 MiB on v7x).  Conservative fallback if the
    # hardware query is unavailable.
    try:
        cap = int(pltpu.get_tpu_info().vmem_capacity_bytes)
    except Exception:
        cap = 64 * 1024 * 1024
    return max((cap * 3) // 4, 16 * 1024 * 1024)


def _pick_tile_rows(H, per_row_bytes, fixed_bytes, vmem_limit, override=None):
    """Largest divisor of H whose per-grid-step footprint fits ~60% of the limit."""
    if override is not None:
        assert H % override == 0, (H, override)
        return override
    budget = max(int(vmem_limit * 0.6) - fixed_bytes, per_row_bytes)
    for th in range(H, 0, -1):
        if H % th == 0 and th * per_row_bytes <= budget:
            return th
    return 1


# ----------------------------------------------------------------------------
# Kernels
# ----------------------------------------------------------------------------
def _conv3x3_kernel(*refs, fuse_input_bn):
    """3x3 conv (stride 1, pad 1) over one (TH, W) row tile.

    refs (in order):
      x_ref    : (1, TH, W, Cin)  bf16  main row tile (pre-BN values when fused)
      halo_ref : (1, 2,  W, Cin)  bf16  row above / row below this tile
      w_ref    : (9, Cin, Cout)   bf16  tap-major weights
      [scale_ref, shift_ref : (1, Cin) f32   -- only when fuse_input_bn]
      conv_ref : (1, TH, W, Cout) bf16  pre-BN conv output (bf16 intermediate)
      psum_ref : (1, 1, 1, Cout)  f32   per-tile sum   (from the f32 accumulator)
      psq_ref  : (1, 1, 1, Cout)  f32   per-tile sum of squares
    """
    if fuse_input_bn:
        x_ref, halo_ref, w_ref, scale_ref, shift_ref, conv_ref, psum_ref, psq_ref = refs
    else:
        x_ref, halo_ref, w_ref, conv_ref, psum_ref, psq_ref = refs

    _, TH, W, Cin = x_ref.shape
    Cout = conv_ref.shape[-1]

    x = x_ref[0]                                            # (TH, W, Cin) bf16
    halo = halo_ref[0]                                      # (2, W, Cin)  bf16
    top = halo[0:1]
    bot = halo[1:2]

    if fuse_input_bn:
        # Previous stage's BN + ReLU applied in-register (fusion; no HBM round
        # trip of the activation).  Boundary halo rows must be zero in the
        # *activation* domain, hence the scalar masks.
        scale = scale_ref[...]
        shift = shift_ref[...]
        r = pl.program_id(1)
        nr = pl.num_programs(1)
        top_m = (r != 0).astype(jnp.float32)
        bot_m = (r != nr - 1).astype(jnp.float32)
        x = jnp.maximum(x * scale + shift, 0.0).astype(x_ref.dtype)
        top = (jnp.maximum(top * scale + shift, 0.0) * top_m).astype(x_ref.dtype)
        bot = (jnp.maximum(bot * scale + shift, 0.0) * bot_m).astype(x_ref.dtype)

    # Row-pad the tile with its halo (major-axis concat, layout preserving).
    xx = jnp.concatenate([top, x, bot], axis=0)             # (TH+2, W, Cin)

    # W-axis (sublane) shifts built once.  Zero columns are inserted AFTER the
    # activation, so they are true conv zero-padding in the activation domain.
    # TODO(synk): pltpu.roll + single-column mask would move these onto the XLU
    #             and avoid two relayout copies.
    zcol = jnp.zeros((TH + 2, 1, Cin), xx.dtype)
    x_m1 = jnp.concatenate([zcol, xx[:, :W - 1, :]], axis=1)
    x_p1 = jnp.concatenate([xx[:, 1:, :], zcol], axis=1)
    shifted = (x_m1, xx, x_p1)

    acc = jnp.zeros((TH * W, Cout), jnp.float32)
    for ky in range(3):
        for kx in range(3):
            patch = shifted[kx][ky:ky + TH]                 # (TH, W, Cin) major slice
            # W a multiple of 8 keeps this flatten layout-compatible (cheap);
            # other W is still correct, just triggers a relayout.
            acc = acc + jnp.dot(
                patch.reshape(TH * W, Cin),
                w_ref[3 * ky + kx],
                preferred_element_type=jnp.float32,         # bf16 operands, f32 acc
            )

    conv_ref[0] = acc.reshape(TH, W, Cout).astype(conv_ref.dtype)   # bf16 writeback
    psum_ref[0, 0] = jnp.sum(acc, axis=0, keepdims=True)
    psq_ref[0, 0] = jnp.sum(acc * acc, axis=0, keepdims=True)


def _conv_packed_kernel(x_ref, w_ref, conv_ref, psum_ref, psq_ref):
    """First conv with the 9 taps packed into the contraction dim (im2col input).

    x_ref: (1, TH, W, K) bf16  with K = round_up(9*Cin, 128) -> one matmul
    instead of 9 K=128 matmuls that are mostly channel padding.
    """
    _, TH, W, K = x_ref.shape
    Cout = conv_ref.shape[-1]
    acc = jnp.dot(x_ref[0].reshape(TH * W, K), w_ref[0],
                  preferred_element_type=jnp.float32)
    conv_ref[0] = acc.reshape(TH, W, Cout).astype(conv_ref.dtype)
    psum_ref[0, 0] = jnp.sum(acc, axis=0, keepdims=True)
    psq_ref[0, 0] = jnp.sum(acc * acc, axis=0, keepdims=True)


def _bn_relu_kernel(y_ref, scale_ref, shift_ref, o_ref):
    """Final y = relu(conv*scale + shift) (BN affine folded into one FMA)."""
    y = y_ref[0]                                            # (TH, W, C) bf16
    o_ref[0] = jnp.maximum(y * scale_ref[...] + shift_ref[...], 0.0).astype(o_ref.dtype)


# ----------------------------------------------------------------------------
# Wrapper-side helpers (XLA glue, all cheap relative to the activation traffic)
# ----------------------------------------------------------------------------
def _build_row_halo(x, th):
    """Row above / below each TH-row tile (zeros at the image boundary).

    x: (N, H, W, C) -> (N*R, 2, W, C), R = H // th.  Only 2*R rows per image
    are touched, so this stays negligible vs. the conv output traffic.
    """
    N, H, W, C = x.shape
    R = H // th
    xr = x.reshape(N, R, th, W, C)
    zero = jnp.zeros((N, 1, 1, W, C), x.dtype)
    top = jnp.concatenate([zero, xr[:, :-1, th - 1:th]], axis=1)
    bot = jnp.concatenate([xr[:, 1:, 0:1], zero], axis=1)
    return jnp.concatenate([top, bot], axis=2).reshape(N * R, 2, W, C)


def _im2col_3x3(x):
    """(N, H, W, Cin) -> (N, H, W, 9*Cin); channel order (ky*3+kx)*Cin + c."""
    N, H, W, Cin = x.shape
    xp = jnp.pad(x, ((0, 0), (1, 1), (1, 1), (0, 0)))
    cols = [xp[:, ky:ky + H, kx:kx + W, :] for ky in range(3) for kx in range(3)]
    return jnp.concatenate(cols, axis=-1)


def _prep_w_taps(w_oihw, cin_p, cout_p):
    # PyTorch (Cout, Cin, 3, 3) -> tap-major (9, Cin_p, Cout_p) bf16.
    cout, cin = w_oihw.shape[:2]
    w = jnp.transpose(w_oihw, (2, 3, 1, 0))
    w = jnp.pad(w, ((0, 0), (0, 0), (0, cin_p - cin), (0, cout_p - cout)))
    return w.reshape(9, cin_p, cout_p).astype(jnp.bfloat16)


def _prep_w_packed(w_oihw, k_p, cout_p):
    # PyTorch (Cout, Cin, 3, 3) -> packed (1, K_p, Cout_p) bf16, K = 9*Cin.
    cout, cin = w_oihw.shape[:2]
    w = jnp.transpose(w_oihw, (2, 3, 1, 0)).reshape(9 * cin, cout)
    w = jnp.pad(w, ((0, k_p - 9 * cin), (0, cout_p - cout)))
    return w.reshape(1, k_p, cout_p).astype(jnp.bfloat16)


def _bn_affine(psum, psq, gamma, beta, count, eps):
    # Training-mode (biased) batch statistics from the f32 in-kernel partials.
    # E[x^2]-mean^2 in f32 is adequate at these magnitudes; for very large
    # activation means, switch to a shifted (per-tile-mean) accumulation.
    mean = jnp.sum(psum, axis=(0, 1, 2)) / count
    var = jnp.maximum(jnp.sum(psq, axis=(0, 1, 2)) / count - mean * mean, 0.0)
    scale = gamma * lax.rsqrt(var + eps)
    shift = beta - mean * scale
    return scale.reshape(1, -1), shift.reshape(1, -1)


def _conv_out_parts(N, R, H, W, cout_p):
    out_specs = (
        pl.BlockSpec((1, None, W, cout_p), None),  # placeholder (unused)
    )
    return out_specs


# ----------------------------------------------------------------------------
# pallas_call wrappers
# ----------------------------------------------------------------------------
def _conv_pass_9tap(x, w9, *, tile_rows, vmem_limit, scale=None, shift=None):
    """x: (N, H, W, Cin_p) bf16.  When scale/shift are given, the previous
    stage's BN+ReLU is applied in-kernel before convolving (fusion)."""
    N, H, W, Cin_p = x.shape
    Cout_p = w9.shape[-1]
    TH = tile_rows
    R = H // TH
    halo = _build_row_halo(x, TH)
    fused = scale is not None
    kern = functools.partial(_conv3x3_kernel, fuse_input_bn=fused)

    in_specs = [
        pl.BlockSpec((1, TH, W, Cin_p), lambda n, r: (n, r, 0, 0)),
        pl.BlockSpec((1, 2, W, Cin_p), lambda n, r: (n * R + r, 0, 0, 0)),
        # TODO(synk): constant index_map -> pipeline_mode=pl.Buffered(1) (or a
        #             resident VMEM scratch) would save one weight-sized buffer.
        pl.BlockSpec((9, Cin_p, Cout_p), lambda n, r: (0, 0, 0)),
    ]
    args = [x, halo, w9]
    if fused:
        in_specs += [
            pl.BlockSpec((1, Cin_p), lambda n, r: (0, 0)),
            pl.BlockSpec((1, Cin_p), lambda n, r: (0, 0)),
        ]
        args += [scale, shift]

    return pl.pallas_call(
        kern,
        grid=(N, R),
        in_specs=in_specs,
        out_specs=(
            pl.BlockSpec((1, TH, W, Cout_p), lambda n, r: (n, r, 0, 0)),
            pl.BlockSpec((1, 1, 1, Cout_p), lambda n, r: (n, r, 0, 0)),
            pl.BlockSpec((1, 1, 1, Cout_p), lambda n, r: (n, r, 0, 0)),
        ),
        out_shape=(
            jax.ShapeDtypeStruct((N, H, W, Cout_p), jnp.bfloat16),   # bf16 intermediate
            jax.ShapeDtypeStruct((N, R, 1, Cout_p), jnp.float32),
            jax.ShapeDtypeStruct((N, R, 1, Cout_p), jnp.float32),
        ),
        compiler_params=pltpu.CompilerParams(
            dimension_semantics=("parallel", "parallel"),
            vmem_limit_bytes=vmem_limit,
        ),
    )(*args)


def _conv_pass_packed(xi, w1, *, tile_rows, vmem_limit):
    """Tap-packed first conv: xi is the im2col'd input (N, H, W, K_p) bf16."""
    N, H, W, K = xi.shape
    Cout_p = w1.shape[-1]
    TH = tile_rows
    R = H // TH
    return pl.pallas_call(
        _conv_packed_kernel,
        grid=(N, R),
        in_specs=[
            pl.BlockSpec((1, TH, W, K), lambda n, r: (n, r, 0, 0)),
            pl.BlockSpec((1, K, Cout_p), lambda n, r: (0, 0, 0)),
        ],
        out_specs=(
            pl.BlockSpec((1, TH, W, Cout_p), lambda n, r: (n, r, 0, 0)),
            pl.BlockSpec((1, 1, 1, Cout_p), lambda n, r: (n, r, 0, 0)),
            pl.BlockSpec((1, 1, 1, Cout_p), lambda n, r: (n, r, 0, 0)),
        ),
        out_shape=(
            jax.ShapeDtypeStruct((N, H, W, Cout_p), jnp.bfloat16),
            jax.ShapeDtypeStruct((N, R, 1, Cout_p), jnp.float32),
            jax.ShapeDtypeStruct((N, R, 1, Cout_p), jnp.float32),
        ),
        compiler_params=pltpu.CompilerParams(
            dimension_semantics=("parallel", "parallel"),
            vmem_limit_bytes=vmem_limit,
        ),
    )(xi, w1)


def _bn_relu_pass(conv, scale, shift, *, tile_rows, vmem_limit, out_dtype):
    N, H, W, C = conv.shape
    TH = tile_rows
    R = H // TH
    return pl.pallas_call(
        _bn_relu_kernel,
        grid=(N, R),
        in_specs=[
            pl.BlockSpec((1, TH, W, C), lambda n, r: (n, r, 0, 0)),
            pl.BlockSpec((1, C), lambda n, r: (0, 0)),
            pl.BlockSpec((1, C), lambda n, r: (0, 0)),
        ],
        out_specs=pl.BlockSpec((1, TH, W, C), lambda n, r: (n, r, 0, 0)),
        out_shape=jax.ShapeDtypeStruct((N, H, W, C), out_dtype),
        compiler_params=pltpu.CompilerParams(
            dimension_semantics=("parallel", "parallel"),
            vmem_limit_bytes=vmem_limit,
        ),
    )(conv, scale, shift)


# ----------------------------------------------------------------------------
# ConvBlock forward (NCHW in / NCHW out, matching the PyTorch module)
# ----------------------------------------------------------------------------
# TODO(synk): only stride=1 (the module's default) is implemented.
def conv_block_forward(x_nchw, params, eps=1e-5, tile_rows=None):
    N, Cin, H, W = x_nchw.shape
    Cout = params["g1"].shape[0]
    Cout_p = _round_up(Cout, _LANE)
    vmem_limit = _vmem_limit_bytes()

    # NCHW -> NHWC, bf16 MXU operands.  Conv biases (b1/b2) are intentionally
    # unused: with train-mode batch statistics BN's mean subtraction cancels
    # them exactly (this breaks if eval-mode running stats are ever used).
    x = jnp.transpose(x_nchw, (0, 2, 3, 1)).astype(jnp.bfloat16)

    g1 = jnp.pad(params["g1"], (0, Cout_p - Cout)).astype(jnp.float32)
    be1 = jnp.pad(params["beta1"], (0, Cout_p - Cout)).astype(jnp.float32)
    g2 = jnp.pad(params["g2"], (0, Cout_p - Cout)).astype(jnp.float32)
    be2 = jnp.pad(params["beta2"], (0, Cout_p - Cout)).astype(jnp.float32)

    count = float(N * H * W)

    # ---- stage 1: conv1 + per-channel partial stats (bf16 pre-BN output) ----
    if 9 * Cin <= _LANE:
        # Tap-packing: fold the 9 taps into K so the MXU is not fed mostly
        # channel padding (Cin=3-4 -> K=27-36 real values in a 128-deep K).
        K_p = _round_up(9 * Cin, _LANE)
        xi = jnp.pad(_im2col_3x3(x), ((0, 0), (0, 0), (0, 0), (0, K_p - 9 * Cin)))
        w1 = _prep_w_packed(params["w1"], K_p, Cout_p)
        th1 = _pick_tile_rows(H, W * (K_p * 4 + Cout_p * 10),
                              4 * K_p * Cout_p, vmem_limit, tile_rows)
        conv1, ps1, pq1 = _conv_pass_packed(xi, w1, tile_rows=th1,
                                            vmem_limit=vmem_limit)
    else:
        Cin_p = _round_up(Cin, _LANE)
        xp = jnp.pad(x, ((0, 0), (0, 0), (0, 0), (0, Cin_p - Cin)))
        w1 = _prep_w_taps(params["w1"], Cin_p, Cout_p)
        th1 = _pick_tile_rows(H, W * (Cin_p * 14 + Cout_p * 10),
                              36 * Cin_p * Cout_p, vmem_limit, tile_rows)
        conv1, ps1, pq1 = _conv_pass_9tap(xp, w1, tile_rows=th1,
                                          vmem_limit=vmem_limit)
    scale1, shift1 = _bn_affine(ps1, pq1, g1, be1, count, eps)

    # ---- stage 2: bn1 + relu fused into conv2 (no activation round trip) ----
    w2 = _prep_w_taps(params["w2"], Cout_p, Cout_p)
    th2 = _pick_tile_rows(H, W * (Cout_p * 14 + Cout_p * 10),
                          36 * Cout_p * Cout_p, vmem_limit, tile_rows)
    conv2, ps2, pq2 = _conv_pass_9tap(conv1, w2, tile_rows=th2,
                                      vmem_limit=vmem_limit,
                                      scale=scale1, shift=shift1)
    scale2, shift2 = _bn_affine(ps2, pq2, g2, be2, count, eps)

    # ---- final bn2 + relu (only remaining standalone pointwise pass) ----
    th3 = _pick_tile_rows(H, W * Cout_p * 16, 0, vmem_limit, tile_rows)
    y = _bn_relu_pass(conv2, scale2, shift2, tile_rows=th3,
                      vmem_limit=vmem_limit, out_dtype=jnp.float32)

    # TODO(synk): NHWC consumers could take `y` (optionally in bf16) directly and
    #             skip this channel crop + NCHW transpose epilogue (extra HBM
    #             round trip; most costly on v5e's single store port).
    return jnp.transpose(y[..., :Cout], (0, 3, 1, 2))


def init_params(key, in_channels, out_channels):
    k1, k2, k3, k4 = jax.random.split(key, 4)
    # PyTorch conv weight layout [Cout, Cin, kh, kw].
    return {
        "w1": 0.1 * jax.random.normal(k1, (out_channels, in_channels, 3, 3), jnp.float32),
        "b1": 0.05 * jax.random.normal(k3, (out_channels,), jnp.float32),   # cancelled by BN
        "g1": jnp.ones((out_channels,), jnp.float32),
        "beta1": jnp.zeros((out_channels,), jnp.float32),
        "w2": 0.1 * jax.random.normal(k2, (out_channels, out_channels, 3, 3), jnp.float32),
        "b2": 0.05 * jax.random.normal(k4, (out_channels,), jnp.float32),   # cancelled by BN
        "g2": jnp.ones((out_channels,), jnp.float32),
        "beta2": jnp.zeros((out_channels,), jnp.float32),
    }


# ----------------------------------------------------------------------------
# Pure-JAX reference with the same semantics / precision choices: bf16 conv
# operands with f32 accumulation, BN stats from the f32 conv, scale/shift
# applied to the bf16-rounded conv intermediate (mirrors the kernel), bias
# omitted (exactly cancelled by train-mode BN).
# ----------------------------------------------------------------------------
def _ref_stage(x_bf16, w_oihw, gamma, beta, eps=1e-5):
    w = jnp.transpose(w_oihw, (2, 3, 1, 0)).astype(jnp.bfloat16)   # HWIO
    y = lax.conv_general_dilated(
        x_bf16, w, window_strides=(1, 1), padding=((1, 1), (1, 1)),
        dimension_numbers=("NHWC", "HWIO", "NHWC"),
        preferred_element_type=jnp.float32)
    mean = jnp.mean(y, axis=(0, 1, 2))
    var = jnp.mean((y - mean) ** 2, axis=(0, 1, 2))
    scale = gamma * lax.rsqrt(var + eps)
    shift = beta - mean * scale
    y_r = y.astype(jnp.bfloat16).astype(jnp.float32)   # kernel stores the conv in bf16
    return jnp.maximum(y_r * scale + shift, 0.0)


def conv_block_reference(x_nchw, p, eps=1e-5):
    x = jnp.transpose(x_nchw, (0, 2, 3, 1)).astype(jnp.bfloat16)
    a1 = _ref_stage(x, p["w1"], p["g1"], p["beta1"], eps)
    a2 = _ref_stage(a1.astype(jnp.bfloat16), p["w2"], p["g2"], p["beta2"], eps)
    return jnp.transpose(a2, (0, 3, 1, 2))


if __name__ == "__main__":
    key = jax.random.PRNGKey(0)
    kx, kp = jax.random.split(key)

    N, Cin, Cout, H, W = 2, 4, 8, 16, 16
    x = jax.random.normal(kx, (N, Cin, H, W), jnp.float32)   # NCHW, like PyTorch
    params = init_params(kp, Cin, Cout)

    out = jax.block_until_ready(jax.jit(conv_block_forward)(x, params))
    ref = jax.block_until_ready(conv_block_reference(x, params))

    assert out.shape == (N, Cout, H, W), out.shape
    assert bool(jnp.isfinite(out).all())
    # bf16 conv intermediates (mirrored in the reference) leave occasional
    # one-ulp rounding disagreements; tolerance sized for that, still far below
    # any structural error (wrong halo row / tap / statistic) would produce.
    max_err = float(jnp.max(jnp.abs(out - ref)))
    mean_err = float(jnp.mean(jnp.abs(out - ref)))
    assert jnp.allclose(out, ref, rtol=3e-2, atol=3e-2), max_err
    assert mean_err < 3e-3, mean_err

    # Exercise the halo'd row-tiling path (R > 1 per image) and re-check.
    out_tiled = jax.block_until_ready(
        jax.jit(functools.partial(conv_block_forward, tile_rows=4))(x, params))
    max_err_t = float(jnp.max(jnp.abs(out_tiled - ref)))
    assert jnp.allclose(out_tiled, ref, rtol=3e-2, atol=3e-2), max_err_t
    assert float(jnp.mean(jnp.abs(out_tiled - ref))) < 3e-3

    print("KERNEL_OK")
</pallas_src>

<mosaic_0001>
module attributes {stable_mosaic.version = 11 : i64} {
  func.func @_conv_packed_kernel(%arg0: i32, %arg1: i32, %arg2: memref<1x16x16x128xbf16, #tpu.memory_space<vmem>>, %arg3: memref<1x128x128xbf16, #tpu.memory_space<vmem>>, %arg4: memref<1x16x16x128xbf16, #tpu.memory_space<vmem>>, %arg5: memref<1x1x1x128xf32, #tpu.memory_space<vmem>>, %arg6: memref<1x1x1x128xf32, #tpu.memory_space<vmem>>) attributes {dimension_semantics = [#tpu.dimension_semantics<parallel>, #tpu.dimension_semantics<parallel>], iteration_bounds = array<i64: 2, 1>, scalar_prefetch = 0 : i64, scratch_operands = 0 : i64, tpu.core_type = #tpu.core_type<tc>, window_params = [{transform_indices = @transform_0, window_bounds = array<i64: 1, 16, 16, 128>}, {pipeline_mode = #tpu.pipeline_mode<synchronous>, transform_indices = @transform_1, window_bounds = array<i64: 1, 128, 128>}, {transform_indices = @transform_2, window_bounds = array<i64: 1, 16, 16, 128>}, {transform_indices = @transform_3, window_bounds = array<i64: 1, 1, 1, 128>}, {transform_indices = @transform_4, window_bounds = array<i64: 1, 1, 1, 128>}]} {
    %c0 = arith.constant 0 : index
    %c0_0 = arith.constant 0 : index
    %c0_1 = arith.constant 0 : index
    %c0_2 = arith.constant 0 : index
    %0 = vector.load %arg2[%c0, %c0_0, %c0_1, %c0_2] : memref<1x16x16x128xbf16, #tpu.memory_space<vmem>>, vector<1x16x16x128xbf16>
    %1 = vector.shape_cast %0 : vector<1x16x16x128xbf16> to vector<16x16x128xbf16>
    %2 = vector.shape_cast %1 : vector<16x16x128xbf16> to vector<256x128xbf16>
    %c0_3 = arith.constant 0 : index
    %c0_4 = arith.constant 0 : index
    %c0_5 = arith.constant 0 : index
    %3 = vector.load %arg3[%c0_3, %c0_4, %c0_5] : memref<1x128x128xbf16, #tpu.memory_space<vmem>>, vector<1x128x128xbf16>
    %4 = vector.shape_cast %3 : vector<1x128x128xbf16> to vector<128x128xbf16>
    %cst = arith.constant dense<0.000000e+00> : vector<256x128xf32>
    %5 = tpu.matmul %2, %4, %cst {dimension_numbers = #tpu.dot_dimension_numbers<[1], [0], [0], [1], [0, 0, 1, 1], [], []>} : vector<256x128xbf16>, vector<128x128xbf16>, vector<256x128xf32> -> vector<256x128xf32>
    %6 = vector.shape_cast %5 : vector<256x128xf32> to vector<16x16x128xf32>
    %7 = arith.truncf %6 : vector<16x16x128xf32> to vector<16x16x128xbf16>
    %c0_6 = arith.constant 0 : index
    %c0_7 = arith.constant 0 : index
    %c0_8 = arith.constant 0 : index
    %c0_9 = arith.constant 0 : index
    %8 = vector.load %arg4[%c0_6, %c0_7, %c0_8, %c0_9] : memref<1x16x16x128xbf16, #tpu.memory_space<vmem>>, vector<1x16x16x128xbf16>
    %9 = vector.shape_cast %8 : vector<1x16x16x128xbf16> to vector<16x16x128xbf16>
    %10 = vector.shape_cast %7 : vector<16x16x128xbf16> to vector<1x16x16x128xbf16>
    tpu.vector_store %arg4[%c0_6, %c0_7, %c0_8, %c0_9], %10 {strides = array<i32>} : memref<1x16x16x128xbf16, #tpu.memory_space<vmem>>, vector<1x16x16x128xbf16>,
    %cst_10 = arith.constant dense<0.000000e+00> : vector<128xf32>
    %11 = vector.multi_reduction <add>, %5, %cst_10 [0] : vector<256x128xf32> to vector<128xf32>
    %12 = vector.shape_cast %11 : vector<128xf32> to vector<1x128xf32>
    %c0_11 = arith.constant 0 : index
    %c0_12 = arith.constant 0 : index
    %c0_13 = arith.constant 0 : index
    %c0_14 = arith.constant 0 : index
    %13 = vector.load %arg5[%c0_11, %c0_12, %c0_13, %c0_14] : memref<1x1x1x128xf32, #tpu.memory_space<vmem>>, vector<1x1x1x128xf32>
    %14 = vector.shape_cast %13 : vector<1x1x1x128xf32> to vector<1x128xf32>
    %15 = vector.shape_cast %12 : vector<1x128xf32> to vector<1x1x1x128xf32>
    tpu.vector_store %arg5[%c0_11, %c0_12, %c0_13, %c0_14], %15 {strides = array<i32>} : memref<1x1x1x128xf32, #tpu.memory_space<vmem>>, vector<1x1x1x128xf32>,
    %16 = arith.mulf %5, %5 : vector<256x128xf32>
    %cst_15 = arith.constant dense<0.000000e+00> : vector<128xf32>
    %17 = vector.multi_reduction <add>, %16, %cst_15 [0] : vector<256x128xf32> to vector<128xf32>
    %18 = vector.shape_cast %17 : vector<128xf32> to vector<1x128xf32>
    %c0_16 = arith.constant 0 : index
    %c0_17 = arith.constant 0 : index
    %c0_18 = arith.constant 0 : index
    %c0_19 = arith.constant 0 : index
    %19 = vector.load %arg6[%c0_16, %c0_17, %c0_18, %c0_19] : memref<1x1x1x128xf32, #tpu.memory_space<vmem>>, vector<1x1x1x128xf32>
    %20 = vector.shape_cast %19 : vector<1x1x1x128xf32> to vector<1x128xf32>
    %21 = vector.shape_cast %18 : vector<1x128xf32> to vector<1x1x1x128xf32>
    tpu.vector_store %arg6[%c0_16, %c0_17, %c0_18, %c0_19], %21 {strides = array<i32>} : memref<1x1x1x128xf32, #tpu.memory_space<vmem>>, vector<1x1x1x128xf32>,
    return
  }
  func.func @transform_0(%arg0: i32, %arg1: i32) -> (i32, i32, i32, i32) {
    %c0_i32 = arith.constant 0 : i32
    %c0_i32_0 = arith.constant 0 : i32
    %c0_i32_1 = arith.constant 0 : i32
    return %arg0, %arg1, %c0_i32, %c0_i32_0 : i32, i32, i32, i32
  }
  func.func @transform_1(%arg0: i32, %arg1: i32) -> (i32, i32, i32) {
    %c0_i32 = arith.constant 0 : i32
    %c0_i32_0 = arith.constant 0 : i32
    %c0_i32_1 = arith.constant 0 : i32
    %c0_i32_2 = arith.constant 0 : i32
    return %c0_i32, %c0_i32_0, %c0_i32_1 : i32, i32, i32
  }
  func.func @transform_2(%arg0: i32, %arg1: i32) -> (i32, i32, i32, i32) {
    %c0_i32 = arith.constant 0 : i32
    %c0_i32_0 = arith.constant 0 : i32
    %c0_i32_1 = arith.constant 0 : i32
    return %arg0, %arg1, %c0_i32, %c0_i32_0 : i32, i32, i32, i32
  }
  func.func @transform_3(%arg0: i32, %arg1: i32) -> (i32, i32, i32, i32) {
    %c0_i32 = arith.constant 0 : i32
    %c0_i32_0 = arith.constant 0 : i32
    %c0_i32_1 = arith.constant 0 : i32
    return %arg0, %arg1, %c0_i32, %c0_i32_0 : i32, i32, i32, i32
  }
  func.func @transform_4(%arg0: i32, %arg1: i32) -> (i32, i32, i32, i32) {
    %c0_i32 = arith.constant 0 : i32
    %c0_i32_0 = arith.constant 0 : i32
    %c0_i32_1 = arith.constant 0 : i32
    return %arg0, %arg1, %c0_i32, %c0_i32_0 : i32, i32, i32, i32
  }
}

module attributes {stable_mosaic.version = 11 : i64} {
  func.func @_conv3x3_kernel(%arg0: i32, %arg1: i32, %arg2: memref<1x16x16x128xbf16, #tpu.memory_space<vmem>>, %arg3: memref<1x2x16x128xbf16, #tpu.memory_space<vmem>>, %arg4: memref<9x128x128xbf16, #tpu.memory_space<vmem>>, %arg5: memref<1x128xf32, #tpu.memory_space<vmem>>, %arg6: memref<1x128xf32, #tpu.memory_space<vmem>>, %arg7: memref<1x16x16x128xbf16, #tpu.memory_space<vmem>>, %arg8: memref<1x1x1x128xf32, #tpu.memory_space<vmem>>, %arg9: memref<1x1x1x128xf32, #tpu.memory_space<vmem>>) attributes {dimension_semantics = [#tpu.dimension_semantics<parallel>, #tpu.dimension_semantics<parallel>], iteration_bounds = array<i64: 2, 1>, scalar_prefetch = 0 : i64, scratch_operands = 0 : i64, tpu.core_type = #tpu.core_type<tc>, window_params = [{transform_indices = @transform_0, window_bounds = array<i64: 1, 16, 16, 128>}, {transform_indices = @transform_1, window_bounds = array<i64: 1, 2, 16, 128>}, {pipeline_mode = #tpu.pipeline_mode<synchronous>, transform_indices = @transform_2, window_bounds = array<i64: 9, 128, 128>}, {pipeline_mode = #tpu.pipeline_mode<synchronous>, transform_indices = @transform_3, window_bounds = array<i64: 1, 128>}, {pipeline_mode = #tpu.pipeline_mode<synchronous>, transform_indices = @transform_4, window_bounds = array<i64: 1, 128>}, {transform_indices = @transform_5, window_bounds = array<i64: 1, 16, 16, 128>}, {transform_indices = @transform_6, window_bounds = array<i64: 1, 1, 1, 128>}, {transform_indices = @transform_7, window_bounds = array<i64: 1, 1, 1, 128>}]} {
    %c0 = arith.constant 0 : index
    %c0_0 = arith.constant 0 : index
    %c0_1 = arith.constant 0 : index
    %c0_2 = arith.constant 0 : index
    %0 = vector.load %arg2[%c0, %c0_0, %c0_1, %c0_2] : memref<1x16x16x128xbf16, #tpu.memory_space<vmem>>, vector<1x16x16x128xbf16>
    %1 = vector.shape_cast %0 : vector<1x16x16x128xbf16> to vector<16x16x128xbf16>
    %c0_3 = arith.constant 0 : index
    %c0_4 = arith.constant 0 : index
    %c0_5 = arith.constant 0 : index
    %c0_6 = arith.constant 0 : index
    %2 = vector.load %arg3[%c0_3, %c0_4, %c0_5, %c0_6] : memref<1x2x16x128xbf16, #tpu.memory_space<vmem>>, vector<1x2x16x128xbf16>
    %3 = vector.shape_cast %2 : vector<1x2x16x128xbf16> to vector<2x16x128xbf16>
    %4 = vector.extract_strided_slice %3 {offsets = [0, 0, 0], sizes = [1, 16, 128], strides = [1, 1, 1]} : vector<2x16x128xbf16> to vector<1x16x128xbf16>
    %5 = vector.extract_strided_slice %3 {offsets = [1, 0, 0], sizes = [1, 16, 128], strides = [1, 1, 1]} : vector<2x16x128xbf16> to vector<1x16x128xbf16>
    %c0_7 = arith.constant 0 : index
    %c0_8 = arith.constant 0 : index
    %6 = vector.load %arg5[%c0_7, %c0_8] : memref<1x128xf32, #tpu.memory_space<vmem>>, vector<1x128xf32>
    %c0_9 = arith.constant 0 : index
    %c0_10 = arith.constant 0 : index
    %7 = vector.load %arg6[%c0_9, %c0_10] : memref<1x128xf32, #tpu.memory_space<vmem>>, vector<1x128xf32>
    %c0_i32 = arith.constant 0 : i32
    %8 = arith.cmpi ne, %arg1, %c0_i32 : i32
    %9 = arith.extui %8 : i1 to i32
    %10 = arith.sitofp %9 : i32 to f32
    %c0_i32_11 = arith.constant 0 : i32
    %11 = arith.cmpi ne, %arg1, %c0_i32_11 : i32
    %12 = arith.extui %11 : i1 to i32
    %13 = arith.sitofp %12 : i32 to f32
    %14 = arith.extf %1 : vector<16x16x128xbf16> to vector<16x16x128xf32>
    %15 = vector.shape_cast %6 : vector<1x128xf32> to vector<1x1x128xf32>
    %16 = vector.broadcast %15 : vector<1x1x128xf32> to vector<16x16x128xf32>
    %17 = arith.mulf %14, %16 : vector<16x16x128xf32>
    %18 = vector.shape_cast %7 : vector<1x128xf32> to vector<1x1x128xf32>
    %19 = vector.broadcast %18 : vector<1x1x128xf32> to vector<16x16x128xf32>
    %20 = arith.addf %17, %19 : vector<16x16x128xf32>
    %cst = arith.constant 0.000000e+00 : f32
    %21 = vector.broadcast %cst : f32 to vector<16x16x128xf32>
    %22 = arith.maximumf %20, %21 : vector<16x16x128xf32>
    %23 = arith.truncf %22 : vector<16x16x128xf32> to vector<16x16x128xbf16>
    %24 = arith.extf %4 : vector<1x16x128xbf16> to vector<1x16x128xf32>
    %25 = vector.shape_cast %6 : vector<1x128xf32> to vector<1x1x128xf32>
    %26 = vector.broadcast %25 : vector<1x1x128xf32> to vector<1x16x128xf32>
    %27 = arith.mulf %24, %26 : vector<1x16x128xf32>
    %28 = vector.shape_cast %7 : vector<1x128xf32> to vector<1x1x128xf32>
    %29 = vector.broadcast %28 : vector<1x1x128xf32> to vector<1x16x128xf32>
    %30 = arith.addf %27, %29 : vector<1x16x128xf32>
    %cst_12 = arith.constant 0.000000e+00 : f32
    %31 = vector.broadcast %cst_12 : f32 to vector<1x16x128xf32>
    %32 = arith.maximumf %30, %31 : vector<1x16x128xf32>
    %33 = vector.broadcast %10 : f32 to vector<1x16x128xf32>
    %34 = arith.mulf %32, %33 : vector<1x16x128xf32>
    %35 = arith.truncf %34 : vector<1x16x128xf32> to vector<1x16x128xbf16>
    %36 = arith.extf %5 : vector<1x16x128xbf16> to vector<1x16x128xf32>
    %37 = vector.shape_cast %6 : vector<1x128xf32> to vector<1x1x128xf32>
    %38 = vector.broadcast %37 : vector<1x1x128xf32> to vector<1x16x128xf32>
    %39 = arith.mulf %36, %38 : vector<1x16x128xf32>
    %40 = vector.shape_cast %7 : vector<1x128xf32> to vector<1x1x128xf32>
    %41 = vector.broadcast %40 : vector<1x1x128xf32> to vector<1x16x128xf32>
    %42 = arith.addf %39, %41 : vector<1x16x128xf32>
    %cst_13 = arith.constant 0.000000e+00 : f32
    %43 = vector.broadcast %cst_13 : f32 to vector<1x16x128xf32>
    %44 = arith.maximumf %42, %43 : vector<1x16x128xf32>
    %45 = vector.broadcast %13 : f32 to vector<1x16x128xf32>
    %46 = arith.mulf %44, %45 : vector<1x16x128xf32>
    %47 = arith.truncf %46 : vector<1x16x128xf32> to vector<1x16x128xbf16>
    %48 = tpu.concatenate %35, %23, %47 in 0 : vector<1x16x128xbf16>, vector<16x16x128xbf16>, vector<1x16x128xbf16> -> vector<18x16x128xbf16>
    %cst_14 = arith.constant 0.000000e+00 : bf16
    %49 = vector.broadcast %cst_14 : bf16 to vector<18x1x128xbf16>
    %50 = vector.extract_strided_slice %48 {offsets = [0, 0, 0], sizes = [18, 15, 128], strides = [1, 1, 1]} : vector<18x16x128xbf16> to vector<18x15x128xbf16>
    %51 = tpu.concatenate %49, %50 in 1 : vector<18x1x128xbf16>, vector<18x15x128xbf16> -> vector<18x16x128xbf16>
    %52 = vector.extract_strided_slice %48 {offsets = [0, 1, 0], sizes = [18, 15, 128], strides = [1, 1, 1]} : vector<18x16x128xbf16> to vector<18x15x128xbf16>
    %53 = tpu.concatenate %52, %49 in 1 : vector<18x15x128xbf16>, vector<18x1x128xbf16> -> vector<18x16x128xbf16>
    %cst_15 = arith.constant 0.000000e+00 : f32
    %54 = vector.broadcast %cst_15 : f32 to vector<256x128xf32>
    %55 = vector.extract_strided_slice %51 {offsets = [0, 0, 0], sizes = [16, 16, 128], strides = [1, 1, 1]} : vector<18x16x128xbf16> to vector<16x16x128xbf16>
    %56 = vector.shape_cast %55 : vector<16x16x128xbf16> to vector<256x128xbf16>
    %c0_16 = arith.constant 0 : index
    %c0_17 = arith.constant 0 : index
    %c0_18 = arith.constant 0 : index
    %57 = vector.load %arg4[%c0_16, %c0_17, %c0_18] : memref<9x128x128xbf16, #tpu.memory_space<vmem>>, vector<1x128x128xbf16>
    %58 = vector.shape_cast %57 : vector<1x128x128xbf16> to vector<128x128xbf16>
    %cst_19 = arith.constant dense<0.000000e+00> : vector<256x128xf32>
    %59 = tpu.matmul %56, %58, %cst_19 {dimension_numbers = #tpu.dot_dimension_numbers<[1], [0], [0], [1], [0, 0, 1, 1], [], []>} : vector<256x128xbf16>, vector<128x128xbf16>, vector<256x128xf32> -> vector<256x128xf32>
    %60 = arith.addf %54, %59 : vector<256x128xf32>
    %61 = vector.extract_strided_slice %48 {offsets = [0, 0, 0], sizes = [16, 16, 128], strides = [1, 1, 1]} : vector<18x16x128xbf16> to vector<16x16x128xbf16>
    %62 = vector.shape_cast %61 : vector<16x16x128xbf16> to vector<256x128xbf16>
    %c1 = arith.constant 1 : index
    %c0_20 = arith.constant 0 : index
    %c0_21 = arith.constant 0 : index
    %63 = vector.load %arg4[%c1, %c0_20, %c0_21] : memref<9x128x128xbf16, #tpu.memory_space<vmem>>, vector<1x128x128xbf16>
    %64 = vector.shape_cast %63 : vector<1x128x128xbf16> to vector<128x128xbf16>
    %cst_22 = arith.constant dense<0.000000e+00> : vector<256x128xf32>
    %65 = tpu.matmul %62, %64, %cst_22 {dimension_numbers = #tpu.dot_dimension_numbers<[1], [0], [0], [1], [0, 0, 1, 1], [], []>} : vector<256x128xbf16>, vector<128x128xbf16>, vector<256x128xf32> -> vector<256x128xf32>
    %66 = arith.addf %60, %65 : vector<256x128xf32>
    %67 = vector.extract_strided_slice %53 {offsets = [0, 0, 0], sizes = [16, 16, 128], strides = [1, 1, 1]} : vector<18x16x128xbf16> to vector<16x16x128xbf16>
    %68 = vector.shape_cast %67 : vector<16x16x128xbf16> to vector<256x128xbf16>
    %c2 = arith.constant 2 : index
    %c0_23 = arith.constant 0 : index
    %c0_24 = arith.constant 0 : index
    %69 = vector.load %arg4[%c2, %c0_23, %c0_24] : memref<9x128x128xbf16, #tpu.memory_space<vmem>>, vector<1x128x128xbf16>
    %70 = vector.shape_cast %69 : vector<1x128x128xbf16> to vector<128x128xbf16>
    %cst_25 = arith.constant dense<0.000000e+00> : vector<256x128xf32>
    %71 = tpu.matmul %68, %70, %cst_25 {dimension_numbers = #tpu.dot_dimension_numbers<[1], [0], [0], [1], [0, 0, 1, 1], [], []>} : vector<256x128xbf16>, vector<128x128xbf16>, vector<256x128xf32> -> vector<256x128xf32>
    %72 = arith.addf %66, %71 : vector<256x128xf32>
    %73 = vector.extract_strided_slice %51 {offsets = [1, 0, 0], sizes = [16, 16, 128], strides = [1, 1, 1]} : vector<18x16x128xbf16> to vector<16x16x128xbf16>
    %74 = vector.shape_cast %73 : vector<16x16x128xbf16> to vector<256x128xbf16>
    %c3 = arith.constant 3 : index
    %c0_26 = arith.constant 0 : index
    %c0_27 = arith.constant 0 : index
    %75 = vector.load %arg4[%c3, %c0_26, %c0_27] : memref<9x128x128xbf16, #tpu.memory_space<vmem>>, vector<1x128x128xbf16>
    %76 = vector.shape_cast %75 : vector<1x128x128xbf16> to vector<128x128xbf16>
    %cst_28 = arith.constant dense<0.000000e+00> : vector<256x128xf32>
    %77 = tpu.matmul %74, %76, %cst_28 {dimension_numbers = #tpu.dot_dimension_numbers<[1], [0], [0], [1], [0, 0, 1, 1], [], []>} : vector<256x128xbf16>, vector<128x128xbf16>, vector<256x128xf32> -> vector<256x128xf32>
    %78 = arith.addf %72, %77 : vector<256x128xf32>
    %79 = vector.extract_strided_slice %48 {offsets = [1, 0, 0], sizes = [16, 16, 128], strides = [1, 1, 1]} : vector<18x16x128xbf16> to vector<16x16x128xbf16>
    %80 = vector.shape_cast %79 : vector<16x16x128xbf16> to vector<256x128xbf16>
    %c4 = arith.constant 4 : index
    %c0_29 = arith.constant 0 : index
    %c0_30 = arith.constant 0 : index
    %81 = vector.load %arg4[%c4, %c0_29, %c0_30] : memref<9x128x128xbf16, #tpu.memory_space<vmem>>, vector<1x128x128xbf16>
    %82 = vector.shape_cast %81 : vector<1x128x128xbf16> to vector<128x128xbf16>
    %cst_31 = arith.constant dense<0.000000e+00> : vector<256x128xf32>
    %83 = tpu.matmul %80, %82, %cst_31 {dimension_numbers = #tpu.dot_dimension_numbers<[1], [0], [0], [1], [0, 0, 1, 1], [], []>} : vector<256x128xbf16>, vector<128x128xbf16>, vector<256x128xf32> -> vector<256x128xf32>
    %84 = arith.addf %78, %83 : vector<256x128xf32>
    %85 = vector.extract_strided_slice %53 {offsets = [1, 0, 0], sizes = [16, 16, 128], strides = [1, 1, 1]} : vector<18x16x128xbf16> to vector<16x16x128xbf16>
    %86 = vector.shape_cast %85 : vector<16x16x128xbf16> to vector<256x128xbf16>
    %c5 = arith.constant 5 : index
    %c0_32 = arith.constant 0 : index
    %c0_33 = arith.constant 0 : index
    %87 = vector.load %arg4[%c5, %c0_32, %c0_33] : memref<9x128x128xbf16, #tpu.memory_space<vmem>>, vector<1x128x128xbf16>
    %88 = vector.shape_cast %87 : vector<1x128x128xbf16> to vector<128x128xbf16>
    %cst_34 = arith.constant dense<0.000000e+00> : vector<256x128xf32>
    %89 = tpu.matmul %86, %88, %cst_34 {dimension_numbers = #tpu.dot_dimension_numbers<[1], [0], [0], [1], [0, 0, 1, 1], [], []>} : vector<256x128xbf16>, vector<128x128xbf16>, vector<256x128xf32> -> vector<256x128xf32>
    %90 = arith.addf %84, %89 : vector<256x128xf32>
    %91 = vector.extract_strided_slice %51 {offsets = [2, 0, 0], sizes = [16, 16, 128], strides = [1, 1, 1]} : vector<18x16x128xbf16> to vector<16x16x128xbf16>
    %92 = vector.shape_cast %91 : vector<16x16x128xbf16> to vector<256x128xbf16>
    %c6 = arith.constant 6 : index
    %c0_35 = arith.constant 0 : index
    %c0_36 = arith.constant 0 : index
    %93 = vector.load %arg4[%c6, %c0_35, %c0_36] : memref<9x128x128xbf16, #tpu.memory_space<vmem>>, vector<1x128x128xbf16>
    %94 = vector.shape_cast %93 : vector<1x128x128xbf16> to vector<128x128xbf16>
    %cst_37 = arith.constant dense<0.000000e+00> : vector<256x128xf32>
    %95 = tpu.matmul %92, %94, %cst_37 {dimension_numbers = #tpu.dot_dimension_numbers<[1], [0], [0], [1], [0, 0, 1, 1], [], []>} : vector<256x128xbf16>, vector<128x128xbf16>, vector<256x128xf32> -> vector<256x128xf32>
    %96 = arith.addf %90, %95 : vector<256x128xf32>
    %97 = vector.extract_strided_slice %48 {offsets = [2, 0, 0], sizes = [16, 16, 128], strides = [1, 1, 1]} : vector<18x16x128xbf16> to vector<16x16x128xbf16>
    %98 = vector.shape_cast %97 : vector<16x16x128xbf16> to vector<256x128xbf16>
    %c7 = arith.constant 7 : index
    %c0_38 = arith.constant 0 : index
    %c0_39 = arith.constant 0 : index
    %99 = vector.load %arg4[%c7, %c0_38, %c0_39] : memref<9x128x128xbf16, #tpu.memory_space<vmem>>, vector<1x128x128xbf16>
    %100 = vector.shape_cast %99 : vector<1x128x128xbf16> to vector<128x128xbf16>
    %cst_40 = arith.constant dense<0.000000e+00> : vector<256x128xf32>
    %101 = tpu.matmul %98, %100, %cst_40 {dimension_numbers = #tpu.dot_dimension_numbers<[1], [0], [0], [1], [0, 0, 1, 1], [], []>} : vector<256x128xbf16>, vector<128x128xbf16>, vector<256x128xf32> -> vector<256x128xf32>
    %102 = arith.addf %96, %101 : vector<256x128xf32>
    %103 = vector.extract_strided_slice %53 {offsets = [2, 0, 0], sizes = [16, 16, 128], strides = [1, 1, 1]} : vector<18x16x128xbf16> to vector<16x16x128xbf16>
    %104 = vector.shape_cast %103 : vector<16x16x128xbf16> to vector<256x128xbf16>
    %c8 = arith.constant 8 : index
    %c0_41 = arith.constant 0 : index
    %c0_42 = arith.constant 0 : index
    %105 = vector.load %arg4[%c8, %c0_41, %c0_42] : memref<9x128x128xbf16, #tpu.memory_space<vmem>>, vector<1x128x128xbf16>
    %106 = vector.shape_cast %105 : vector<1x128x128xbf16> to vector<128x128xbf16>
    %cst_43 = arith.constant dense<0.000000e+00> : vector<256x128xf32>
    %107 = tpu.matmul %104, %106, %cst_43 {dimension_numbers = #tpu.dot_dimension_numbers<[1], [0], [0], [1], [0, 0, 1, 1], [], []>} : vector<256x128xbf16>, vector<128x128xbf16>, vector<256x128xf32> -> vector<256x128xf32>
    %108 = arith.addf %102, %107 : vector<256x128xf32>
    %109 = vector.shape_cast %108 : vector<256x128xf32> to vector<16x16x128xf32>
    %110 = arith.truncf %109 : vector<16x16x128xf32> to vector<16x16x128xbf16>
    %c0_44 = arith.constant 0 : index
    %c0_45 = arith.constant 0 : index
    %c0_46 = arith.constant 0 : index
    %c0_47 = arith.constant 0 : index
    %111 = vector.load %arg7[%c0_44, %c0_45, %c0_46, %c0_47] : memref<1x16x16x128xbf16, #tpu.memory_space<vmem>>, vector<1x16x16x128xbf16>
    %112 = vector.shape_cast %111 : vector<1x16x16x128xbf16> to vector<16x16x128xbf16>
    %113 = vector.shape_cast %110 : vector<16x16x128xbf16> to vector<1x16x16x128xbf16>
    tpu.vector_store %arg7[%c0_44, %c0_45, %c0_46, %c0_47], %113 {strides = array<i32>} : memref<1x16x16x128xbf16, #tpu.memory_space<vmem>>, vector<1x16x16x128xbf16>,
    %cst_48 = arith.constant dense<0.000000e+00> : vector<128xf32>
    %114 = vector.multi_reduction <add>, %108, %cst_48 [0] : vector<256x128xf32> to vector<128xf32>
    %115 = vector.shape_cast %114 : vector<128xf32> to vector<1x128xf32>
    %c0_49 = arith.constant 0 : index
    %c0_50 = arith.constant 0 : index
    %c0_51 = arith.constant 0 : index
    %c0_52 = arith.constant 0 : index
    %116 = vector.load %arg8[%c0_49, %c0_50, %c0_51, %c0_52] : memref<1x1x1x128xf32, #tpu.memory_space<vmem>>, vector<1x1x1x128xf32>
    %117 = vector.shape_cast %116 : vector<1x1x1x128xf32> to vector<1x128xf32>
    %118 = vector.shape_cast %115 : vector<1x128xf32> to vector<1x1x1x128xf32>
    tpu.vector_store %arg8[%c0_49, %c0_50, %c0_51, %c0_52], %118 {strides = array<i32>} : memref<1x1x1x128xf32, #tpu.memory_space<vmem>>, vector<1x1x1x128xf32>,
    %119 = arith.mulf %108, %108 : vector<256x128xf32>
    %cst_53 = arith.constant dense<0.000000e+00> : vector<128xf32>
    %120 = vector.multi_reduction <add>, %119, %cst_53 [0] : vector<256x128xf32> to vector<128xf32>
    %121 = vector.shape_cast %120 : vector<128xf32> to vector<1x128xf32>
    %c0_54 = arith.constant 0 : index
    %c0_55 = arith.constant 0 : index
    %c0_56 = arith.constant 0 : index
    %c0_57 = arith.constant 0 : index
    %122 = vector.load %arg9[%c0_54, %c0_55, %c0_56, %c0_57] : memref<1x1x1x128xf32, #tpu.memory_space<vmem>>, vector<1x1x1x128xf32>
    %123 = vector.shape_cast %122 : vector<1x1x1x128xf32> to vector<1x128xf32>
    %124 = vector.shape_cast %121 : vector<1x128xf32> to vector<1x1x1x128xf32>
    tpu.vector_store %arg9[%c0_54, %c0_55, %c0_56, %c0_57], %124 {strides = array<i32>} : memref<1x1x1x128xf32, #tpu.memory_space<vmem>>, vector<1x1x1x128xf32>,
    return
  }
  func.func @transform_0(%arg0: i32, %arg1: i32) -> (i32, i32, i32, i32) {
    %c0_i32 = arith.constant 0 : i32
    %c0_i32_0 = arith.constant 0 : i32
    %c0_i32_1 = arith.constant 0 : i32
    return %arg0, %arg1, %c0_i32, %c0_i32_0 : i32, i32, i32, i32
  }
  func.func @transform_1(%arg0: i32, %arg1: i32) -> (i32, i32, i32, i32) {
    %c1_i32 = arith.constant 1 : i32
    %0 = arith.muli %arg0, %c1_i32 : i32
    %1 = arith.addi %0, %arg1 : i32
    %c0_i32 = arith.constant 0 : i32
    %c0_i32_0 = arith.constant 0 : i32
    %c0_i32_1 = arith.constant 0 : i32
    %c0_i32_2 = arith.constant 0 : i32
    return %1, %c0_i32, %c0_i32_0, %c0_i32_1 : i32, i32, i32, i32
  }
  func.func @transform_2(%arg0: i32, %arg1: i32) -> (i32, i32, i32) {
    %c0_i32 = arith.constant 0 : i32
    %c0_i32_0 = arith.constant 0 : i32
    %c0_i32_1 = arith.constant 0 : i32
    %c0_i32_2 = arith.constant 0 : i32
    return %c0_i32, %c0_i32_0, %c0_i32_1 : i32, i32, i32
  }
  func.func @transform_3(%arg0: i32, %arg1: i32) -> (i32, i32) {
    %c0_i32 = arith.constant 0 : i32
    %c0_i32_0 = arith.constant 0 : i32
    %c0_i32_1 = arith.constant 0 : i32
    return %c0_i32, %c0_i32_0 : i32, i32
  }
  func.func @transform_4(%arg0: i32, %arg1: i32) -> (i32, i32) {
    %c0_i32 = arith.constant 0 : i32
    %c0_i32_0 = arith.constant 0 : i32
    %c0_i32_1 = arith.constant 0 : i32
    return %c0_i32, %c0_i32_0 : i32, i32
  }
  func.func @transform_5(%arg0: i32, %arg1: i32) -> (i32, i32, i32, i32) {
    %c0_i32 = arith.constant 0 : i32
    %c0_i32_0 = arith.constant 0 : i32
    %c0_i32_1 = arith.constant 0 : i32
    return %arg0, %arg1, %c0_i32, %c0_i32_0 : i32, i32, i32, i32
  }
  func.func @transform_6(%arg0: i32, %arg1: i32) -> (i32, i32, i32, i32) {
    %c0_i32 = arith.constant 0 : i32
    %c0_i32_0 = arith.constant 0 : i32
    %c0_i32_1 = arith.constant 0 : i32
    return %arg0, %arg1, %c0_i32, %c0_i32_0 : i32, i32, i32, i32
  }
  func.func @transform_7(%arg0: i32, %arg1: i32) -> (i32, i32, i32, i32) {
    %c0_i32 = arith.constant 0 : i32
    %c0_i32_0 = arith.constant 0 : i32
    %c0_i32_1 = arith.constant 0 : i32
    return %arg0, %arg1, %c0_i32, %c0_i32_0 : i32, i32, i32, i32
  }
}

module attributes {stable_mosaic.version = 11 : i64} {
  func.func @_bn_relu_kernel(%arg0: i32, %arg1: i32, %arg2: memref<1x16x16x128xbf16, #tpu.memory_space<vmem>>, %arg3: memref<1x128xf32, #tpu.memory_space<vmem>>, %arg4: memref<1x128xf32, #tpu.memory_space<vmem>>, %arg5: memref<1x16x16x128xf32, #tpu.memory_space<vmem>>) attributes {dimension_semantics = [#tpu.dimension_semantics<parallel>, #tpu.dimension_semantics<parallel>], iteration_bounds = array<i64: 2, 1>, scalar_prefetch = 0 : i64, scratch_operands = 0 : i64, tpu.core_type = #tpu.core_type<tc>, window_params = [{transform_indices = @transform_0, window_bounds = array<i64: 1, 16, 16, 128>}, {pipeline_mode = #tpu.pipeline_mode<synchronous>, transform_indices = @transform_1, window_bounds = array<i64: 1, 128>}, {pipeline_mode = #tpu.pipeline_mode<synchronous>, transform_indices = @transform_2, window_bounds = array<i64: 1, 128>}, {transform_indices = @transform_3, window_bounds = array<i64: 1, 16, 16, 128>}]} {
    %c0 = arith.constant 0 : index
    %c0_0 = arith.constant 0 : index
    %c0_1 = arith.constant 0 : index
    %c0_2 = arith.constant 0 : index
    %0 = vector.load %arg2[%c0, %c0_0, %c0_1, %c0_2] : memref<1x16x16x128xbf16, #tpu.memory_space<vmem>>, vector<1x16x16x128xbf16>
    %1 = vector.shape_cast %0 : vector<1x16x16x128xbf16> to vector<16x16x128xbf16>
    %c0_3 = arith.constant 0 : index
    %c0_4 = arith.constant 0 : index
    %2 = vector.load %arg3[%c0_3, %c0_4] : memref<1x128xf32, #tpu.memory_space<vmem>>, vector<1x128xf32>
    %3 = arith.extf %1 : vector<16x16x128xbf16> to vector<16x16x128xf32>
    %4 = vector.shape_cast %2 : vector<1x128xf32> to vector<1x1x128xf32>
    %5 = vector.broadcast %4 : vector<1x1x128xf32> to vector<16x16x128xf32>
    %6 = arith.mulf %3, %5 : vector<16x16x128xf32>
    %c0_5 = arith.constant 0 : index
    %c0_6 = arith.constant 0 : index
    %7 = vector.load %arg4[%c0_5, %c0_6] : memref<1x128xf32, #tpu.memory_space<vmem>>, vector<1x128xf32>
    %8 = vector.shape_cast %7 : vector<1x128xf32> to vector<1x1x128xf32>
    %9 = vector.broadcast %8 : vector<1x1x128xf32> to vector<16x16x128xf32>
    %10 = arith.addf %6, %9 : vector<16x16x128xf32>
    %cst = arith.constant 0.000000e+00 : f32
    %11 = vector.broadcast %cst : f32 to vector<16x16x128xf32>
    %12 = arith.maximumf %10, %11 : vector<16x16x128xf32>
    %c0_7 = arith.constant 0 : index
    %c0_8 = arith.constant 0 : index
    %c0_9 = arith.constant 0 : index
    %c0_10 = arith.constant 0 : index
    %13 = vector.load %arg5[%c0_7, %c0_8, %c0_9, %c0_10] : memref<1x16x16x128xf32, #tpu.memory_space<vmem>>, vector<1x16x16x128xf32>
    %14 = vector.shape_cast %13 : vector<1x16x16x128xf32> to vector<16x16x128xf32>
    %15 = vector.shape_cast %12 : vector<16x16x128xf32> to vector<1x16x16x128xf32>
    tpu.vector_store %arg5[%c0_7, %c0_8, %c0_9, %c0_10], %15 {strides = array<i32>} : memref<1x16x16x128xf32, #tpu.memory_space<vmem>>, vector<1x16x16x128xf32>,
    return
  }
  func.func @transform_0(%arg0: i32, %arg1: i32) -> (i32, i32, i32, i32) {
    %c0_i32 = arith.constant 0 : i32
    %c0_i32_0 = arith.constant 0 : i32
    %c0_i32_1 = arith.constant 0 : i32
    return %arg0, %arg1, %c0_i32, %c0_i32_0 : i32, i32, i32, i32
  }
  func.func @transform_1(%arg0: i32, %arg1: i32) -> (i32, i32) {
    %c0_i32 = arith.constant 0 : i32
    %c0_i32_0 = arith.constant 0 : i32
    %c0_i32_1 = arith.constant 0 : i32
    return %c0_i32, %c0_i32_0 : i32, i32
  }
  func.func @transform_2(%arg0: i32, %arg1: i32) -> (i32, i32) {
    %c0_i32 = arith.constant 0 : i32
    %c0_i32_0 = arith.constant 0 : i32
    %c0_i32_1 = arith.constant 0 : i32
    return %c0_i32, %c0_i32_0 : i32, i32
  }
  func.func @transform_3(%arg0: i32, %arg1: i32) -> (i32, i32, i32, i32) {
    %c0_i32 = arith.constant 0 : i32
    %c0_i32_0 = arith.constant 0 : i32
    %c0_i32_1 = arith.constant 0 : i32
    return %arg0, %arg1, %c0_i32, %c0_i32_0 : i32, i32, i32, i32
  }
}

</mosaic_0001>

<bundles_post_ra>
// kernel: conv_block_forward.3
= control target key start
LH: loop header
LB: loop body
LE: loop exit
PB: predicated region body
PF: predicated region fallthrough
CT: control target
= control target key end

     0   :  { %s1219_s15 = smov 0   ;;  %s1221_s16 = smov 0   ;;  %s1445_s0 = inlined_call_operand.vmem [shape: bf16[2,16,16,128], index: 0, kind: input, shape index: {}]   ;;  %s1446_s1 = inlined_call_operand.vmem [shape: bf16[1,128,128], index: 1, kind: input, shape index: {}]   ;;  %s1447_s2 = inlined_call_operand.vmem [shape: bf16[2,16,16,128], index: 2, kind: output, shape index: {0}]   ;;  %s1448_s3 = inlined_call_operand.vmem [shape: f32[2,1,1,128], index: 3, kind: output, shape index: {1}]   ;;  %s1449_s4 = inlined_call_operand.vmem [shape: f32[2,1,1,128], index: 4, kind: output, shape index: {2}]  }
   0x1   :  { %s1223_s17 = smov 0  }
   0x2 LB: > { %s27_s18 = sadd.s32 1, %s1188_s16  ;;  %p898_p0 = scmp.ge.s32.totalorder %s1192_s17, 1  ;;  %s1192_s17 = sphi %s1223_s17, %s15_s17   ;;  %s1188_s16 = sphi %s1221_s16, %s1451_s16   ;;  %s1184_s15 = sphi %s1219_s15, %s1450_s15  }
   0x3   : > { %p29_p1 = scmp.ge.s32.totalorder %s27_s18, 2  ;;  %p193_p2 = scmp.lt.s32.totalorder %s1192_s17, 3 }
   0x5   : > { %s1453_s18 = smov (%p29_p1, %s27_s18), 0  ;;  %p194_p3 = pnand %p898_p0, %p193_p2 }
   0x6   : > { %p242_p4 = scmp.lt.s32.totalorder (!%p194_p3), %s1184_s15, 1 }
   0x7   : > { %197 = sbr.rel (%p194_p3) target bundleno = 291 (0x123), region = 28 }
   0xc   : > { %v1026_v0 = vld [vmem:[%s1446_s1 + $0x38] sm:$0xff]  ;;  %v1025_v1 = vld [vmem:[%s1446_s1 + $0x30] sm:$0xff]  ;;  %v1024_v2 = vld [vmem:[%s1446_s1 + $0x28] sm:$0xff]  ;;  %s1455_s15 = smov (!%p242_p4, %s1184_s15), 1 }
   0xd   : > { %467 = vmatpush.bf16.msra.mxu0 %v1026_v0  ;;  %1122 = vmatpush.bf16.msra.mxu1 %v1026_v0  ;;  %v1023_v3 = vld [vmem:[%s1446_s1 + $0x20] sm:$0xff]  ;;  %v1022_v4 = vld [vmem:[%s1446_s1 + $0x18] sm:$0xff]  ;;  %v1021_v5 = vld [vmem:[%s1446_s1 + $0x10] sm:$0xff]  ;;  %s1001_s7 = sshll.u32 %s1455_s15, 7  ;;  %s268_s22 = scalar_lea.vmem %s1448_s3, %s1455_s15 }
   0xe   : > { %1123 = vmatpush.bf16.msra.mxu2 %v1026_v0  ;;  %1124 = vmatpush.bf16.msra.mxu3 %v1026_v0  ;;  %v1020_v6 = vld [vmem:[%s1446_s1 + $0x8] sm:$0xff]  ;;  %v1019_v7 = vld [vmem:[%s1446_s1] sm:$0xff]  ;;  %s1273_s12 = scalar_lea.vmem %s1445_s0, %s1001_s7  ;;  %s1300_s19 = scalar_lea.vmem %s1447_s2, %s1001_s7 }
   0xf   : > { %v1003_v8 = vld [vmem:[%s1273_s12] sm:$0xff]  ;;  %v1004_v12 = vld [vmem:[%s1273_s12 + $0x8] sm:$0xff]  ;;  %v1005_v16 = vld [vmem:[%s1273_s12 + $0x10] sm:$0xff]  ;;  %s274_s25 = scalar_lea.vmem %s1449_s4, %s1455_s15 }
  0x10   : > { %v1007_v9 = vld [vmem:[%s1273_s12 + $0x20] sm:$0xff]  ;;  %v1008_v13 = vld [vmem:[%s1273_s12 + $0x28] sm:$0xff]  ;;  %v1009_v17 = vld [vmem:[%s1273_s12 + $0x30] sm:$0xff] }
  0x11   : > { %468 = vmatpush.bf16.msra.mxu0 %v1025_v1  ;;  %1125 = vmatpush.bf16.msra.mxu1 %v1025_v1  ;;  %v1011_v10 = vld [vmem:[%s1273_s12 + $0x40] sm:$0xff]  ;;  %v1012_v14 = vld [vmem:[%s1273_s12 + $0x48] sm:$0xff]  ;;  %v1013_v18 = vld [vmem:[%s1273_s12 + $0x50] sm:$0xff] }
  0x12   : > { %1126 = vmatpush.bf16.msra.mxu2 %v1025_v1  ;;  %1127 = vmatpush.bf16.msra.mxu3 %v1025_v1  ;;  %v1015_v11 = vld [vmem:[%s1273_s12 + $0x60] sm:$0xff]  ;;  %v1016_v15 = vld [vmem:[%s1273_s12 + $0x68] sm:$0xff]  ;;  %v1017_v19 = vld [vmem:[%s1273_s12 + $0x70] sm:$0xff] }
  0x13   : > { %v1006_v20 = vld [vmem:[%s1273_s12 + $0x18] sm:$0xff] }
  0x14   : > { %v1010_v21 = vld [vmem:[%s1273_s12 + $0x38] sm:$0xff] }
  0x15   : > { %469 = vmatpush.bf16.msra.mxu0 %v1024_v2  ;;  %1128 = vmatpush.bf16.msra.mxu1 %v1024_v2  ;;  %v1014_v22 = vld [vmem:[%s1273_s12 + $0x58] sm:$0xff] }
  0x16   : > { %1129 = vmatpush.bf16.msra.mxu2 %v1024_v2  ;;  %1130 = vmatpush.bf16.msra.mxu3 %v1024_v2  ;;  %v1018_v23 = vld [vmem:[%s1273_s12 + $0x78] sm:$0xff] }
  0x19   : > { %470 = vmatpush.bf16.msra.mxu0 %v1023_v3  ;;  %1131 = vmatpush.bf16.msra.mxu1 %v1023_v3 }
  0x1a   : > { %1132 = vmatpush.bf16.msra.mxu2 %v1023_v3  ;;  %1133 = vmatpush.bf16.msra.mxu3 %v1023_v3 }
  0x1d   : > { %471 = vmatpush.bf16.msra.mxu0 %v1022_v4  ;;  %1134 = vmatpush.bf16.msra.mxu1 %v1022_v4 }
  0x1e   : > { %1135 = vmatpush.bf16.msra.mxu2 %v1022_v4  ;;  %1136 = vmatpush.bf16.msra.mxu3 %v1022_v4 }
  0x21   : > { %472 = vmatpush.bf16.msra.mxu0 %v1021_v5  ;;  %1137 = vmatpush.bf16.msra.mxu1 %v1021_v5 }
  0x22   : > { %1138 = vmatpush.bf16.msra.mxu2 %v1021_v5  ;;  %1139 = vmatpush.bf16.msra.mxu3 %v1021_v5 }
  0x25   : > { %473 = vmatpush.bf16.msra.mxu0 %v1020_v6  ;;  %1140 = vmatpush.bf16.msra.mxu1 %v1020_v6 }
  0x26   : > { %1141 = vmatpush.bf16.msra.mxu2 %v1020_v6  ;;  %1142 = vmatpush.bf16.msra.mxu3 %v1020_v6 }
  0x29   : > { %474 = vmatpush.bf16.msra.mxu0 %v1019_v7  ;;  %1143 = vmatpush.bf16.msra.mxu1 %v1019_v7 }
  0x2a   : > { %1144 = vmatpush.bf16.msra.mxu2 %v1019_v7  ;;  %1145 = vmatpush.bf16.msra.mxu3 %v1019_v7 }
  0x2c   : > { %475 = vmatmul.bf16.vlgmr.msra.gmra.mxu0 %v1003_v8  ;;  %495 = vmatmul.bf16.vlgmr.msra.gmra.mxu1 %v1007_v9 }
  0x2d   : > { %515 = vmatmul.bf16.vlgmr.msra.gmra.mxu2 %v1011_v10  ;;  %535 = vmatmul.bf16.vlgmr.msra.gmra.mxu3 %v1015_v11 }
  0x3c   : > { %480 = vmatmul.bf16.gmra.mxu0 %v1004_v12  ;;  %500 = vmatmul.bf16.gmra.mxu1 %v1008_v13 }
  0x3d   : > { %520 = vmatmul.bf16.gmra.mxu2 %v1012_v14  ;;  %540 = vmatmul.bf16.gmra.mxu3 %v1016_v15 }
  0x4c   : > { %485 = vmatmul.bf16.gmra.mxu0 %v1005_v16  ;;  %505 = vmatmul.bf16.gmra.mxu1 %v1009_v17 }
  0x4d   : > { %525 = vmatmul.bf16.gmra.mxu2 %v1013_v18  ;;  %545 = vmatmul.bf16.gmra.mxu3 %v1017_v19 }
  0x5c   : > { %490 = vmatmul.bf16.gmra.mxu0 %v1006_v20  ;;  %510 = vmatmul.bf16.gmra.mxu1 %v1010_v21 }
  0x5d   : > { %530 = vmatmul.bf16.gmra.mxu2 %v1014_v22  ;;  %550 = vmatmul.bf16.gmra.mxu3 %v1018_v23 }
  0xa9   : > { %v476_v24 = vpop.f32.mrf.mxu0  ;;  %v1291_v25 = vpop.f32.mrf.mxu1 }
  0xaa   : > { %v658_v57 = vmul.f32 %v476_v24, %v476_v24 }
  0xb0   : > { %v1293_v26 = vpop.f32.mrf.mxu2  ;;  %v1306_v31 = vpop.f32.mrf.mxu3 }
  0xb1   : > { %v478_v27 = vpop.f32.mrf.mxu0  ;;  %v1302_v28 = vpop.f32.mrf.mxu1 }
  0xb2   : > { %v1030_v29 = vpack.c.bf16 %v478_v27, %v476_v24  ;;  %v1050_v30 = vpack.c.bf16 %v1302_v28, %v1291_v25  ;;  %v659_v56 = vmul.f32 %v478_v27, %v478_v27  ;;  %v620_v59 = vadd.f32 %v478_v27, %v476_v24 }
  0xb3   : > { %v666_v27 = vmul.f32 %v1291_v25, %v1291_v25 }
  0xb4   : > { %1031 = vst [vmem:[%s1300_s19] sm:$0xff] %v1030_v29   ;;  %v690_v60 = vadd.f32 %v659_v56, %v658_v57 }
  0xb5   : > { %1110 = vst [vmem:[%s1300_s19 + $0x20] sm:$0xff] %v1050_v30  }
  0xb8   : > { %v1310_v32 = vpop.f32.mrf.mxu2  ;;  %v1316_v36 = vpop.f32.mrf.mxu3 }
  0xb9   : > { %v481_v33 = vpop.f32.mrf.mxu0  ;;  %v1312_v34 = vpop.f32.mrf.mxu1  ;;  %v1070_v35 = vpack.c.bf16 %v1310_v32, %v1293_v26  ;;  %v1090_v37 = vpack.c.bf16 %v1316_v36, %v1306_v31 }
  0xba   : > { %v660_v58 = vmul.f32 %v481_v33, %v481_v33  ;;  %v621_v62 = vadd.f32 %v620_v59, %v481_v33 }
  0xbb   : > { %1114 = vst [vmem:[%s1300_s19 + $0x40] sm:$0xff] %v1070_v35  }
  0xbc   : > { %1118 = vst [vmem:[%s1300_s19 + $0x60] sm:$0xff] %v1090_v37   ;;  %v691_v0 = vadd.f32 %v690_v60, %v660_v58 }
  0xc0   : > { %v1322_v38 = vpop.f32.mrf.mxu2  ;;  %v1328_v43 = vpop.f32.mrf.mxu3 }
  0xc1   : > { %v483_v39 = vpop.f32.mrf.mxu0  ;;  %v1324_v40 = vpop.f32.mrf.mxu1 }
  0xc2   : > { %v1035_v41 = vpack.c.bf16 %v483_v39, %v481_v33  ;;  %v1055_v42 = vpack.c.bf16 %v1324_v40, %v1312_v34  ;;  %v661_v61 = vmul.f32 %v483_v39, %v483_v39  ;;  %v622_v5 = vadd.f32 %v621_v62, %v483_v39 }
  0xc3   : > { %v667_v33 = vmul.f32 %v1302_v28, %v1302_v28  ;;  %v668_v39 = vmul.f32 %v1312_v34, %v1312_v34 }
  0xc4   : > { %1107 = vst [vmem:[%s1300_s19 + $0x8] sm:$0xff] %v1035_v41   ;;  %v692_v7 = vadd.f32 %v691_v0, %v661_v61 }
  0xc5   : > { %1111 = vst [vmem:[%s1300_s19 + $0x28] sm:$0xff] %v1055_v42  }
  0xc8   : > { %v1332_v44 = vpop.f32.mrf.mxu2  ;;  %v1338_v48 = vpop.f32.mrf.mxu3 }
  0xc9   : > { %v486_v45 = vpop.f32.mrf.mxu0  ;;  %v1334_v46 = vpop.f32.mrf.mxu1  ;;  %v1075_v47 = vpack.c.bf16 %v1332_v44, %v1322_v38  ;;  %v1095_v49 = vpack.c.bf16 %v1338_v48, %v1328_v43 }
  0xca   : > { %v662_v1 = vmul.f32 %v486_v45, %v486_v45  ;;  %v623_v10 = vadd.f32 %v622_v5, %v486_v45  ;;  %v675_v5 = vmul.f32 %v1310_v32, %v1310_v32 }
  0xcb   : > { %1115 = vst [vmem:[%s1300_s19 + $0x48] sm:$0xff] %v1075_v47  }
  0xcc   : > { %1119 = vst [vmem:[%s1300_s19 + $0x68] sm:$0xff] %v1095_v49   ;;  %v693_v11 = vadd.f32 %v692_v7, %v662_v1 }
  0xd0   : > { %v1344_v50 = vpop.f32.mrf.mxu2  ;;  %v1350_v55 = vpop.f32.mrf.mxu3 }
  0xd1   : > { %v488_v51 = vpop.f32.mrf.mxu0  ;;  %v1346_v52 = vpop.f32.mrf.mxu1 }
  0xd2   : > { %v1040_v53 = vpack.c.bf16 %v488_v51, %v486_v45  ;;  %v1060_v54 = vpack.c.bf16 %v1346_v52, %v1334_v46  ;;  %v663_v8 = vmul.f32 %v488_v51, %v488_v51  ;;  %v624_v13 = vadd.f32 %v623_v10, %v488_v51 }
  0xd3   : > { %v677_v10 = vmul.f32 %v1332_v44, %v1332_v44 }
  0xd4   : > { %1108 = vst [vmem:[%s1300_s19 + $0x10] sm:$0xff] %v1040_v53   ;;  %v694_v14 = vadd.f32 %v693_v11, %v663_v8 }
  0xd5   : > { %1112 = vst [vmem:[%s1300_s19 + $0x30] sm:$0xff] %v1060_v54   ;;  %v670_v54 = vmul.f32 %v1334_v46, %v1334_v46 }
  0xd8   : > { %v1354_v63 = vpop.f32.mrf.mxu2  ;;  %v1358_v6 = vpop.f32.mrf.mxu3 }
  0xd9   : > { %v491_v2 = vpop.f32.mrf.mxu0  ;;  %v511_v3 = vpop.f32.mrf.mxu1  ;;  %v1080_v4 = vpack.c.bf16 %v1354_v63, %v1344_v50  ;;  %v1100_v9 = vpack.c.bf16 %v1358_v6, %v1350_v55 }
  0xda   : > { %v664_v12 = vmul.f32 %v491_v2, %v491_v2  ;;  %v625_v15 = vadd.f32 %v624_v13, %v491_v2  ;;  %v672_v61 = vmul.f32 %v511_v3, %v511_v3 }
  0xdb   : > { %1116 = vst [vmem:[%s1300_s19 + $0x50] sm:$0xff] %v1080_v4  }
  0xdc   : > { %1120 = vst [vmem:[%s1300_s19 + $0x70] sm:$0xff] %v1100_v9   ;;  %v695_v17 = vadd.f32 %v694_v14, %v664_v12 }
  0xe0   : > { %v531_v16 = vpop.f32.mrf.mxu2  ;;  %v1364_v24 = vpop.f32.mrf.mxu3 }
  0xe1   : > { %v493_v18 = vpop.f32.mrf.mxu0  ;;  %v513_v19 = vpop.f32.mrf.mxu1 }
  0xe2   : > { %v1045_v20 = vpack.c.bf16 %v493_v18, %v491_v2  ;;  %v626_v21 = vadd.f32 %v625_v15, %v493_v18  ;;  %v665_v22 = vmul.f32 %v493_v18, %v493_v18  ;;  %v1065_v23 = vpack.c.bf16 %v513_v19, %v511_v3 }
  0xe3   : > { %v673_v1 = vmul.f32 %v513_v19, %v513_v19  ;;  %v674_v2 = vmul.f32 %v1293_v26, %v1293_v26  ;;  %v679_v15 = vmul.f32 %v1354_v63, %v1354_v63 }
  0xe4   : > { %1109 = vst [vmem:[%s1300_s19 + $0x18] sm:$0xff] %v1045_v20   ;;  %v627_v29 = vadd.f32 %v626_v21, %v1291_v25  ;;  %v696_v30 = vadd.f32 %v695_v17, %v665_v22  ;;  %v669_v25 = vmul.f32 %v1324_v40, %v1324_v40 }
  0xe5   : > { %1113 = vst [vmem:[%s1300_s19 + $0x38] sm:$0xff] %v1065_v23  }
  0xe6   : > { %v628_v35 = vadd.f32 %v627_v29, %v1302_v28  ;;  %v697_v37 = vadd.f32 %v696_v30, %v666_v27 }
  0xe8   : > { %v629_v41 = vadd.f32 %v628_v35, %v1312_v34  ;;  %v698_v42 = vadd.f32 %v697_v37, %v667_v33  ;;  %v533_v45 = vpop.f32.mrf.mxu2  ;;  %v553_v53 = vpop.f32.mrf.mxu3  ;;  %v671_v34 = vmul.f32 %v1346_v52, %v1346_v52  ;;  %v685_v35 = vmul.f32 %v1338_v48, %v1338_v48 }
  0xe9   : > { %v1085_v47 = vpack.c.bf16 %v533_v45, %v531_v16  ;;  %v1105_v28 = vpack.c.bf16 %v553_v53, %v1364_v24  ;;  %v681_v22 = vmul.f32 %v533_v45, %v533_v45 }
  0xea   : > { %v699_v49 = vadd.f32 %v698_v42, %v668_v39  ;;  %v630_v51 = vadd.f32 %v629_v41, %v1324_v40 }
  0xeb   : > { %1117 = vst [vmem:[%s1300_s19 + $0x58] sm:$0xff] %v1085_v47  }
  0xec   : > { %v631_v56 = vadd.f32 %v630_v51, %v1334_v46  ;;  %v700_v57 = vadd.f32 %v699_v49, %v669_v25  ;;  %1121 = vst [vmem:[%s1300_s19 + $0x78] sm:$0xff] %v1105_v28   ;;  %v688_v49 = vmul.f32 %v1364_v24, %v1364_v24  ;;  %v689_v28 = vmul.f32 %v553_v53, %v553_v53 }
  0xee   : > { %v632_v58 = vadd.f32 %v631_v56, %v1346_v52  ;;  %v701_v59 = vadd.f32 %v700_v57, %v670_v54  ;;  %v676_v52 = vmul.f32 %v1322_v38, %v1322_v38 }
  0xf0   : > { %v633_v60 = vadd.f32 %v632_v58, %v511_v3  ;;  %v702_v40 = vadd.f32 %v701_v59, %v671_v34 }
  0xf2   : > { %v703_v62 = vadd.f32 %v702_v40, %v672_v61  ;;  %v634_v0 = vadd.f32 %v633_v60, %v513_v19  ;;  %v680_v19 = vmul.f32 %v531_v16, %v531_v16 }
  0xf4   : > { %v635_v4 = vadd.f32 %v634_v0, %v1293_v26  ;;  %v704_v46 = vadd.f32 %v703_v62, %v673_v1  ;;  %v678_v26 = vmul.f32 %v1344_v50, %v1344_v50 }
  0xf6   : > { %v636_v7 = vadd.f32 %v635_v4, %v1310_v32  ;;  %v705_v8 = vadd.f32 %v704_v46, %v674_v2 }
  0xf8   : > { %v637_v3 = vadd.f32 %v636_v7, %v1322_v38  ;;  %v706_v9 = vadd.f32 %v705_v8, %v675_v5 }
  0xfa   : > { %v707_v11 = vadd.f32 %v706_v9, %v676_v52  ;;  %v638_v12 = vadd.f32 %v637_v3, %v1332_v44  ;;  %v682_v44 = vmul.f32 %v1306_v31, %v1306_v31 }
  0xfc   : > { %v639_v13 = vadd.f32 %v638_v12, %v1344_v50  ;;  %v708_v14 = vadd.f32 %v707_v11, %v677_v10  ;;  %v683_v50 = vmul.f32 %v1316_v36, %v1316_v36 }
  0xfe   : > { %v640_v32 = vadd.f32 %v639_v13, %v1354_v63  ;;  %v709_v17 = vadd.f32 %v708_v14, %v678_v26  ;;  %v684_v63 = vmul.f32 %v1328_v43, %v1328_v43 }
 0x100   : > { %v710_v38 = vadd.f32 %v709_v17, %v679_v15  ;;  %v641_v18 = vadd.f32 %v640_v32, %v531_v16 }
 0x102   : > { %v711_v20 = vadd.f32 %v710_v38, %v680_v19  ;;  %v642_v21 = vadd.f32 %v641_v18, %v533_v45  ;;  %v687_v45 = vmul.f32 %v1358_v6, %v1358_v6 }
 0x104   : > { %v643_v23 = vadd.f32 %v642_v21, %v1306_v31  ;;  %v712_v27 = vadd.f32 %v711_v20, %v681_v22  ;;  %v686_v31 = vmul.f32 %v1350_v55, %v1350_v55 }
 0x106   : > { %v644_v29 = vadd.f32 %v643_v23, %v1316_v36  ;;  %v713_v30 = vadd.f32 %v712_v27, %v682_v44 }
 0x108   : > { %v645_v16 = vadd.f32 %v644_v29, %v1328_v43  ;;  %v714_v33 = vadd.f32 %v713_v30, %v683_v50 }
 0x10a   : > { %v715_v37 = vadd.f32 %v714_v33, %v684_v63  ;;  %v646_v39 = vadd.f32 %v645_v16, %v1338_v48 }
 0x10c   : > { %v647_v41 = vadd.f32 %v646_v39, %v1350_v55  ;;  %v716_v42 = vadd.f32 %v715_v37, %v685_v35 }
 0x10e   : > { %v648_v36 = vadd.f32 %v647_v41, %v1358_v6  ;;  %v717_v47 = vadd.f32 %v716_v42, %v686_v31 }
 0x110   : > { %v718_v43 = vadd.f32 %v717_v47, %v687_v45  ;;  %v649_v25 = vadd.f32 %v648_v36, %v1364_v24 }
 0x112   : > { %v719_v48 = vadd.f32 %v718_v43, %v688_v49  ;;  %v650_v51 = vadd.f32 %v649_v25, %v553_v53 }
 0x114   : > { %v651_v54 = vrot.slane %v650_v51, 4  ;;  %v720_v55 = vadd.f32 %v719_v48, %v689_v28 }
 0x116   : > { %v652_v56 = vadd.f32 %v651_v54, %v650_v51  ;;  %v721_v57 = vrot.slane %v720_v55, 4 }
 0x118   : > { %v653_v34 = vrot.slane %v652_v56, 2  ;;  %v722_v58 = vadd.f32 %v721_v57, %v720_v55 }
 0x11a   : > { %v654_v59 = vadd.f32 %v653_v34, %v652_v56  ;;  %v723_v6 = vrot.slane %v722_v58, 2 }
 0x11c   : > { %v655_v60 = vrot.slane %v654_v59, 1  ;;  %v724_v61 = vadd.f32 %v723_v6, %v722_v58 }
 0x11e   : > { %v656_v40 = vadd.f32 %v655_v60, %v654_v59  ;;  %v725_v24 = vrot.slane %v724_v61, 1 }
 0x120   : > { %657 = vst [vmem:[%s268_s22] sm:$0x1] %v656_v40  ;;  %v726_v53 = vadd.f32 %v725_v24, %v724_v61 }
 0x122   : > { %727 = vst [vmem:[%s274_s25] sm:$0x1] %v726_v53 }
 0x123 PF: > { %s15_s17 = sadd.s32 1, %s1192_s17   ;;  %s1450_s15 = smov %s1188_s16 }
 0x124   : > { %p12_p5 = scmp.ge.s32.totalorder %s15_s17, 4   ;;  %s1451_s16 = smov %s1453_s18 }
 0x126   :  { %14 = sbr.rel (!%p12_p5) target bundleno = 2 (0x2), region = 82 }

// kernel: conv_block_forward.5
= control target key start
LH: loop header
LB: loop body
LE: loop exit
PB: predicated region body
PF: predicated region fallthrough
CT: control target
= control target key end

     0   :  { %s673_s12 = smov 0   ;;  %s675_s13 = smov 0   ;;  %s836_s0 = inlined_call_operand.vmem [shape: bf16[2,16,16,128], index: 0, kind: input, shape index: {}]   ;;  %s837_s1 = inlined_call_operand.vmem [shape: f32[1,128], index: 1, kind: input, shape index: {}]   ;;  %s838_s2 = inlined_call_operand.vmem [shape: f32[1,128], index: 2, kind: input, shape index: {}]   ;;  %s839_s3 = inlined_call_operand.vmem [shape: f32[2,16,16,128], index: 3, kind: output, shape index: {}]  }
   0x1   :  { %s677_s14 = smov 0  }
   0x2 LB: > { %s25_s15 = sadd.s32 1, %s647_s13  ;;  %p515_p0 = scmp.ge.s32.totalorder %s651_s14, 1  ;;  %s651_s14 = sphi %s677_s14, %s13_s14   ;;  %s647_s13 = sphi %s675_s13, %s841_s13   ;;  %s643_s12 = sphi %s673_s12, %s840_s12  }
   0x3   : > { %p27_p1 = scmp.ge.s32.totalorder %s25_s15, 2  ;;  %p159_p2 = scmp.lt.s32.totalorder %s651_s14, 3 }
   0x5   : > { %s843_s15 = smov (%p27_p1, %s25_s15), 0  ;;  %p160_p3 = pnand %p515_p0, %p159_p2 }
   0x6   : > { %p194_p4 = scmp.lt.s32.totalorder (!%p160_p3), %s643_s12, 1 }
   0x7   : > { %163 = sbr.rel (%p160_p3) target bundleno = 56 (0x38), region = 32 }
   0xc   : > { %s845_s12 = smov (!%p194_p4, %s643_s12), 1  ;;  %v702_v0 = vld [vmem:[%s837_s1] ss:$0 sm:$0xff] }
   0xd   : > { %s522_s16 = sshll.u32 %s845_s12, 7  ;;  %v710_v5 = vld [vmem:[%s838_s2] ss:$0 sm:$0xff]  ;;  %s523_s24 = sshll.u32 %s845_s12, 8 }
   0xe   : > { %s697_s19 = scalar_lea.vmem %s836_s0, %s522_s16  ;;  %s729_s27 = scalar_lea.vmem %s839_s3, %s523_s24 }
   0xf   : > { %v525_v1 = vld [vmem:[%s697_s19] sm:$0xff]   ;;  %v588_v2 = vld [vmem:[%s697_s19 + $0x8] sm:$0xff]   ;;  %v589_v3 = vld [vmem:[%s697_s19 + $0x10] sm:$0xff]  }
  0x10   : > { %v526_v4 = vunpack.c.l.bf16 %v525_v1  ;;  %v527_v6 = vunpack.c.h.bf16 %v525_v1  ;;  %v530_v7 = vunpack.c.l.bf16 %v588_v2  ;;  %v531_v8 = vunpack.c.h.bf16 %v588_v2  ;;  %v590_v9 = vld [vmem:[%s697_s19 + $0x18] sm:$0xff]   ;;  %v591_v30 = vld [vmem:[%s697_s19 + $0x20] sm:$0xff]   ;;  %v592_v31 = vld [vmem:[%s697_s19 + $0x28] sm:$0xff]  }
  0x11   : > { %v534_v10 = vunpack.c.l.bf16 %v589_v3  ;;  %v535_v11 = vunpack.c.h.bf16 %v589_v3  ;;  %v538_v12 = vunpack.c.l.bf16 %v590_v9  ;;  %v539_v13 = vunpack.c.h.bf16 %v590_v9  ;;  %v593_v36 = vld [vmem:[%s697_s19 + $0x30] sm:$0xff]   ;;  %v594_v37 = vld [vmem:[%s697_s19 + $0x38] sm:$0xff]   ;;  %v595_v3 = vld [vmem:[%s697_s19 + $0x40] sm:$0xff]  }
  0x12   : > { %v283_v14 = vmul.f32 %v702_v0, %v526_v4  ;;  %v284_v15 = vmul.f32 %v702_v0, %v527_v6  ;;  %v285_v16 = vmul.f32 %v702_v0, %v530_v7  ;;  %v286_v17 = vmul.f32 %v702_v0, %v531_v8  ;;  %v596_v4 = vld [vmem:[%s697_s19 + $0x48] sm:$0xff]   ;;  %v597_v6 = vld [vmem:[%s697_s19 + $0x50] sm:$0xff]  }
  0x13   : > { %v287_v18 = vmul.f32 %v702_v0, %v534_v10  ;;  %v288_v19 = vmul.f32 %v702_v0, %v535_v11  ;;  %v289_v20 = vmul.f32 %v702_v0, %v538_v12  ;;  %v290_v21 = vmul.f32 %v702_v0, %v539_v13  ;;  %v598_v11 = vld [vmem:[%s697_s19 + $0x58] sm:$0xff]  }
  0x14   : > { %v319_v22 = vadd.f32 %v710_v5, %v283_v14  ;;  %v320_v23 = vadd.f32 %v710_v5, %v284_v15  ;;  %v321_v24 = vadd.f32 %v710_v5, %v285_v16  ;;  %v322_v25 = vadd.f32 %v710_v5, %v286_v17 }
  0x15   : > { %v323_v26 = vadd.f32 %v710_v5, %v287_v18  ;;  %v324_v27 = vadd.f32 %v710_v5, %v288_v19  ;;  %v325_v28 = vadd.f32 %v710_v5, %v289_v20  ;;  %v326_v29 = vadd.f32 %v710_v5, %v290_v21 }
  0x16   : > { %v351_v32 = vmax.f32 %v319_v22, 0.0  ;;  %v352_v33 = vmax.f32 %v320_v23, 0.0  ;;  %v353_v34 = vmax.f32 %v321_v24, 0.0  ;;  %v354_v35 = vmax.f32 %v322_v25, 0.0 }
  0x17   : > { %v355_v38 = vmax.f32 %v323_v26, 0.0  ;;  %v356_v39 = vmax.f32 %v324_v27, 0.0  ;;  %v357_v40 = vmax.f32 %v325_v28, 0.0  ;;  %v358_v41 = vmax.f32 %v326_v29, 0.0 }
  0x18   : > { %383 = vst [vmem:[%s729_s27] sm:$0xff] %v351_v32  ;;  %v542_v42 = vunpack.c.l.bf16 %v591_v30  ;;  %v543_v43 = vunpack.c.h.bf16 %v591_v30  ;;  %v546_v44 = vunpack.c.l.bf16 %v592_v31  ;;  %v547_v45 = vunpack.c.h.bf16 %v592_v31 }
  0x19   : > { %384 = vst [vmem:[%s729_s27 + $0x8] sm:$0xff] %v352_v33  ;;  %v550_v46 = vunpack.c.l.bf16 %v593_v36  ;;  %v551_v47 = vunpack.c.h.bf16 %v593_v36  ;;  %v554_v48 = vunpack.c.l.bf16 %v594_v37  ;;  %v555_v49 = vunpack.c.h.bf16 %v594_v37 }
  0x1a   : > { %385 = vst [vmem:[%s729_s27 + $0x10] sm:$0xff] %v353_v34  ;;  %v291_v50 = vmul.f32 %v702_v0, %v542_v42  ;;  %v292_v51 = vmul.f32 %v702_v0, %v543_v43  ;;  %v293_v52 = vmul.f32 %v702_v0, %v546_v44  ;;  %v294_v53 = vmul.f32 %v702_v0, %v547_v45  ;;  %v601_v42 = vld [vmem:[%s697_s19 + $0x70] sm:$0xff]  }
  0x1b   : > { %386 = vst [vmem:[%s729_s27 + $0x18] sm:$0xff] %v354_v35  ;;  %v295_v54 = vmul.f32 %v702_v0, %v550_v46  ;;  %v296_v55 = vmul.f32 %v702_v0, %v551_v47  ;;  %v297_v56 = vmul.f32 %v702_v0, %v554_v48  ;;  %v298_v57 = vmul.f32 %v702_v0, %v555_v49  ;;  %v602_v47 = vld [vmem:[%s697_s19 + $0x78] sm:$0xff]  }
  0x1c   : > { %387 = vst [vmem:[%s729_s27 + $0x20] sm:$0xff] %v355_v38  ;;  %v327_v58 = vadd.f32 %v710_v5, %v291_v50  ;;  %v328_v59 = vadd.f32 %v710_v5, %v292_v51  ;;  %v329_v60 = vadd.f32 %v710_v5, %v293_v52  ;;  %v330_v61 = vadd.f32 %v710_v5, %v294_v53 }
  0x1d   : > { %388 = vst [vmem:[%s729_s27 + $0x28] sm:$0xff] %v356_v39  ;;  %v331_v62 = vadd.f32 %v710_v5, %v295_v54  ;;  %v332_v63 = vadd.f32 %v710_v5, %v296_v55  ;;  %v333_v1 = vadd.f32 %v710_v5, %v297_v56  ;;  %v334_v2 = vadd.f32 %v710_v5, %v298_v57 }
  0x1e   : > { %389 = vst [vmem:[%s729_s27 + $0x30] sm:$0xff] %v357_v40  ;;  %v359_v7 = vmax.f32 %v327_v58, 0.0  ;;  %v360_v8 = vmax.f32 %v328_v59, 0.0  ;;  %v361_v9 = vmax.f32 %v329_v60, 0.0  ;;  %v362_v10 = vmax.f32 %v330_v61, 0.0  ;;  %v599_v40 = vld [vmem:[%s697_s19 + $0x60] sm:$0xff]  }
  0x1f   : > { %390 = vst [vmem:[%s729_s27 + $0x38] sm:$0xff] %v358_v41  ;;  %v363_v12 = vmax.f32 %v331_v62, 0.0  ;;  %v364_v13 = vmax.f32 %v332_v63, 0.0  ;;  %v365_v14 = vmax.f32 %v333_v1, 0.0  ;;  %v366_v15 = vmax.f32 %v334_v2, 0.0  ;;  %v600_v41 = vld [vmem:[%s697_s19 + $0x68] sm:$0xff]  }
  0x20   : > { %391 = vst [vmem:[%s729_s27 + $0x40] sm:$0xff] %v359_v7  ;;  %v558_v16 = vunpack.c.l.bf16 %v595_v3  ;;  %v559_v17 = vunpack.c.h.bf16 %v595_v3  ;;  %v562_v18 = vunpack.c.l.bf16 %v596_v4  ;;  %v563_v19 = vunpack.c.h.bf16 %v596_v4 }
  0x21   : > { %392 = vst [vmem:[%s729_s27 + $0x48] sm:$0xff] %v360_v8  ;;  %v566_v20 = vunpack.c.l.bf16 %v597_v6  ;;  %v567_v21 = vunpack.c.h.bf16 %v597_v6  ;;  %v570_v22 = vunpack.c.l.bf16 %v598_v11  ;;  %v571_v23 = vunpack.c.h.bf16 %v598_v11 }
  0x22   : > { %393 = vst [vmem:[%s729_s27 + $0x50] sm:$0xff] %v361_v9  ;;  %v299_v24 = vmul.f32 %v702_v0, %v558_v16  ;;  %v300_v25 = vmul.f32 %v702_v0, %v559_v17  ;;  %v301_v26 = vmul.f32 %v702_v0, %v562_v18  ;;  %v302_v27 = vmul.f32 %v702_v0, %v563_v19 }
  0x23   : > { %394 = vst [vmem:[%s729_s27 + $0x58] sm:$0xff] %v362_v10  ;;  %v303_v28 = vmul.f32 %v702_v0, %v566_v20  ;;  %v304_v29 = vmul.f32 %v702_v0, %v567_v21  ;;  %v305_v30 = vmul.f32 %v702_v0, %v570_v22  ;;  %v306_v31 = vmul.f32 %v702_v0, %v571_v23 }
  0x24   : > { %395 = vst [vmem:[%s729_s27 + $0x60] sm:$0xff] %v363_v12  ;;  %v335_v32 = vadd.f32 %v710_v5, %v299_v24  ;;  %v336_v33 = vadd.f32 %v710_v5, %v300_v25  ;;  %v337_v34 = vadd.f32 %v710_v5, %v301_v26  ;;  %v338_v35 = vadd.f32 %v710_v5, %v302_v27 }
  0x25   : > { %396 = vst [vmem:[%s729_s27 + $0x68] sm:$0xff] %v364_v13  ;;  %v339_v36 = vadd.f32 %v710_v5, %v303_v28  ;;  %v340_v37 = vadd.f32 %v710_v5, %v304_v29  ;;  %v341_v38 = vadd.f32 %v710_v5, %v305_v30  ;;  %v342_v39 = vadd.f32 %v710_v5, %v306_v31 }
  0x26   : > { %397 = vst [vmem:[%s729_s27 + $0x70] sm:$0xff] %v365_v14  ;;  %v367_v43 = vmax.f32 %v335_v32, 0.0  ;;  %v368_v44 = vmax.f32 %v336_v33, 0.0  ;;  %v369_v45 = vmax.f32 %v337_v34, 0.0  ;;  %v370_v46 = vmax.f32 %v338_v35, 0.0 }
  0x27   : > { %398 = vst [vmem:[%s729_s27 + $0x78] sm:$0xff] %v366_v15  ;;  %v371_v48 = vmax.f32 %v339_v36, 0.0  ;;  %v372_v49 = vmax.f32 %v340_v37, 0.0  ;;  %v373_v50 = vmax.f32 %v341_v38, 0.0  ;;  %v374_v51 = vmax.f32 %v342_v39, 0.0 }
  0x28   : > { %399 = vst [vmem:[%s729_s27 + $0x80] sm:$0xff] %v367_v43  ;;  %v574_v52 = vunpack.c.l.bf16 %v599_v40  ;;  %v575_v53 = vunpack.c.h.bf16 %v599_v40  ;;  %v578_v54 = vunpack.c.l.bf16 %v600_v41  ;;  %v579_v55 = vunpack.c.h.bf16 %v600_v41 }
  0x29   : > { %400 = vst [vmem:[%s729_s27 + $0x88] sm:$0xff] %v368_v44  ;;  %v582_v56 = vunpack.c.l.bf16 %v601_v42  ;;  %v583_v57 = vunpack.c.h.bf16 %v601_v42  ;;  %v586_v58 = vunpack.c.l.bf16 %v602_v47  ;;  %v587_v59 = vunpack.c.h.bf16 %v602_v47 }
  0x2a   : > { %401 = vst [vmem:[%s729_s27 + $0x90] sm:$0xff] %v369_v45  ;;  %v307_v60 = vmul.f32 %v702_v0, %v574_v52  ;;  %v308_v61 = vmul.f32 %v702_v0, %v575_v53  ;;  %v309_v62 = vmul.f32 %v702_v0, %v578_v54  ;;  %v310_v63 = vmul.f32 %v702_v0, %v579_v55 }
  0x2b   : > { %402 = vst [vmem:[%s729_s27 + $0x98] sm:$0xff] %v370_v46  ;;  %v311_v1 = vmul.f32 %v702_v0, %v582_v56  ;;  %v312_v2 = vmul.f32 %v702_v0, %v583_v57  ;;  %v313_v3 = vmul.f32 %v702_v0, %v586_v58  ;;  %v314_v4 = vmul.f32 %v702_v0, %v587_v59 }
  0x2c   : > { %403 = vst [vmem:[%s729_s27 + $0xa0] sm:$0xff] %v371_v48  ;;  %v343_v6 = vadd.f32 %v710_v5, %v307_v60  ;;  %v344_v7 = vadd.f32 %v710_v5, %v308_v61  ;;  %v345_v8 = vadd.f32 %v710_v5, %v309_v62  ;;  %v346_v9 = vadd.f32 %v710_v5, %v310_v63 }
  0x2d   : > { %404 = vst [vmem:[%s729_s27 + $0xa8] sm:$0xff] %v372_v49  ;;  %v347_v10 = vadd.f32 %v710_v5, %v311_v1  ;;  %v348_v11 = vadd.f32 %v710_v5, %v312_v2  ;;  %v349_v14 = vadd.f32 %v710_v5, %v313_v3  ;;  %v350_v16 = vadd.f32 %v710_v5, %v314_v4 }
  0x2e   : > { %405 = vst [vmem:[%s729_s27 + $0xb0] sm:$0xff] %v373_v50  ;;  %v375_v0 = vmax.f32 %v343_v6, 0.0  ;;  %v376_v12 = vmax.f32 %v344_v7, 0.0  ;;  %v377_v13 = vmax.f32 %v345_v8, 0.0  ;;  %v378_v15 = vmax.f32 %v346_v9, 0.0 }
  0x2f   : > { %406 = vst [vmem:[%s729_s27 + $0xb8] sm:$0xff] %v374_v51  ;;  %v379_v17 = vmax.f32 %v347_v10, 0.0  ;;  %v380_v18 = vmax.f32 %v348_v11, 0.0  ;;  %v381_v19 = vmax.f32 %v349_v14, 0.0  ;;  %v382_v20 = vmax.f32 %v350_v16, 0.0 }
  0x30   : > { %407 = vst [vmem:[%s729_s27 + $0xc0] sm:$0xff] %v375_v0 }
  0x31   : > { %408 = vst [vmem:[%s729_s27 + $0xc8] sm:$0xff] %v376_v12 }
  0x32   : > { %409 = vst [vmem:[%s729_s27 + $0xd0] sm:$0xff] %v377_v13 }
  0x33   : > { %410 = vst [vmem:[%s729_s27 + $0xd8] sm:$0xff] %v378_v15 }
  0x34   : > { %411 = vst [vmem:[%s729_s27 + $0xe0] sm:$0xff] %v379_v17 }
  0x35   : > { %412 = vst [vmem:[%s729_s27 + $0xe8] sm:$0xff] %v380_v18 }
  0x36   : > { %413 = vst [vmem:[%s729_s27 + $0xf0] sm:$0xff] %v381_v19 }
  0x37   : > { %414 = vst [vmem:[%s729_s27 + $0xf8] sm:$0xff] %v382_v20 }
  0x38 PF: > { %s13_s14 = sadd.s32 1, %s651_s14   ;;  %s840_s12 = smov %s647_s13 }
  0x39   : > { %p10_p5 = scmp.ge.s32.totalorder %s13_s14, 4   ;;  %s841_s13 = smov %s843_s15 }
  0x3b   :  { %12 = sbr.rel (!%p10_p5) target bundleno = 2 (0x2), region = 62 }

// kernel: conv_block_forward.4
= control target key start
LH: loop header
LB: loop body
LE: loop exit
PB: predicated region body
PF: predicated region fallthrough
CT: control target
= control target key end

     0   :  { %s3726_s24 = smov 0   ;;  %s3728_s25 = smov 0   ;;  %s4672_s0 = inlined_call_operand.vmem [shape: bf16[2,16,16,128], index: 0, kind: input, shape index: {}]   ;;  %s4673_s1 = inlined_call_operand.vmem [shape: bf16[2,2,16,128], index: 1, kind: input, shape index: {}]   ;;  %s4674_s2 = inlined_call_operand.vmem [shape: bf16[9,128,128], index: 2, kind: input, shape index: {}]   ;;  %s4675_s3 = inlined_call_operand.vmem [shape: f32[1,128], index: 3, kind: input, shape index: {}]   ;;  %s4676_s4 = inlined_call_operand.vmem [shape: f32[1,128], index: 4, kind: input, shape index: {}]   ;;  %s4677_s5 = inlined_call_operand.vmem [shape: bf16[2,16,16,128], index: 5, kind: output, shape index: {0}]   ;;  %s4678_s6 = inlined_call_operand.vmem [shape: f32[2,1,1,128], index: 6, kind: output, shape index: {1}]   ;;  %s4679_s7 = inlined_call_operand.vmem [shape: f32[2,1,1,128], index: 7, kind: output, shape index: {2}]  }
   0x1   :  { %s3730_s26 = smov 0  }
   0x2 LB: > { %s30_s27 = sadd.s32 1, %s3680_s25  ;;  %p2927_p0 = scmp.ge.s32.totalorder %s3684_s26, 1  ;;  %s3684_s26 = sphi %s3730_s26, %s18_s26   ;;  %s3680_s25 = sphi %s3728_s25, %s4783_s25   ;;  %s3676_s24 = sphi %s3726_s24, %s4782_s24  }
   0x3   : > { %p32_p1 = scmp.ge.s32.totalorder %s30_s27, 2  ;;  %p282_p2 = scmp.lt.s32.totalorder %s3684_s26, 3 }
   0x5   : > { %s4785_s27 = smov (%p32_p1, %s30_s27), 0  ;;  %p283_p3 = pnand %p2927_p0, %p282_p2 }
   0x7   : > { %286 = sbr.rel (%p283_p3) target bundleno = 767 (0x2ff), region = 40 }
   0xc   : > { %v3370_v0 = vld [vmem:[%s4674_s2 + $0x78] sm:$0xff]  ;;  %p343_p4 = scmp.lt.s32.totalorder %s3676_s24, 1  ;;  %v3369_v1 = vld [vmem:[%s4674_s2 + $0x70] sm:$0xff]  ;;  %v3368_v2 = vld [vmem:[%s4674_s2 + $0x68] sm:$0xff]  ;;  %vm850_vm0 = vcmask 1040384   ;;  %vm925_vm2 = vcmask 1047552  }
   0xd   : > { %3610 = vmatpush.bf16.msra.mxu1 %v3370_v0  ;;  %3611 = vmatpush.bf16.msra.mxu2 %v3370_v0  ;;  %v3767_v3 = vld [vmem:[%s4675_s3] ss:$0 sm:$0xff]  ;;  %v3366_v33 = vld [vmem:[%s4674_s2 + $0x58] sm:$0xff]  ;;  %v3365_v45 = vld [vmem:[%s4674_s2 + $0x50] sm:$0xff]  ;;  %vm851_vm1 = vsmask.f32 256 }
   0xe   : > { %s4787_s24 = smov (!%p343_p4, %s3676_s24), 1  ;;  %3612 = vmatpush.bf16.msra.mxu3 %v3370_v0  ;;  %1043 = vmatpush.bf16.msra.mxu0 %v3370_v0  ;;  %v3780_v9 = vld [vmem:[%s4676_s4] ss:$0 sm:$0xff]  ;;  %v3364_v60 = vld [vmem:[%s4674_s2 + $0x48] sm:$0xff]  ;;  %vm926_vm3 = vsmask.f32 7424  ;;  %vm4037_vm4 = vmand %vm850_vm0, %vm851_vm1 }
   0xf   : > { %s3352_s9 = sshll.u32 %s4787_s24, 7  ;;  %s3353_s10 = sshll.u32 %s4787_s24, 4  ;;  %v3367_v21 = vld [vmem:[%s4674_s2 + $0x60] sm:$0xff]  ;;  %vm4041_vm5 = vmand %vm925_vm2, %vm926_vm3 }
  0x10   : > { %s3762_s15 = scalar_lea.vmem %s4672_s0, %s3352_s9  ;;  %s3772_s20 = scalar_lea.vmem %s4673_s1, %s3353_s10 }
  0x11   : > { %3613 = vmatpush.bf16.msra.mxu1 %v3369_v1  ;;  %3614 = vmatpush.bf16.msra.mxu2 %v3369_v1  ;;  %v3581_v4 = vld [vmem:[%s3762_s15 + $0x18] sm:$0xff]   ;;  %v3492_v12 = vld [vmem:[%s3772_s20] sm:$0xff]   ;;  %s4571_s22 = scalar_lea.vmem %s4677_s5, %s3352_s9  ;;  %s376_s23 = scalar_lea.vmem %s4678_s6, %s4787_s24 }
  0x12   : > { %v3585_v5 = vld [vmem:[%s3762_s15 + $0x38] sm:$0xff]   ;;  %3615 = vmatpush.bf16.msra.mxu3 %v3369_v1  ;;  %1044 = vmatpush.bf16.msra.mxu0 %v3369_v1  ;;  %v3441_v7 = vunpack.c.l.bf16 %v3581_v4  ;;  %v3442_v8 = vunpack.c.h.bf16 %v3581_v4  ;;  %v3493_v15 = vunpack.c.l.bf16 %v3492_v12  ;;  %v3494_v16 = vunpack.c.h.bf16 %v3492_v12  ;;  %v3582_v32 = vld [vmem:[%s3762_s15 + $0x20] sm:$0xff]   ;;  %s382_s30 = scalar_lea.vmem %s4679_s7, %s4787_s24 }
  0x13   : > { %v3589_v6 = vld [vmem:[%s3762_s15 + $0x58] sm:$0xff]   ;;  %v3457_v10 = vunpack.c.l.bf16 %v3585_v5  ;;  %v3458_v11 = vunpack.c.h.bf16 %v3585_v5  ;;  %v3445_v40 = vunpack.c.l.bf16 %v3582_v32  ;;  %v3586_v44 = vld [vmem:[%s3762_s15 + $0x40] sm:$0xff]   ;;  %v3446_v51 = vunpack.c.h.bf16 %v3582_v32 }
  0x14   : > { %v3473_v13 = vunpack.c.l.bf16 %v3589_v6  ;;  %v3474_v14 = vunpack.c.h.bf16 %v3589_v6  ;;  %v466_v17 = vmul.f32 %v3767_v3, %v3441_v7  ;;  %v467_v18 = vmul.f32 %v3767_v3, %v3442_v8  ;;  %v3590_v52 = vld [vmem:[%s3762_s15 + $0x60] sm:$0xff]  }
  0x15   : > { %v474_v19 = vmul.f32 %v3767_v3, %v3457_v10  ;;  %v475_v20 = vmul.f32 %v3767_v3, %v3458_v11  ;;  %3616 = vmatpush.bf16.msra.mxu1 %v3368_v2  ;;  %3617 = vmatpush.bf16.msra.mxu2 %v3368_v2  ;;  %v593_v28 = vmul.f32 %v3767_v3, %v3493_v15  ;;  %v3461_v56 = vunpack.c.l.bf16 %v3586_v44  ;;  %v3428_v1 = vld [vmem:[%s3762_s15] sm:$0xff]  }
  0x16   : > { %v482_v22 = vmul.f32 %v3767_v3, %v3473_v13  ;;  %v483_v23 = vmul.f32 %v3767_v3, %v3474_v14  ;;  %3618 = vmatpush.bf16.msra.mxu3 %v3368_v2  ;;  %1045 = vmatpush.bf16.msra.mxu0 %v3368_v2  ;;  %v501_v24 = vadd.f32 %v3780_v9, %v466_v17  ;;  %v3462_v59 = vunpack.c.h.bf16 %v3586_v44  ;;  %v3363_v15 = vld [vmem:[%s4674_s2 + $0x40] sm:$0xff]  ;;  %v3587_v44 = vld [vmem:[%s3762_s15 + $0x48] sm:$0xff]  }
  0x17   : > { %v502_v25 = vadd.f32 %v3780_v9, %v467_v18  ;;  %v509_v26 = vadd.f32 %v3780_v9, %v474_v19  ;;  %v510_v27 = vadd.f32 %v3780_v9, %v475_v20  ;;  %v594_v31 = vmul.f32 %v3767_v3, %v3494_v16 }
  0x18   : > { %v517_v29 = vadd.f32 %v3780_v9, %v482_v22  ;;  %v518_v30 = vadd.f32 %v3780_v9, %v483_v23  ;;  %v533_v34 = vmax.f32 %v501_v24, 0.0  ;;  %v595_v35 = vadd.f32 %v3780_v9, %v593_v28  ;;  %v3378_v24 = vld [vmem:[%s4674_s2 + $0xb8] sm:$0xff] }
  0x19   : > { %3619 = vmatpush.bf16.msra.mxu1 %v3367_v21  ;;  %3620 = vmatpush.bf16.msra.mxu2 %v3367_v21  ;;  %v534_v36 = vmax.f32 %v502_v25, 0.0  ;;  %v541_v37 = vmax.f32 %v509_v26, 0.0  ;;  %v542_v38 = vmax.f32 %v510_v27, 0.0  ;;  %v596_v39 = vadd.f32 %v3780_v9, %v594_v31  ;;  %v3386_v25 = vld [vmem:[%s4674_s2 + $0xf8] sm:$0xff] }
  0x1a   : > { %3621 = vmatpush.bf16.msra.mxu3 %v3367_v21  ;;  %1046 = vmatpush.bf16.msra.mxu0 %v3367_v21  ;;  %v549_v41 = vmax.f32 %v517_v29, 0.0  ;;  %v550_v42 = vmax.f32 %v518_v30, 0.0  ;;  %v597_v43 = vmax.f32 %v595_v35, 0.0  ;;  %v565_v46 = vpack.c.bf16 %v533_v34, %v533_v34 }
  0x1b   : > { %v598_v47 = vmax.f32 %v596_v39, 0.0  ;;  %v566_v48 = vpack.c.bf16 %v534_v36, %v534_v36  ;;  %v573_v49 = vpack.c.bf16 %v541_v37, %v541_v37  ;;  %v574_v53 = vpack.c.bf16 %v542_v38, %v542_v38  ;;  %v3362_v36 = vld [vmem:[%s4674_s2 + $0x38] sm:$0xff] }
  0x1c   : > { %v600_v50 = vmul.f32 0.0, %v597_v43  ;;  %v468_v55 = vmul.f32 %v3767_v3, %v3445_v40  ;;  %v581_v57 = vpack.c.bf16 %v549_v41, %v549_v41  ;;  %v582_v58 = vpack.c.bf16 %v550_v42, %v550_v42  ;;  %v3394_v37 = vld [vmem:[%s4674_s2 + $0x138] sm:$0xff]  ;;  %v3583_v40 = vld [vmem:[%s3762_s15 + $0x28] sm:$0xff]   ;;  %v3377_v41 = vld [vmem:[%s4674_s2 + $0xb0] sm:$0xff] }
  0x1d   : > { %3622 = vmatpush.bf16.msra.mxu1 %v3366_v33  ;;  %3623 = vmatpush.bf16.msra.mxu2 %v3366_v33  ;;  %v601_v54 = vmul.f32 0.0, %v598_v47  ;;  %v3477_v63 = vunpack.c.l.bf16 %v3590_v52  ;;  %v3478_v0 = vunpack.c.h.bf16 %v3590_v52  ;;  %v660_v2 = vunpack.c.l.b16 %v565_v46  ;;  %v3385_v42 = vld [vmem:[%s4674_s2 + $0xf0] sm:$0xff] }
  0x1e   : > { %3624 = vmatpush.bf16.msra.mxu3 %v3366_v33  ;;  %1047 = vmatpush.bf16.msra.mxu0 %v3366_v33  ;;  %v602_v61 = vpack.c.bf16 %v600_v50, %v600_v50  ;;  %v661_v4 = vunpack.c.l.b16 %v566_v48  ;;  %v469_v5 = vmul.f32 %v3767_v3, %v3446_v51  ;;  %v668_v6 = vunpack.c.l.b16 %v573_v49  ;;  %v3591_v49 = vld [vmem:[%s3762_s15 + $0x68] sm:$0xff]  }
  0x1f   : > { %v603_v62 = vpack.c.bf16 %v601_v54, %v601_v54  ;;  %v669_v7 = vunpack.c.l.b16 %v574_v53  ;;  %v503_v8 = vadd.f32 %v3780_v9, %v468_v55  ;;  %v476_v10 = vmul.f32 %v3767_v3, %v3461_v56  ;;  %v3361_v53 = vld [vmem:[%s4674_s2 + $0x30] sm:$0xff] }
  0x20   : > { %v477_v11 = vmul.f32 %v3767_v3, %v3462_v59  ;;  %v484_v12 = vmul.f32 %v3767_v3, %v3477_v63  ;;  %v485_v13 = vmul.f32 %v3767_v3, %v3478_v0  ;;  %v3429_v14 = vunpack.c.l.bf16 %v3428_v1  ;;  %v3393_v55 = vld [vmem:[%s4674_s2 + $0x130] sm:$0xff]  ;;  %v3579_v59 = vld [vmem:[%s3762_s15 + $0x8] sm:$0xff]  }
  0x21   : > { %3625 = vmatpush.bf16.msra.mxu1 %v3365_v45  ;;  %3626 = vmatpush.bf16.msra.mxu2 %v3365_v45  ;;  %v676_v16 = vunpack.c.l.b16 %v581_v57  ;;  %v677_v17 = vunpack.c.l.b16 %v582_v58  ;;  %v652_v18 = vunpack.c.l.b16 %v602_v61  ;;  %v653_v19 = vunpack.c.l.b16 %v603_v62  ;;  %v3376_v61 = vld [vmem:[%s4674_s2 + $0xa8] sm:$0xff] }
  0x22   : > { %3627 = vmatpush.bf16.msra.mxu3 %v3365_v45  ;;  %1048 = vmatpush.bf16.msra.mxu0 %v3365_v45  ;;  %v3825_v20 = vpack.c.b16 %v661_v4, %v660_v2  ;;  %v504_v21 = vadd.f32 %v3780_v9, %v469_v5  ;;  %v3430_v22 = vunpack.c.h.bf16 %v3428_v1  ;;  %v3828_v23 = vpack.c.b16 %v669_v7, %v668_v6  ;;  %v3384_v62 = vld [vmem:[%s4674_s2 + $0xe8] sm:$0xff] }
  0x23   : > { %v535_v26 = vmax.f32 %v503_v8, 0.0  ;;  %v511_v27 = vadd.f32 %v3780_v9, %v476_v10  ;;  %v460_v28 = vmul.f32 %v3767_v3, %v3429_v14  ;;  %v512_v29 = vadd.f32 %v3780_v9, %v477_v11 }
  0x24   : > { %4704 = vst [vmem:[#allocation2_spill] sm:$0xff] %v3828_v23  ;;  %v519_v30 = vadd.f32 %v3780_v9, %v484_v12  ;;  %v520_v31 = vadd.f32 %v3780_v9, %v485_v13  ;;  %v461_v32 = vmul.f32 %v3767_v3, %v3430_v22  ;;  %v3842_v33 = vpack.c.b16 %v677_v17, %v676_v16  ;;  %v3360_v12 = vld [vmem:[%s4674_s2 + $0x28] sm:$0xff] }
  0x25   : > { %3628 = vmatpush.bf16.msra.mxu1 %v3364_v60  ;;  %3629 = vmatpush.bf16.msra.mxu2 %v3364_v60  ;;  %v3844_v34 = vpack.c.b16 %v653_v19, %v652_v18  ;;  %v495_v35 = vadd.f32 %v3780_v9, %v460_v28  ;;  %v536_v38 = vmax.f32 %v504_v21, 0.0  ;;  %v543_v43 = vmax.f32 %v511_v27, 0.0  ;;  %v3392_v13 = vld [vmem:[%s4674_s2 + $0x128] sm:$0xff]  ;;  %v3375_v18 = vld [vmem:[%s4674_s2 + $0xa0] sm:$0xff] }
  0x26   : > { %3630 = vmatpush.bf16.msra.mxu3 %v3364_v60  ;;  %1049 = vmatpush.bf16.msra.mxu0 %v3364_v60  ;;  %4705 = vst [vmem:[#allocation3_spill] sm:$0xff] %v3842_v33  ;;  %v496_v39 = vadd.f32 %v3780_v9, %v461_v32  ;;  %v3864_v45 = vpack.c.bf16 %v535_v26, %v535_v26  ;;  %v544_v46 = vmax.f32 %v512_v29, 0.0  ;;  %v551_v47 = vmax.f32 %v519_v30, 0.0  ;;  %v3383_v19 = vld [vmem:[%s4674_s2 + $0xe0] sm:$0xff] }
  0x27   : > { %v552_v48 = vmax.f32 %v520_v31, 0.0  ;;  %v527_v50 = vmax.f32 %v495_v35, 0.0  ;;  %v3449_v52 = vunpack.c.l.bf16 %v3583_v40  ;;  %v568_v54 = vpack.c.bf16 %v536_v38, %v536_v38  ;;  %v3359_v35 = vld [vmem:[%s4674_s2 + $0x20] sm:$0xff] }
  0x28   : > { %v528_v51 = vmax.f32 %v496_v39, 0.0  ;;  %v3450_v56 = vunpack.c.h.bf16 %v3583_v40  ;;  %v3465_v57 = vunpack.c.l.bf16 %v3587_v44  ;;  %v3466_v58 = vunpack.c.h.bf16 %v3587_v44  ;;  %v3391_v39 = vld [vmem:[%s4674_s2 + $0x120] sm:$0xff] }
  0x29   : > { %3631 = vmatpush.bf16.msra.mxu1 %v3363_v15  ;;  %3632 = vmatpush.bf16.msra.mxu2 %v3363_v15  ;;  %v575_v60 = vpack.c.bf16 %v543_v43, %v543_v43  ;;  %v3481_v63 = vunpack.c.l.bf16 %v3591_v49  ;;  %v3482_v0 = vunpack.c.h.bf16 %v3591_v49  ;;  %v662_v1 = vunpack.c.l.b16 %v3864_v45  ;;  %v3382_v43 = vld [vmem:[%s4674_s2 + $0xd8] sm:$0xff] }
  0x2a   : > { %3633 = vmatpush.bf16.msra.mxu3 %v3363_v15  ;;  %1050 = vmatpush.bf16.msra.mxu0 %v3363_v15  ;;  %v576_v2 = vpack.c.bf16 %v544_v46, %v544_v46  ;;  %v583_v4 = vpack.c.bf16 %v551_v47, %v551_v47  ;;  %v584_v5 = vpack.c.bf16 %v552_v48, %v552_v48  ;;  %v3433_v10 = vunpack.c.l.bf16 %v3579_v59 }
  0x2b   : > { %v559_v6 = vpack.c.bf16 %v527_v50, %v527_v50  ;;  %v560_v7 = vpack.c.bf16 %v528_v51, %v528_v51  ;;  %v470_v8 = vmul.f32 %v3767_v3, %v3449_v52  ;;  %v663_v11 = vunpack.c.l.b16 %v568_v54  ;;  %v3358_v54 = vld [vmem:[%s4674_s2 + $0x18] sm:$0xff] }
  0x2c   : > { %1071 = vmatmul.bf16.vlgmr.msra.gmra.mxu1 %v3825_v20  ;;  %1091 = vmatmul.bf16.vlgmr.msra.gmra.mxu2 %v3828_v23  ;;  %v471_v14 = vmul.f32 %v3767_v3, %v3450_v56  ;;  %v478_v15 = vmul.f32 %v3767_v3, %v3465_v57  ;;  %v479_v16 = vmul.f32 %v3767_v3, %v3466_v58  ;;  %v670_v17 = vunpack.c.l.b16 %v575_v60  ;;  %v3373_v58 = vld [vmem:[%s4674_s2 + $0x90] sm:$0xff] }
  0x2d   : > { %1334 = vmatpush.bf16.msrb.mxu2 %v3378_v24  ;;  %1111 = vmatmul.bf16.vlgmr.msra.gmra.mxu3 %v3842_v33  ;;  %v486_v21 = vmul.f32 %v3767_v3, %v3481_v63  ;;  %v487_v22 = vmul.f32 %v3767_v3, %v3482_v0  ;;  %v3434_v24 = vunpack.c.h.bf16 %v3579_v59  ;;  %v678_v26 = vunpack.c.l.b16 %v583_v4  ;;  %v3381_v59 = vld [vmem:[%s4674_s2 + $0xd0] sm:$0xff] }
  0x2e   : > { %1520 = vmatpush.bf16.msrb.mxu3 %v3386_v25  ;;  %1051 = vmatmul.bf16.vlgmr.msra.gmra.mxu0 %v3844_v34  ;;  %v671_v25 = vunpack.c.l.b16 %v576_v2  ;;  %v679_v27 = vunpack.c.l.b16 %v584_v5  ;;  %v462_v28 = vmul.f32 %v3767_v3, %v3433_v10  ;;  %v654_v29 = vunpack.c.l.b16 %v559_v6  ;;  %v3588_v0 = vld [vmem:[%s3762_s15 + $0x50] sm:$0xff]  }
  0x2f   : > { %1180 = vmatpush.bf16.msrb.mxu1 %v3362_v36  ;;  %1707 = vmatpush.bf16.msrb.mxu0 %v3394_v37  ;;  %v655_v30 = vunpack.c.l.b16 %v560_v7  ;;  %v505_v31 = vadd.f32 %v3780_v9, %v470_v8  ;;  %v463_v32 = vmul.f32 %v3767_v3, %v3434_v24  ;;  %v506_v36 = vadd.f32 %v3780_v9, %v471_v14  ;;  %v3357_v6 = vld [vmem:[%s4674_s2 + $0x10] sm:$0xff]  ;;  %v3372_v14 = vld [vmem:[%s4674_s2 + $0x88] sm:$0xff] }
  0x30   : > { %v513_v37 = vadd.f32 %v3780_v9, %v478_v15  ;;  %v514_v38 = vadd.f32 %v3780_v9, %v479_v16  ;;  %v521_v40 = vadd.f32 %v3780_v9, %v486_v21  ;;  %v3921_v44 = vpack.c.b16 %v663_v11, %v662_v1  ;;  %v3592_v1 = vld [vmem:[%s3762_s15 + $0x70] sm:$0xff]   ;;  %v3380_v15 = vld [vmem:[%s4674_s2 + $0xc8] sm:$0xff] }
  0x31   : > { %1335 = vmatpush.bf16.msrb.mxu2 %v3377_v41  ;;  %v522_v41 = vadd.f32 %v3780_v9, %v487_v22  ;;  %v3923_v45 = vpack.c.b16 %v671_v25, %v670_v17  ;;  %v497_v46 = vadd.f32 %v3780_v9, %v462_v28  ;;  %v3926_v47 = vpack.c.b16 %v679_v27, %v678_v26  ;;  %v3580_v7 = vld [vmem:[%s3762_s15 + $0x10] sm:$0xff]  }
  0x32   : > { %1521 = vmatpush.bf16.msrb.mxu3 %v3385_v42  ;;  %v3374_v42 = vld [vmem:[%s4674_s2 + $0x98] sm:$0xff]  ;;  %v3928_v48 = vpack.c.b16 %v655_v30, %v654_v29  ;;  %v537_v49 = vmax.f32 %v505_v31, 0.0  ;;  %v498_v50 = vadd.f32 %v3780_v9, %v463_v32  ;;  %v538_v51 = vmax.f32 %v506_v36, 0.0  ;;  %v3389_v8 = vld [vmem:[%s4674_s2 + $0x110] sm:$0xff]  ;;  %v3356_v30 = vld [vmem:[%s4674_s2 + $0x8] sm:$0xff] }
  0x33   : > { %1181 = vmatpush.bf16.msrb.mxu1 %v3361_v53  ;;  %1708 = vmatpush.bf16.msrb.mxu0 %v3393_v55  ;;  %4706 = vst [vmem:[#allocation4_spill] sm:$0xff] %v3923_v45  ;;  %v545_v52 = vmax.f32 %v513_v37, 0.0  ;;  %v546_v53 = vmax.f32 %v514_v38, 0.0  ;;  %v3390_v55 = vld [vmem:[%s4674_s2 + $0x118] sm:$0xff]  ;;  %v553_v56 = vmax.f32 %v521_v40, 0.0  ;;  %v554_v57 = vmax.f32 %v522_v41, 0.0 }
  0x34   : > { %4707 = vst [vmem:[#allocation5_spill] sm:$0xff] %v3926_v47  ;;  %v529_v60 = vmax.f32 %v497_v46, 0.0  ;;  %v530_v63 = vmax.f32 %v498_v50, 0.0  ;;  %v570_v2 = vpack.c.bf16 %v538_v51, %v538_v51  ;;  %v3469_v17 = vunpack.c.l.bf16 %v3588_v0  ;;  %v3388_v31 = vld [vmem:[%s4674_s2 + $0x108] sm:$0xff]  ;;  %v3371_v38 = vld [vmem:[%s4674_s2 + $0x80] sm:$0xff] }
  0x35   : > { %1336 = vmatpush.bf16.msrb.mxu2 %v3376_v61  ;;  %v3584_v61 = vld [vmem:[%s3762_s15 + $0x30] sm:$0xff]   ;;  %v577_v4 = vpack.c.bf16 %v545_v52, %v545_v52  ;;  %v578_v5 = vpack.c.bf16 %v546_v53, %v546_v53  ;;  %v585_v10 = vpack.c.bf16 %v553_v56, %v553_v56  ;;  %v586_v11 = vpack.c.bf16 %v554_v57, %v554_v57  ;;  %v3355_v53 = vld [vmem:[%s4674_s2] sm:$0xff] }
  0x36   : > { %1522 = vmatpush.bf16.msrb.mxu3 %v3384_v62  ;;  %v569_v62 = vpack.c.bf16 %v537_v49, %v537_v49  ;;  %v561_v16 = vpack.c.bf16 %v529_v60, %v529_v60  ;;  %v562_v21 = vpack.c.bf16 %v530_v63, %v530_v63  ;;  %v3486_v22 = vunpack.c.h.bf16 %v3592_v1 }
  0x37   : > { %1182 = vmatpush.bf16.msrb.mxu1 %v3360_v12  ;;  %1709 = vmatpush.bf16.msrb.mxu0 %v3392_v13  ;;  %v3453_v12 = vunpack.c.l.bf16 %v3584_v61  ;;  %v3454_v13 = vunpack.c.h.bf16 %v3584_v61  ;;  %v3437_v24 = vunpack.c.l.bf16 %v3580_v7  ;;  %v3438_v25 = vunpack.c.h.bf16 %v3580_v7 }
  0x38   : > { %v664_v26 = vunpack.c.l.b16 %v569_v62  ;;  %v665_v27 = vunpack.c.l.b16 %v570_v2  ;;  %v672_v28 = vunpack.c.l.b16 %v577_v4  ;;  %v673_v29 = vunpack.c.l.b16 %v578_v5 }
  0x39   : > { %1337 = vmatpush.bf16.msrb.mxu2 %v3375_v18  ;;  %v3470_v18 = vunpack.c.h.bf16 %v3588_v0  ;;  %v680_v32 = vunpack.c.l.b16 %v585_v10  ;;  %v472_v36 = vmul.f32 %v3767_v3, %v3453_v12  ;;  %v473_v37 = vmul.f32 %v3767_v3, %v3454_v13  ;;  %v3402_v12 = vld [vmem:[%s4674_s2 + $0x178] sm:$0xff] }
  0x3a   : > { %1523 = vmatpush.bf16.msrb.mxu3 %v3383_v19  ;;  %v3485_v19 = vunpack.c.l.bf16 %v3592_v1  ;;  %v656_v40 = vunpack.c.l.b16 %v561_v16  ;;  %v480_v41 = vmul.f32 %v3767_v3, %v3469_v17  ;;  %v657_v46 = vunpack.c.l.b16 %v562_v21  ;;  %v3426_v13 = vld [vmem:[%s4674_s2 + $0x238] sm:$0xff] }
  0x3b   : > { %1183 = vmatpush.bf16.msrb.mxu1 %v3359_v35  ;;  %1710 = vmatpush.bf16.msrb.mxu0 %v3391_v39  ;;  %v681_v35 = vunpack.c.l.b16 %v586_v11  ;;  %v3379_v39 = vld [vmem:[%s4674_s2 + $0xc0] sm:$0xff]  ;;  %v489_v49 = vmul.f32 %v3767_v3, %v3486_v22  ;;  %v464_v50 = vmul.f32 %v3767_v3, %v3437_v24  ;;  %v465_v51 = vmul.f32 %v3767_v3, %v3438_v25  ;;  %v3418_v11 = vld [vmem:[%s4674_s2 + $0x1f8] sm:$0xff] }
  0x3c   : > { %1076 = vmatmul.bf16.gmra.mxu1 %v3921_v44  ;;  %1096 = vmatmul.bf16.gmra.mxu2 %v3923_v45  ;;  %v3983_v52 = vpack.c.b16 %v665_v27, %v664_v26  ;;  %v507_v56 = vadd.f32 %v3780_v9, %v472_v36  ;;  %v508_v57 = vadd.f32 %v3780_v9, %v473_v37 }
  0x3d   : > { %1338 = vmatpush.bf16.msrb.mxu2 %v3374_v42  ;;  %1116 = vmatmul.bf16.gmra.mxu3 %v3926_v47  ;;  %v481_v42 = vmul.f32 %v3767_v3, %v3470_v18  ;;  %v4000_v61 = vpack.c.b16 %v657_v46, %v656_v40  ;;  %v524_v62 = vadd.f32 %v3780_v9, %v489_v49  ;;  %v714_v40 = vshrl.u32 %v3928_v48, 16 }
  0x3e   : > { %1524 = vmatpush.bf16.msrb.mxu3 %v3382_v43  ;;  %1056 = vmatmul.bf16.gmra.mxu0 %v3928_v48  ;;  %v488_v43 = vmul.f32 %v3767_v3, %v3485_v19  ;;  %4708 = vst [vmem:[#allocation6_spill] sm:$0xff] %v3983_v52  ;;  %v3995_v3 = vpack.c.b16 %v681_v35, %v680_v32  ;;  %v539_v1 = vmax.f32 %v507_v56, 0.0  ;;  %v540_v2 = vmax.f32 %v508_v57, 0.0 }
  0x3f   : > { %1184 = vmatpush.bf16.msrb.mxu1 %v3358_v54  ;;  %1711 = vmatpush.bf16.msrb.mxu0 %v3390_v55  ;;  %v3387_v54 = vld [vmem:[%s4674_s2 + $0x100] sm:$0xff]  ;;  %v3991_v55 = vpack.c.b16 %v673_v29, %v672_v28  ;;  %v499_v63 = vadd.f32 %v3780_v9, %v464_v50  ;;  %v500_v0 = vadd.f32 %v3780_v9, %v465_v51  ;;  %v556_v7 = vmax.f32 %v524_v62, 0.0 }
  0x40   : > { %4710 = vst [vmem:[#allocation8_spill] sm:$0xff] %v3995_v3  ;;  %v523_v60 = vadd.f32 %v3780_v9, %v488_v43  ;;  %v716_v43 = vrot.slane %v714_v40, 7  ;;  %v717_v46 = vshll.u32 %v3928_v48, 16  ;;  %v721_v62 = vshrl.u32 %v4000_v61, 16 }
  0x41   : > { %1339 = vmatpush.bf16.msrb.mxu2 %v3373_v58  ;;  %4709 = vst [vmem:[#allocation7_spill] sm:$0xff] %v3991_v55  ;;  %v515_v58 = vadd.f32 %v3780_v9, %v480_v41  ;;  %v532_v10 = vmax.f32 %v500_v0, 0.0  ;;  %v588_v19 = vpack.c.bf16 %v556_v7, %v556_v7 }
  0x42   : > { %1525 = vmatpush.bf16.msrb.mxu3 %v3381_v59  ;;  %v516_v59 = vadd.f32 %v3780_v9, %v481_v42  ;;  %v3410_v9 = vld [vmem:[%s4674_s2 + $0x1b8] sm:$0xff]  ;;  %v723_v0 = vrot.slane %v721_v62, 7 }
  0x43   : > { %1185 = vmatpush.bf16.msrb.mxu1 %v3357_v6  ;;  %1712 = vmatpush.bf16.msrb.mxu0 %v3389_v8  ;;  %v547_v4 = vmax.f32 %v515_v58, 0.0  ;;  %v555_v6 = vmax.f32 %v523_v60, 0.0  ;;  %v531_v8 = vmax.f32 %v499_v63, 0.0  ;;  %v564_v22 = vpack.c.bf16 %v532_v10, %v532_v10  ;;  %v3409_v58 = vld [vmem:[%s4674_s2 + $0x1b0] sm:$0xff] }
  0x44   : > { %v548_v5 = vmax.f32 %v516_v59, 0.0  ;;  %v683_v29 = vunpack.c.l.b16 %v588_v19  ;;  %v3417_v59 = vld [vmem:[%s4674_s2 + $0x1f0] sm:$0xff] }
  0x45   : > { %1340 = vmatpush.bf16.msrb.mxu2 %v3372_v14  ;;  %v571_v14 = vpack.c.bf16 %v539_v1, %v539_v1  ;;  %v579_v16 = vpack.c.bf16 %v547_v4, %v547_v4  ;;  %v587_v18 = vpack.c.bf16 %v555_v6, %v555_v6  ;;  %v563_v21 = vpack.c.bf16 %v531_v8, %v531_v8  ;;  %v3401_v60 = vld [vmem:[%s4674_s2 + $0x170] sm:$0xff] }
  0x46   : > { %1526 = vmatpush.bf16.msrb.mxu3 %v3380_v15  ;;  %v572_v15 = vpack.c.bf16 %v540_v2, %v540_v2  ;;  %v580_v17 = vpack.c.bf16 %v548_v5, %v548_v5  ;;  %v3425_v63 = vld [vmem:[%s4674_s2 + $0x230] sm:$0xff]  ;;  %v724_v1 = vshll.u32 %v4000_v61, 16 }
  0x47   : > { %1186 = vmatpush.bf16.msrb.mxu1 %v3356_v30  ;;  %1713 = vmatpush.bf16.msrb.mxu0 %v3388_v31  ;;  %v666_v24 = vunpack.c.l.b16 %v571_v14  ;;  %v674_v26 = vunpack.c.l.b16 %v579_v16  ;;  %v682_v28 = vunpack.c.l.b16 %v587_v18  ;;  %v658_v30 = vunpack.c.l.b16 %v563_v21  ;;  %v3416_v16 = vld [vmem:[%s4674_s2 + $0x1e8] sm:$0xff] }
  0x48   : > { %v667_v25 = vunpack.c.l.b16 %v572_v15  ;;  %v675_v27 = vunpack.c.l.b16 %v580_v17  ;;  %v659_v31 = vunpack.c.l.b16 %v564_v22  ;;  %v726_v4 = vor.u32 %v724_v1, %v723_v0  ;;  %v3408_v15 = vld [vmem:[%s4674_s2 + $0x1a8] sm:$0xff] }
  0x49   : > { %1341 = vmatpush.bf16.msrb.mxu2 %v3371_v38  ;;  %v4025_v36 = vpack.c.b16 %v683_v29, %v682_v28  ;;  %v707_v38 = vshrl.u32 %v3844_v34, 16  ;;  %v875_v8 = vrot.slane %v724_v1, 1  ;;  %v735_v17 = vshrl.u32 %v3825_v20, 16  ;;  %v3400_v18 = vld [vmem:[%s4674_s2 + $0x168] sm:$0xff] }
  0x4a   : > { %1527 = vmatpush.bf16.msrb.mxu3 %v3379_v39  ;;  %v4021_v32 = vpack.c.b16 %v667_v25, %v666_v24  ;;  %v4023_v35 = vpack.c.b16 %v675_v27, %v674_v26  ;;  %v4027_v37 = vpack.c.b16 %v659_v31, %v658_v30  ;;  %v710_v39 = vshll.u32 %v3844_v34, 16  ;;  %v3424_v24 = vld [vmem:[%s4674_s2 + $0x228] sm:$0xff] }
  0x4b   : > { %1187 = vmatpush.bf16.msrb.mxu1 %v3355_v53  ;;  %1714 = vmatpush.bf16.msrb.mxu0 %v3387_v54  ;;  %v709_v41 = vrot.slane %v707_v38, 7  ;;  %v719_v34 = vor.u32 %v717_v46, %v716_v43  ;;  %v4072_v6 = vsel %vm4037_vm4, 0, %v726_v4  ;;  %v737_v21 = vrot.slane %v735_v17, 7 }
  0x4c   : > { %1081 = vmatmul.bf16.gmra.mxu1 %v3983_v52  ;;  %1101 = vmatmul.bf16.gmra.mxu2 %v3991_v55  ;;  %4711 = vst [vmem:[#allocation9_spill] sm:$0xff] %v4021_v32  ;;  %v871_v42 = vrot.slane %v710_v39, 1  ;;  %v728_v7 = vshrl.u32 %v4027_v37, 16  ;;  %v738_v22 = vshll.u32 %v3825_v20, 16  ;;  %v742_v29 = vshrl.u32 %v3921_v44, 16 }
  0x4d   : > { %1121 = vmatmul.bf16.gmra.mxu3 %v3995_v3  ;;  %2079 = vmatpush.bf16.msra.mxu2 %v3410_v9  ;;  %v712_v49 = vor.u32 %v710_v39, %v709_v41  ;;  %v854_v57 = vsel %vm4037_vm4, 0, %v719_v34  ;;  %v731_v9 = vshll.u32 %v4027_v37, 16  ;;  %v749_v34 = vshrl.u32 %v3983_v52, 16 }
  0x4e   : > { %1061 = vmatmul.bf16.gmra.mxu0 %v4000_v61  ;;  %2266 = vmatpush.bf16.msra.mxu3 %v3418_v11  ;;  %v872_v51 = vor.u32 %v871_v42, %v707_v38  ;;  %v730_v10 = vrot.slane %v728_v7, 7  ;;  %v876_v11 = vor.u32 %v875_v8, %v721_v62  ;;  %v740_v26 = vor.u32 %v738_v22, %v737_v21 }
  0x4f   : > { %1893 = vmatpush.bf16.msra.mxu1 %v3402_v12  ;;  %2452 = vmatpush.bf16.msra.mxu0 %v3426_v13  ;;  %v853_v54 = vsel %vm4037_vm4, 0, %v712_v49  ;;  %v877_v19 = vrot.slane %v731_v9, 1  ;;  %v879_v30 = vrot.slane %v738_v22, 1  ;;  %v744_v31 = vrot.slane %v742_v29, 7  ;;  %v3407_v49 = vld [vmem:[%s4674_s2 + $0x1a0] sm:$0xff] }
  0x50   : > { %v928_v56 = vsel %vm4041_vm5, %v872_v51, 0  ;;  %v733_v12 = vor.u32 %v731_v9, %v730_v10  ;;  %v4081_v13 = vsel %vm4041_vm5, %v876_v11, 0  ;;  %v4111_v28 = vsel %vm4037_vm4, 0, %v740_v26  ;;  %v3415_v51 = vld [vmem:[%s4674_s2 + $0x1e0] sm:$0xff] }
  0x51   : > { %2080 = vmatpush.bf16.msra.mxu2 %v3409_v58  ;;  %v878_v25 = vor.u32 %v877_v19, %v728_v7  ;;  %v745_v38 = vshll.u32 %v3921_v44, 16  ;;  %v880_v39 = vor.u32 %v879_v30, %v735_v17  ;;  %v751_v62 = vrot.slane %v749_v34, 7 }
  0x52   : > { %2267 = vmatpush.bf16.msra.mxu3 %v3417_v59  ;;  %v4085_v14 = vsel %vm4037_vm4, 0, %v733_v12  ;;  %v756_v11 = vshrl.u32 %v4021_v32, 16  ;;  %v759_v21 = vshll.u32 %v4021_v32, 16 }
  0x53   : > { %1894 = vmatpush.bf16.msra.mxu1 %v3401_v60  ;;  %2453 = vmatpush.bf16.msra.mxu0 %v3425_v63  ;;  %v4107_v27 = vsel %vm4041_vm5, %v878_v25, 0  ;;  %v4123_v42 = vsel %vm4041_vm5, %v880_v39, 0  ;;  %v881_v59 = vrot.slane %v745_v38, 1  ;;  %v752_v63 = vshll.u32 %v3983_v52, 16  ;;  %v3406_v39 = vld [vmem:[%s4674_s2 + $0x198] sm:$0xff] }
  0x54   : > { %v758_v19 = vrot.slane %v756_v11, 7 }
  0x55   : > { %2081 = vmatpush.bf16.msra.mxu2 %v3408_v15  ;;  %v882_v0 = vor.u32 %v881_v59, %v742_v29  ;;  %v754_v1 = vor.u32 %v752_v63, %v751_v62  ;;  %v883_v17 = vrot.slane %v752_v63, 1  ;;  %v885_v59 = vrot.slane %v759_v21, 1 }
  0x56   : > { %2268 = vmatpush.bf16.msra.mxu3 %v3416_v16 }
  0x57   : > { %1895 = vmatpush.bf16.msra.mxu1 %v3400_v18  ;;  %2454 = vmatpush.bf16.msra.mxu0 %v3424_v24  ;;  %v4165_v8 = vsel %vm4041_vm5, %v882_v0, 0  ;;  %v4171_v9 = vsel %vm4037_vm4, 0, %v754_v1  ;;  %v884_v22 = vor.u32 %v883_v17, %v749_v34  ;;  %v761_v24 = vor.u32 %v759_v21, %v758_v19  ;;  %v3398_v0 = vld [vmem:[%s4674_s2 + $0x158] sm:$0xff] }
  0x58   : > { %4718 = vst [vmem:[#allocation12_spill] sm:$0xff] %v4171_v9  ;;  %v3422_v1 = vld [vmem:[%s4674_s2 + $0x218] sm:$0xff]  ;;  %v886_v17 = vor.u32 %v885_v59, %v756_v11  ;;  %v770_v11 = vshrl.u32 %v3923_v45, 16 }
  0x59   : > { %2082 = vmatpush.bf16.msra.mxu2 %v3407_v49  ;;  %v4195_v30 = vsel %vm4041_vm5, %v884_v22, 0  ;;  %v763_v49 = vshrl.u32 %v3828_v23, 16 }
  0x5a   : > { %2269 = vmatpush.bf16.msra.mxu3 %v3415_v51  ;;  %4721 = vst [vmem:[#allocation15_spill] sm:$0xff] %v4195_v30 }
  0x5b   : > { %v765_v63 = vrot.slane %v763_v49, 7 }
  0x5c   : > { %1086 = vmatmul.bf16.gmra.mxu1 %v4021_v32  ;;  %1106 = vmatmul.bf16.gmra.mxu2 %v4023_v35 }
  0x5d   : > { %1126 = vmatmul.bf16.gmra.mxu3 %v4025_v36  ;;  %2083 = vmatpush.bf16.msra.mxu2 %v3406_v39  ;;  %v4237_v39 = vsel %vm4041_vm5, %v886_v17, 0 }
  0x5e   : > { %1066 = vmatmul.bf16.gmra.mxu0 %v4027_v37  ;;  %4725 = vst [vmem:[#allocation19_spill] sm:$0xff] %v4237_v39 }
  0x6c   : > { %1188 = vmatmul.bf16.vlgmr.msrb.gmra.mxu1 %v853_v54  ;;  %1342 = vmatmul.bf16.vlgmr.msrb.gmra.mxu2 %v928_v56 }
  0x6d   : > { %1528 = vmatmul.bf16.vlgmr.msrb.gmra.mxu3 %v854_v57 }
  0x6e   : > { %1715 = vmatmul.bf16.vlgmr.msrb.gmra.mxu0 %v3928_v48  ;;  %v873_v48 = vrot.slane %v717_v46, 1 }
  0x70   : > { %v874_v2 = vor.u32 %v873_v48, %v714_v40  ;;  %v747_v40 = vor.u32 %v745_v38, %v744_v31  ;;  %v3423_v48 = vld [vmem:[%s4674_s2 + $0x220] sm:$0xff]  ;;  %v4201_v38 = vsel %vm4037_vm4, 0, %v761_v24 }
  0x71   : > { %2455 = vmatpush.bf16.msra.mxu0 %v3423_v48  ;;  %4722 = vst [vmem:[#allocation16_spill] sm:$0xff] %v4201_v38  ;;  %v766_v48 = vshll.u32 %v3828_v23, 16 }
  0x72   : > { %v4068_v5 = vsel %vm4041_vm5, %v874_v2, 0  ;;  %v4129_v46 = vsel %vm4037_vm4, 0, %v747_v40  ;;  %v3414_v40 = vld [vmem:[%s4674_s2 + $0x1d8] sm:$0xff] }
  0x73   : > { %2270 = vmatpush.bf16.msra.mxu3 %v3414_v40  ;;  %v768_v19 = vor.u32 %v766_v48, %v765_v63 }
  0x75   : > { %2456 = vmatpush.bf16.msra.mxu0 %v3422_v1  ;;  %v887_v1 = vrot.slane %v766_v48, 1 }
  0x7c   : > { %1193 = vmatmul.bf16.gmra.mxu1 %v854_v57  ;;  %1347 = vmatmul.bf16.gmra.mxu2 %v4068_v5  ;;  %v3399_v57 = vld [vmem:[%s4674_s2 + $0x160] sm:$0xff] }
  0x7d   : > { %1533 = vmatmul.bf16.gmra.mxu3 %v4072_v6  ;;  %1896 = vmatpush.bf16.msra.mxu1 %v3399_v57 }
  0x7e   : > { %1720 = vmatmul.bf16.gmra.mxu0 %v4000_v61 }
  0x81   : > { %1897 = vmatpush.bf16.msra.mxu1 %v3398_v0 }
  0x8c   : > { %1198 = vmatmul.bf16.gmra.mxu1 %v4072_v6  ;;  %1352 = vmatmul.bf16.gmra.mxu2 %v4081_v13 }
  0x8d   : > { %1538 = vmatmul.bf16.gmra.mxu3 %v4085_v14 }
  0x8e   : > { %1725 = vmatmul.bf16.gmra.mxu0 %v4027_v37 }
  0x9c   : > { %1203 = vmatmul.bf16.gmra.mxu1 %v4085_v14  ;;  %1357 = vmatmul.bf16.gmra.mxu2 %v4107_v27 }
  0x9d   : > { %1543 = vmatmul.bf16.gmra.mxu3 %v4111_v28 }
  0x9e   : > { %1730 = vmatmul.bf16.gmra.mxu0 %v3825_v20 }
  0xa9   : > { %v4119_v41 = vpop.f32.mrf.mxu1 }
  0xab   : > { %v4125_v43 = vpop.f32.mrf.mxu0 }
  0xac   : > { %1208 = vmatmul.bf16.gmra.mxu1 %v4111_v28  ;;  %1362 = vmatmul.bf16.gmra.mxu2 %v4123_v42 }
  0xad   : > { %1548 = vmatmul.bf16.gmra.mxu3 %v4129_v46 }
  0xae   : > { %1735 = vmatmul.bf16.gmra.mxu0 %v3921_v44 }
  0xaf   : > { %v4142_v54 = vpop.f32.mrf.mxu2 }
  0xb0   : > { %v4144_v56 = vpop.f32.mrf.mxu3 }
  0xb1   : > { %4716 = vst [vmem:[#allocation10_spill] sm:$0xff] %v4144_v56  ;;  %v4149_v58 = vpop.f32.mrf.mxu1 }
  0xb3   : > { %v4151_v60 = vpop.f32.mrf.mxu0 }
  0xb7   : > { %v4157_v2 = vpop.f32.mrf.mxu2 }
  0xb8   : > { %v4159_v4 = vpop.f32.mrf.mxu3 }
  0xb9   : > { %4717 = vst [vmem:[#allocation11_spill] sm:$0xff] %v4159_v4  ;;  %v4161_v7 = vpop.f32.mrf.mxu1 }
  0xbb   : > { %v4167_v10 = vpop.f32.mrf.mxu0 }
  0xbc   : > { %1213 = vmatmul.bf16.gmra.mxu1 %v4129_v46  ;;  %1367 = vmatmul.bf16.gmra.mxu2 %v4165_v8 }
  0xbd   : > { %1553 = vmatmul.bf16.gmra.mxu3 %v4171_v9 }
  0xbe   : > { %1740 = vmatmul.bf16.gmra.mxu0 %v3983_v52  ;;  %v3397_v52 = vld [vmem:[%s4674_s2 + $0x150] sm:$0xff] }
  0xbf   : > { %v4178_v12 = vpop.f32.mrf.mxu2  ;;  %1898 = vmatpush.bf16.msra.mxu1 %v3397_v52 }
  0xc0   : > { %v4180_v15 = vpop.f32.mrf.mxu3 }
  0xc1   : > { %4719 = vst [vmem:[#allocation13_spill] sm:$0xff] %v4180_v15  ;;  %v4182_v16 = vpop.f32.mrf.mxu1 }
  0xc3   : > { %v4184_v18 = vpop.f32.mrf.mxu0 }
  0xc7   : > { %v4187_v25 = vpop.f32.mrf.mxu2 }
  0xc8   : > { %v4189_v26 = vpop.f32.mrf.mxu3 }
  0xc9   : > { %4720 = vst [vmem:[#allocation14_spill] sm:$0xff] %v4189_v26  ;;  %v4191_v29 = vpop.f32.mrf.mxu1  ;;  %v888_v26 = vor.u32 %v887_v1, %v763_v49 }
  0xcb   : > { %v4197_v31 = vpop.f32.mrf.mxu0 }
  0xcc   : > { %1218 = vmatmul.bf16.gmra.mxu1 %v4171_v9  ;;  %1372 = vmatmul.bf16.gmra.mxu2 %v4195_v30  ;;  %v780_v30 = vshll.u32 %v3991_v55, 16 }
  0xcd   : > { %1558 = vmatmul.bf16.gmra.mxu3 %v4201_v38 }
  0xce   : > { %1745 = vmatmul.bf16.gmra.mxu0 %v4021_v32 }
  0xcf   : > { %v4214_v51 = vpop.f32.mrf.mxu2 }
  0xd0   : > { %v4216_v34 = vpop.f32.mrf.mxu3 }
  0xd1   : > { %4723 = vst [vmem:[#allocation17_spill] sm:$0xff] %v4216_v34  ;;  %v4218_v57 = vpop.f32.mrf.mxu1  ;;  %v4243_v34 = vsel %vm4037_vm4, 0, %v768_v19  ;;  %v772_v19 = vrot.slane %v770_v11, 7 }
  0xd2   : > { %4726 = vst [vmem:[#allocation20_spill] sm:$0xff] %v4243_v34 }
  0xd3   : > { %v4220_v62 = vpop.f32.mrf.mxu0 }
  0xd7   : > { %v4229_v22 = vpop.f32.mrf.mxu2 }
  0xd8   : > { %v4231_v21 = vpop.f32.mrf.mxu3 }
  0xd9   : > { %4724 = vst [vmem:[#allocation18_spill] sm:$0xff] %v4231_v21  ;;  %v4233_v24 = vpop.f32.mrf.mxu1  ;;  %v773_v21 = vshll.u32 %v3923_v45, 16 }
  0xdb   : > { %v4239_v40 = vpop.f32.mrf.mxu0  ;;  %v775_v15 = vor.u32 %v773_v21, %v772_v19 }
  0xdc   : > { %1223 = vmatmul.bf16.gmra.mxu1 %v4201_v38  ;;  %1377 = vmatmul.bf16.gmra.mxu2 %v4237_v39  ;;  %v4265_v38 = vsel %vm4041_vm5, %v888_v26, 0  ;;  %v3405_v26 = vld [vmem:[%s4674_s2 + $0x190] sm:$0xff] }
  0xdd   : > { %1563 = vmatmul.bf16.gmra.mxu3 %v4243_v34  ;;  %4731 = vst [vmem:[#allocation25_spill] sm:$0xff] %v4265_v38  ;;  %v4270_v48 = vsel %vm4037_vm4, 0, %v775_v15  ;;  %2084 = vmatpush.bf16.msra.mxu2 %v3405_v26  ;;  %v3421_v26 = vld [vmem:[%s4674_s2 + $0x210] sm:$0xff] }
  0xde   : > { %1750 = vmatmul.bf16.gmra.mxu0 %v3828_v23 }
  0xdf   : > { %v4250_v59 = vpop.f32.mrf.mxu2  ;;  %2457 = vmatpush.bf16.msra.mxu0 %v3421_v26 }
  0xe0   : > { %4727 = vst [vmem:[#allocation21_spill] sm:$0xff] %v4250_v59  ;;  %v4252_v63 = vpop.f32.mrf.mxu3 }
  0xe1   : > { %4728 = vst [vmem:[#allocation22_spill] sm:$0xff] %v4252_v63  ;;  %v4254_v0 = vpop.f32.mrf.mxu1 }
  0xe3   : > { %v4256_v17 = vpop.f32.mrf.mxu0 }
  0xe7   : > { %v4259_v39 = vpop.f32.mrf.mxu2 }
  0xe8   : > { %4729 = vst [vmem:[#allocation23_spill] sm:$0xff] %v4259_v39  ;;  %v4261_v32 = vpop.f32.mrf.mxu3 }
  0xe9   : > { %4730 = vst [vmem:[#allocation24_spill] sm:$0xff] %v4261_v32  ;;  %v1189_v23 = vpop.f32.mrf.mxu1  ;;  %v889_v32 = vrot.slane %v773_v21, 1 }
  0xea   : > { %v1190_v63 = vadd.f32 %v1189_v23, %v4125_v43  ;;  %v3413_v23 = vld [vmem:[%s4674_s2 + $0x1d0] sm:$0xff]  ;;  %v777_v43 = vshrl.u32 %v3991_v55, 16 }
  0xeb   : > { %v1716_v4 = vpop.f32.mrf.mxu0  ;;  %2271 = vmatpush.bf16.msra.mxu3 %v3413_v23  ;;  %v890_v21 = vor.u32 %v889_v32, %v770_v11  ;;  %v891_v11 = vrot.slane %v780_v30, 1 }
  0xec   : > { %1228 = vmatmul.bf16.gmra.mxu1 %v4243_v34  ;;  %1382 = vmatmul.bf16.gmra.mxu2 %v4265_v38  ;;  %v779_v56 = vrot.slane %v777_v43, 7 }
  0xed   : > { %1568 = vmatmul.bf16.gmra.mxu3 %v4270_v48 }
  0xee   : > { %1755 = vmatmul.bf16.gmra.mxu0 %v3923_v45  ;;  %v782_v23 = vor.u32 %v780_v30, %v779_v56 }
  0xef   : > { %v1343_v15 = vpop.f32.mrf.mxu2 }
  0xf0   : > { %v1423_v49 = vadd.f32 %v1343_v15, %v1190_v63  ;;  %v1529_v1 = vpop.f32.mrf.mxu3  ;;  %v4300_v52 = vsel %vm4037_vm4, 0, %v782_v23 }
  0xf1   : > { %v1191_v19 = vpop.f32.mrf.mxu1 }
  0xf2   : > { %v1609_v38 = vadd.f32 %v1529_v1, %v1423_v49  ;;  %v1192_v45 = vadd.f32 %v1191_v19, %v4151_v60  ;;  %v4295_v19 = vsel %vm4041_vm5, %v890_v21, 0 }
  0xf3   : > { %v1718_v34 = vpop.f32.mrf.mxu0 }
  0xf4   : > { %v4291_v63 = vadd.f32 %v1716_v4, %v1609_v38 }
  0xf6   : > { %4732 = vst [vmem:[#allocation26_spill] sm:$0xff] %v4291_v63 }
  0xf7   : > { %v1345_v15 = vpop.f32.mrf.mxu2 }
  0xf8   : > { %v1424_v60 = vadd.f32 %v1345_v15, %v1192_v45  ;;  %v1531_v49 = vpop.f32.mrf.mxu3  ;;  %v784_v45 = vshrl.u32 %v4023_v35, 16 }
  0xf9   : > { %v1194_v1 = vpop.f32.mrf.mxu1 }
  0xfa   : > { %v1610_v9 = vadd.f32 %v1531_v49, %v1424_v60  ;;  %v1195_v39 = vadd.f32 %v1194_v1, %v4167_v10  ;;  %v786_v15 = vrot.slane %v784_v45, 7  ;;  %v787_v60 = vshll.u32 %v4023_v35, 16 }
  0xfb   : > { %v1721_v59 = vpop.f32.mrf.mxu0 }
  0xfc   : > { %1233 = vmatmul.bf16.gmra.mxu1 %v4270_v48  ;;  %1387 = vmatmul.bf16.gmra.mxu2 %v4295_v19  ;;  %v4304_v32 = vadd.f32 %v1718_v34, %v1610_v9  ;;  %v892_v34 = vor.u32 %v891_v11, %v777_v43  ;;  %v789_v49 = vor.u32 %v787_v60, %v786_v15  ;;  %v3404_v43 = vld [vmem:[%s4674_s2 + $0x188] sm:$0xff]  ;;  %v893_v11 = vrot.slane %v787_v60, 1 }
  0xfd   : > { %1573 = vmatmul.bf16.gmra.mxu3 %v4300_v52  ;;  %2085 = vmatpush.bf16.msra.mxu2 %v3404_v43 }
  0xfe   : > { %4733 = vst [vmem:[#allocation27_spill] sm:$0xff] %v4304_v32  ;;  %1760 = vmatmul.bf16.gmra.mxu0 %v3991_v55  ;;  %v894_v60 = vor.u32 %v893_v11, %v784_v45 }
  0xff   : > { %v1348_v56 = vpop.f32.mrf.mxu2 }
 0x100   : > { %v1425_v4 = vadd.f32 %v1348_v56, %v1195_v39  ;;  %v1534_v10 = vpop.f32.mrf.mxu3  ;;  %v4315_v39 = vsel %vm4041_vm5, %v892_v34, 0  ;;  %v794_v34 = vshll.u32 %v3842_v33, 16 }
 0x101   : > { %v1196_v38 = vpop.f32.mrf.mxu1 }
 0x102   : > { %v1611_v26 = vadd.f32 %v1534_v10, %v1425_v4  ;;  %v1197_v21 = vadd.f32 %v1196_v38, %v4184_v18  ;;  %v4320_v4 = vsel %vm4037_vm4, 0, %v789_v49  ;;  %v3396_v49 = vld [vmem:[%s4674_s2 + $0x148] sm:$0xff] }
 0x103   : > { %v1723_v23 = vpop.f32.mrf.mxu0  ;;  %1899 = vmatpush.bf16.msra.mxu1 %v3396_v49 }
 0x104   : > { %v4311_v9 = vadd.f32 %v1721_v59, %v1611_v26 }
 0x107   : > { %v1350_v1 = vpop.f32.mrf.mxu2 }
 0x108   : > { %v1426_v32 = vadd.f32 %v1350_v1, %v1197_v21  ;;  %v1536_v63 = vpop.f32.mrf.mxu3  ;;  %v3420_v1 = vld [vmem:[%s4674_s2 + $0x208] sm:$0xff] }
 0x109   : > { %v1199_v55 = vpop.f32.mrf.mxu1  ;;  %2458 = vmatpush.bf16.msra.mxu0 %v3420_v1 }
 0x10a   : > { %v1612_v30 = vadd.f32 %v1536_v63, %v1426_v32  ;;  %v1200_v56 = vadd.f32 %v1199_v55, %v4197_v31  ;;  %v3412_v55 = vld [vmem:[%s4674_s2 + $0x1c8] sm:$0xff]  ;;  %v791_v31 = vshrl.u32 %v3842_v33, 16 }
 0x10b   : > { %v1726_v18 = vpop.f32.mrf.mxu0  ;;  %2272 = vmatpush.bf16.msra.mxu3 %v3412_v55 }
 0x10c   : > { %1238 = vmatmul.bf16.gmra.mxu1 %v4300_v52  ;;  %1392 = vmatmul.bf16.gmra.mxu2 %v4315_v39  ;;  %v4324_v59 = vadd.f32 %v1723_v23, %v1612_v30  ;;  %v793_v15 = vrot.slane %v791_v31, 7 }
 0x10d   : > { %1578 = vmatmul.bf16.gmra.mxu3 %v4320_v4 }
 0x10e   : > { %4734 = vst [vmem:[#allocation28_spill] sm:$0xff] %v4324_v59  ;;  %1765 = vmatmul.bf16.gmra.mxu0 %v4023_v35 }
 0x10f   : > { %v1353_v63 = vpop.f32.mrf.mxu2 }
 0x110   : > { %v1427_v32 = vadd.f32 %v1353_v63, %v1200_v56  ;;  %v1539_v10 = vpop.f32.mrf.mxu3  ;;  %v796_v56 = vor.u32 %v794_v34, %v793_v15  ;;  %v895_v15 = vrot.slane %v794_v34, 1 }
 0x111   : > { %v1201_v38 = vpop.f32.mrf.mxu1 }
 0x112   : > { %v1613_v26 = vadd.f32 %v1539_v10, %v1427_v32  ;;  %v1202_v21 = vadd.f32 %v1201_v38, %v4220_v62  ;;  %v4347_v32 = vsel %vm4041_vm5, %v894_v60, 0  ;;  %v4352_v49 = vsel %vm4037_vm4, 0, %v796_v56 }
 0x113   : > { %v1728_v23 = vpop.f32.mrf.mxu0 }
 0x114   : > { %v4343_v30 = vadd.f32 %v1726_v18, %v1613_v26  ;;  %v798_v18 = vshrl.u32 %v3926_v47, 16 }
 0x116   : > { %4735 = vst [vmem:[#allocation29_spill] sm:$0xff] %v4343_v30 }
 0x117   : > { %v1355_v43 = vpop.f32.mrf.mxu2 }
 0x118   : > { %v1428_v62 = vadd.f32 %v1355_v43, %v1202_v21  ;;  %v1541_v55 = vpop.f32.mrf.mxu3  ;;  %v800_v43 = vrot.slane %v798_v18, 7 }
 0x119   : > { %v1204_v63 = vpop.f32.mrf.mxu1 }
 0x11a   : > { %v1614_v10 = vadd.f32 %v1541_v55, %v1428_v62  ;;  %v1205_v38 = vadd.f32 %v1204_v63, %v4239_v40  ;;  %v801_v62 = vshll.u32 %v3926_v47, 16  ;;  %v896_v55 = vor.u32 %v895_v15, %v791_v31 }
 0x11b   : > { %v1731_v59 = vpop.f32.mrf.mxu0  ;;  %v805_v31 = vshrl.u32 %v3995_v3, 16 }
 0x11c   : > { %1243 = vmatmul.bf16.gmra.mxu1 %v4320_v4  ;;  %1397 = vmatmul.bf16.gmra.mxu2 %v4347_v32  ;;  %v4356_v45 = vadd.f32 %v1728_v23, %v1614_v10  ;;  %v803_v63 = vor.u32 %v801_v62, %v800_v43 }
 0x11d   : > { %1583 = vmatmul.bf16.gmra.mxu3 %v4352_v49  ;;  %v807_v43 = vrot.slane %v805_v31, 7 }
 0x11e   : > { %4736 = vst [vmem:[#allocation30_spill] sm:$0xff] %v4356_v45  ;;  %1770 = vmatmul.bf16.gmra.mxu0 %v3842_v33 }
 0x11f   : > { %v1358_v11 = vpop.f32.mrf.mxu2 }
 0x120   : > { %v1429_v26 = vadd.f32 %v1358_v11, %v1205_v38  ;;  %v1544_v40 = vpop.f32.mrf.mxu3  ;;  %v4367_v38 = vsel %vm4041_vm5, %v896_v55, 0 }
 0x121   : > { %v1206_v21 = vpop.f32.mrf.mxu1 }
 0x122   : > { %v1615_v1 = vadd.f32 %v1544_v40, %v1429_v26  ;;  %v1207_v60 = vadd.f32 %v1206_v21, %v4256_v17  ;;  %v4371_v17 = vsel %vm4037_vm4, 0, %v803_v63  ;;  %v3593_v21 = vld [vmem:[%s3762_s15 + $0x78] sm:$0xff]  }
 0x123   : > { %v1733_v56 = vpop.f32.mrf.mxu0  ;;  %4738 = vst [vmem:[#allocation32_spill] sm:$0xff] %v4371_v17 }
 0x124   : > { %v4363_v23 = vadd.f32 %v1731_v59, %v1615_v1 }
 0x126   : > { %4737 = vst [vmem:[#allocation31_spill] sm:$0xff] %v4363_v23 }
 0x127   : > { %v1360_v10 = vpop.f32.mrf.mxu2 }
 0x128   : > { %v1430_v45 = vadd.f32 %v1360_v10, %v1207_v60  ;;  %v1546_v30 = vpop.f32.mrf.mxu3  ;;  %v808_v10 = vshll.u32 %v3995_v3, 16 }
 0x129   : > { %v1209_v33 = vpop.f32.mrf.mxu1 }
 0x12a   : > { %v1616_v34 = vadd.f32 %v1546_v30, %v1430_v45  ;;  %v3403_v30 = vld [vmem:[%s4674_s2 + $0x180] sm:$0xff]  ;;  %v1210_v26 = vadd.f32 %v1209_v33, %v4119_v41  ;;  %v3489_v41 = vunpack.c.l.bf16 %v3593_v21 }
 0x12b   : > { %v1736_v11 = vpop.f32.mrf.mxu0  ;;  %v3411_v45 = vld [vmem:[%s4674_s2 + $0x1c0] sm:$0xff]  ;;  %2086 = vmatpush.bf16.msra.mxu2 %v3403_v30  ;;  %v3490_v30 = vunpack.c.h.bf16 %v3593_v21 }
 0x12c   : > { %1248 = vmatmul.bf16.gmra.mxu1 %v4352_v49  ;;  %1402 = vmatmul.bf16.gmra.mxu2 %v4367_v38  ;;  %v4375_v59 = vadd.f32 %v1733_v56, %v1616_v34  ;;  %v897_v56 = vrot.slane %v801_v62, 1  ;;  %v3395_v34 = vld [vmem:[%s4674_s2 + $0x140] sm:$0xff] }
 0x12d   : > { %1588 = vmatmul.bf16.gmra.mxu3 %v4371_v17  ;;  %v3419_v33 = vld [vmem:[%s4674_s2 + $0x200] sm:$0xff]  ;;  %1900 = vmatpush.bf16.msra.mxu1 %v3395_v34 }
 0x12e   : > { %4739 = vst [vmem:[#allocation33_spill] sm:$0xff] %v4375_v59  ;;  %1775 = vmatmul.bf16.gmra.mxu0 %v3926_v47  ;;  %2273 = vmatpush.bf16.msra.mxu3 %v3411_v45  ;;  %v898_v62 = vor.u32 %v897_v56, %v798_v18  ;;  %v4416_v56 = vld [vmem:[%s4676_s4] ss:$0 sm:$0xff] }
 0x12f   : > { %v1363_v40 = vpop.f32.mrf.mxu2  ;;  %2459 = vmatpush.bf16.msra.mxu0 %v3419_v33  ;;  %4743 = vst [vmem:[#allocation37_spill] sm:$0xff] %v4416_v56 }
 0x130   : > { %v1431_v15 = vadd.f32 %v1363_v40, %v1210_v26  ;;  %v1549_v1 = vpop.f32.mrf.mxu3  ;;  %v810_v40 = vor.u32 %v808_v10, %v807_v43 }
 0x131   : > { %v1211_v60 = vpop.f32.mrf.mxu1 }
 0x132   : > { %v1617_v55 = vadd.f32 %v1549_v1, %v1431_v15  ;;  %v1212_v26 = vadd.f32 %v1211_v60, %v4149_v58  ;;  %v4401_v15 = vld [vmem:[%s4675_s3] ss:$0 sm:$0xff]  ;;  %v4411_v60 = vsel %vm4037_vm4, 0, %v810_v40 }
 0x133   : > { %v1738_v63 = vpop.f32.mrf.mxu0  ;;  %4741 = vst [vmem:[#allocation35_spill] sm:$0xff] %v4401_v15  ;;  %v490_v1 = vmul.f32 %v4401_v15, %v3489_v41  ;;  %v491_v59 = vmul.f32 %v4401_v15, %v3490_v30 }
 0x134   : > { %v4395_v45 = vadd.f32 %v1736_v11, %v1617_v55  ;;  %v4407_v11 = vsel %vm4041_vm5, %v898_v62, 0 }
 0x135   : > { %4742 = vst [vmem:[#allocation36_spill] sm:$0xff] %v4407_v11  ;;  %v525_v43 = vadd.f32 %v4416_v56, %v490_v1  ;;  %v899_v1 = vrot.slane %v808_v10, 1 }
 0x136   : > { %4740 = vst [vmem:[#allocation34_spill] sm:$0xff] %v4395_v45 }
 0x137   : > { %v1365_v23 = vpop.f32.mrf.mxu2  ;;  %v557_v41 = vmax.f32 %v525_v43, 0.0 }
 0x138   : > { %v1432_v47 = vadd.f32 %v1365_v23, %v1212_v26  ;;  %v1551_v21 = vpop.f32.mrf.mxu3  ;;  %v526_v23 = vadd.f32 %v4416_v56, %v491_v59 }
 0x139   : > { %v1214_v34 = vpop.f32.mrf.mxu1 }
 0x13a   : > { %v1618_v18 = vadd.f32 %v1551_v21, %v1432_v47  ;;  %v812_v47 = vshrl.u32 %v4025_v36, 16  ;;  %v1215_v33 = vadd.f32 %v1214_v34, %v4161_v7  ;;  %v558_v30 = vmax.f32 %v526_v23, 0.0 }
 0x13b   : > { %v1741_v58 = vpop.f32.mrf.mxu0 }
 0x13c   : > { %1253 = vmatmul.bf16.gmra.mxu1 %v4371_v17  ;;  %1407 = vmatmul.bf16.gmra.mxu2 %v4407_v11  ;;  %v4422_v55 = vadd.f32 %v1738_v63, %v1618_v18  ;;  %v814_v21 = vrot.slane %v812_v47, 7  ;;  %v815_v63 = vshll.u32 %v4025_v36, 16  ;;  %v589_v18 = vpack.c.bf16 %v557_v41, %v557_v41 }
 0x13d   : > { %1593 = vmatmul.bf16.gmra.mxu3 %v4411_v60 }
 0x13e   : > { %4744 = vst [vmem:[#allocation38_spill] sm:$0xff] %v4422_v55  ;;  %1780 = vmatmul.bf16.gmra.mxu0 %v3995_v3  ;;  %v590_v55 = vpack.c.bf16 %v558_v30, %v558_v30  ;;  %v900_v3 = vor.u32 %v899_v1, %v805_v31  ;;  %v817_v7 = vor.u32 %v815_v63, %v814_v21  ;;  %v684_v34 = vunpack.c.l.b16 %v589_v18 }
 0x13f   : > { %v1368_v62 = vpop.f32.mrf.mxu2 }
 0x140   : > { %v1433_v26 = vadd.f32 %v1368_v62, %v1215_v33  ;;  %v1554_v40 = vpop.f32.mrf.mxu3  ;;  %v685_v43 = vunpack.c.l.b16 %v590_v55  ;;  %v4434_v10 = vsel %vm4041_vm5, %v900_v3, 0 }
 0x141   : > { %v1216_v59 = vpop.f32.mrf.mxu1 }
 0x142   : > { %v1619_v56 = vadd.f32 %v1554_v40, %v1433_v26  ;;  %v1217_v11 = vadd.f32 %v1216_v59, %v4182_v16  ;;  %v4440_v31 = vpack.c.b16 %v685_v43, %v684_v34  ;;  %v901_v59 = vrot.slane %v815_v63, 1 }
 0x143   : > { %v1743_v15 = vpop.f32.mrf.mxu0 }
 0x144   : > { %v4429_v45 = vadd.f32 %v1741_v58, %v1619_v56  ;;  %v4438_v58 = vsel %vm4037_vm4, 0, %v817_v7  ;;  %v902_v34 = vor.u32 %v901_v59, %v812_v47 }
 0x146   : > { %v4460_v63 = vsel %vm4041_vm5, %v902_v34, 0 }
 0x147   : > { %v1370_v23 = vpop.f32.mrf.mxu2 }
 0x148   : > { %v1434_v33 = vadd.f32 %v1370_v23, %v1217_v11  ;;  %v1556_v62 = vpop.f32.mrf.mxu3  ;;  %v819_v11 = vshrl.u32 %v4440_v31, 16 }
 0x149   : > { %v1219_v17 = vpop.f32.mrf.mxu1 }
 0x14a   : > { %v1620_v26 = vadd.f32 %v1556_v62, %v1434_v33  ;;  %v1220_v3 = vadd.f32 %v1219_v17, %v4191_v29  ;;  %v821_v18 = vrot.slane %v819_v11, 7 }
 0x14b   : > { %v1746_v40 = vpop.f32.mrf.mxu0 }
 0x14c   : > { %1258 = vmatmul.bf16.gmra.mxu1 %v4411_v60  ;;  %1412 = vmatmul.bf16.gmra.mxu2 %v4434_v10  ;;  %v4444_v16 = vadd.f32 %v1743_v15, %v1620_v26  ;;  %v822_v15 = vshll.u32 %v4440_v31, 16 }
 0x14d   : > { %1598 = vmatmul.bf16.gmra.mxu3 %v4438_v58 }
 0x14e   : > { %1785 = vmatmul.bf16.gmra.mxu0 %v4025_v36  ;;  %v824_v29 = vor.u32 %v822_v15, %v821_v18 }
 0x14f   : > { %v1373_v56 = vpop.f32.mrf.mxu2 }
 0x150   : > { %v1435_v55 = vadd.f32 %v1373_v56, %v1220_v3  ;;  %v1559_v41 = vpop.f32.mrf.mxu3 }
 0x151   : > { %v1221_v30 = vpop.f32.mrf.mxu1 }
 0x152   : > { %v1621_v1 = vadd.f32 %v1559_v41, %v1435_v55  ;;  %v1222_v43 = vadd.f32 %v1221_v30, %v4218_v57 }
 0x153   : > { %v1748_v21 = vpop.f32.mrf.mxu0 }
 0x154   : > { %v4453_v7 = vadd.f32 %v1746_v40, %v1621_v1  ;;  %v4464_v40 = vsel %vm4037_vm4, 0, %v824_v29 }
 0x157   : > { %v1375_v17 = vpop.f32.mrf.mxu2 }
 0x158   : > { %v1436_v23 = vadd.f32 %v1375_v17, %v1222_v43  ;;  %v1561_v33 = vpop.f32.mrf.mxu3 }
 0x159   : > { %v1224_v62 = vpop.f32.mrf.mxu1 }
 0x15a   : > { %v1622_v26 = vadd.f32 %v1561_v33, %v1436_v23  ;;  %v1225_v47 = vadd.f32 %v1224_v62, %v4233_v24 }
 0x15b   : > { %v1751_v3 = vpop.f32.mrf.mxu0 }
 0x15c   : > { %1263 = vmatmul.bf16.gmra.mxu1 %v4438_v58  ;;  %1417 = vmatmul.bf16.gmra.mxu2 %v4460_v63  ;;  %v4468_v57 = vadd.f32 %v1748_v21, %v1622_v26 }
 0x15d   : > { %1603 = vmatmul.bf16.gmra.mxu3 %v4464_v40 }
 0x15e   : > { %1790 = vmatmul.bf16.gmra.mxu0 %v4440_v31 }
 0x15f   : > { %v1378_v56 = vpop.f32.mrf.mxu2 }
 0x160   : > { %v1437_v55 = vadd.f32 %v1378_v56, %v1225_v47  ;;  %v1564_v41 = vpop.f32.mrf.mxu3 }
 0x161   : > { %v1226_v30 = vpop.f32.mrf.mxu1 }
 0x162   : > { %v1623_v59 = vadd.f32 %v1564_v41, %v1437_v55  ;;  %v1227_v34 = vadd.f32 %v1226_v30, %v4254_v0 }
 0x163   : > { %v1753_v1 = vpop.f32.mrf.mxu0 }
 0x164   : > { %v4473_v18 = vadd.f32 %v1751_v3, %v1623_v59 }
 0x167   : > { %v1380_v43 = vpop.f32.mrf.mxu2 }
 0x168   : > { %v1438_v29 = vadd.f32 %v1380_v43, %v1227_v34  ;;  %v1566_v21 = vpop.f32.mrf.mxu3 }
 0x169   : > { %v1229_v17 = vpop.f32.mrf.mxu1 }
 0x16a   : > { %v1624_v23 = vadd.f32 %v1566_v21, %v1438_v29  ;;  %v1230_v62 = vadd.f32 %v1229_v17, %v4142_v54 }
 0x16b   : > { %v1756_v33 = vpop.f32.mrf.mxu0 }
 0x16c   : > { %1901 = vmatmul.bf16.vlgmr.msra.gmra.mxu1 %v4068_v5  ;;  %2087 = vmatmul.bf16.vlgmr.msra.gmra.mxu2 %v4072_v6  ;;  %v4478_v24 = vadd.f32 %v1753_v1, %v1624_v23 }
 0x16d   : > { %2274 = vmatmul.bf16.vlgmr.msra.gmra.mxu3 %v4000_v61 }
 0x16e   : > { %2460 = vmatmul.bf16.vlgmr.msra.gmra.mxu0 %v4081_v13 }
 0x16f   : > { %v1383_v26 = vpop.f32.mrf.mxu2 }
 0x170   : > { %v1439_v0 = vadd.f32 %v1383_v26, %v1230_v62  ;;  %v1569_v3 = vpop.f32.mrf.mxu3 }
 0x171   : > { %v1231_v47 = vpop.f32.mrf.mxu1 }
 0x172   : > { %v1625_v56 = vadd.f32 %v1569_v3, %v1439_v0  ;;  %v1232_v5 = vadd.f32 %v1231_v47, %v4157_v2 }
 0x173   : > { %v1758_v55 = vpop.f32.mrf.mxu0 }
 0x174   : > { %v4483_v41 = vadd.f32 %v1756_v33, %v1625_v56 }
 0x177   : > { %v1385_v30 = vpop.f32.mrf.mxu2 }
 0x178   : > { %v1440_v6 = vadd.f32 %v1385_v30, %v1232_v5  ;;  %v1571_v59 = vpop.f32.mrf.mxu3 }
 0x179   : > { %v1234_v1 = vpop.f32.mrf.mxu1 }
 0x17a   : > { %v1626_v34 = vadd.f32 %v1571_v59, %v1440_v6  ;;  %v1235_v43 = vadd.f32 %v1234_v1, %v4178_v12 }
 0x17b   : > { %v1761_v61 = vpop.f32.mrf.mxu0 }
 0x17c   : > { %1906 = vmatmul.bf16.gmra.mxu1 %v4081_v13  ;;  %2092 = vmatmul.bf16.gmra.mxu2 %v4085_v14  ;;  %v4488_v54 = vadd.f32 %v1758_v55, %v1626_v34 }
 0x17d   : > { %2279 = vmatmul.bf16.gmra.mxu3 %v4027_v37 }
 0x17e   : > { %2465 = vmatmul.bf16.gmra.mxu0 %v4107_v27 }
 0x17f   : > { %v1388_v29 = vpop.f32.mrf.mxu2 }
 0x180   : > { %v1441_v2 = vadd.f32 %v1388_v29, %v1235_v43  ;;  %v1574_v21 = vpop.f32.mrf.mxu3 }
 0x181   : > { %v1236_v17 = vpop.f32.mrf.mxu1 }
 0x182   : > { %v1627_v23 = vadd.f32 %v1574_v21, %v1441_v2  ;;  %v1237_v13 = vadd.f32 %v1236_v17, %v4187_v25  ;;  %v4745_v2 = vld [vmem:[#allocation21_spill] sm:$0xff] }
 0x183   : > { %v1763_v33 = vpop.f32.mrf.mxu0 }
 0x184   : > { %v4493_v62 = vadd.f32 %v1761_v61, %v1627_v23 }
 0x187   : > { %v1390_v26 = vpop.f32.mrf.mxu2 }
 0x188   : > { %v1442_v14 = vadd.f32 %v1390_v26, %v1237_v13  ;;  %v1576_v0 = vpop.f32.mrf.mxu3 }
 0x189   : > { %v1239_v3 = vpop.f32.mrf.mxu1 }
 0x18a   : > { %v1628_v47 = vadd.f32 %v1576_v0, %v1442_v14  ;;  %v1240_v56 = vadd.f32 %v1239_v3, %v4214_v51  ;;  %v4746_v0 = vld [vmem:[#allocation23_spill] sm:$0xff] }
 0x18b   : > { %v1766_v37 = vpop.f32.mrf.mxu0 }
 0x18c   : > { %1911 = vmatmul.bf16.gmra.mxu1 %v4107_v27  ;;  %2097 = vmatmul.bf16.gmra.mxu2 %v4111_v28  ;;  %v4498_v12 = vadd.f32 %v1763_v33, %v1628_v47 }
 0x18d   : > { %2284 = vmatmul.bf16.gmra.mxu3 %v3825_v20 }
 0x18e   : > { %2470 = vmatmul.bf16.gmra.mxu0 %v4123_v42 }
 0x18f   : > { %v1393_v55 = vpop.f32.mrf.mxu2 }
 0x190   : > { %v1443_v25 = vadd.f32 %v1393_v55, %v1240_v56  ;;  %v1579_v5 = vpop.f32.mrf.mxu3  ;;  %v4747_v55 = vld [vmem:[#allocation12_spill] sm:$0xff] }
 0x191   : > { %v1241_v30 = vpop.f32.mrf.mxu1 }
 0x192   : > { %v1629_v6 = vadd.f32 %v1579_v5, %v1443_v25  ;;  %v1242_v27 = vadd.f32 %v1241_v30, %v4229_v22  ;;  %v4748_v5 = vld [vmem:[#allocation6_spill] sm:$0xff]  ;;  %v4749_v30 = vld [vmem:[#allocation15_spill] sm:$0xff] }
 0x193   : > { %v1768_v59 = vpop.f32.mrf.mxu0 }
 0x194   : > { %v4503_v1 = vadd.f32 %v1766_v37, %v1629_v6  ;;  %v4750_v6 = vld [vmem:[#allocation10_spill] sm:$0xff] }
 0x197   : > { %v1395_v34 = vpop.f32.mrf.mxu2 }
 0x198   : > { %v1444_v28 = vadd.f32 %v1395_v34, %v1242_v27  ;;  %v1581_v61 = vpop.f32.mrf.mxu3 }
 0x199   : > { %v1244_v43 = vpop.f32.mrf.mxu1 }
 0x19a   : > { %v1630_v29 = vadd.f32 %v1581_v61, %v1444_v28  ;;  %v1245_v21 = vadd.f32 %v1244_v43, %v4745_v2  ;;  %v4751_v2 = vld [vmem:[#allocation11_spill] sm:$0xff] }
 0x19b   : > { %v1771_v20 = vpop.f32.mrf.mxu0 }
 0x19c   : > { %1916 = vmatmul.bf16.gmra.mxu1 %v4123_v42  ;;  %2102 = vmatmul.bf16.gmra.mxu2 %v4129_v46  ;;  %v4508_v51 = vadd.f32 %v1768_v59, %v1630_v29 }
 0x19d   : > { %2289 = vmatmul.bf16.gmra.mxu3 %v3921_v44 }
 0x19e   : > { %2475 = vmatmul.bf16.gmra.mxu0 %v4165_v8 }
 0x19f   : > { %v1398_v17 = vpop.f32.mrf.mxu2 }
 0x1a0   : > { %v1445_v22 = vadd.f32 %v1398_v17, %v1245_v21  ;;  %v1584_v23 = vpop.f32.mrf.mxu3 }
 0x1a1   : > { %v1246_v33 = vpop.f32.mrf.mxu1 }
 0x1a2   : > { %v1631_v13 = vadd.f32 %v1584_v23, %v1445_v22  ;;  %v1247_v42 = vadd.f32 %v1246_v33, %v4746_v0 }
 0x1a3   : > { %v1773_v26 = vpop.f32.mrf.mxu0 }
 0x1a4   : > { %v4513_v14 = vadd.f32 %v1771_v20, %v1631_v13 }
 0x1a7   : > { %v1400_v3 = vpop.f32.mrf.mxu2 }
 0x1a8   : > { %v1446_v46 = vadd.f32 %v1400_v3, %v1247_v42  ;;  %v1586_v47 = vpop.f32.mrf.mxu3  ;;  %v4753_v42 = vld [vmem:[#allocation9_spill] sm:$0xff]  ;;  %v4754_v3 = vld [vmem:[#allocation19_spill] sm:$0xff] }
 0x1a9   : > { %v1249_v37 = vpop.f32.mrf.mxu1 }
 0x1aa   : > { %v1632_v56 = vadd.f32 %v1586_v47, %v1446_v46  ;;  %v1250_v59 = vadd.f32 %v1249_v37, %v4750_v6  ;;  %v4755_v46 = vld [vmem:[#allocation13_spill] sm:$0xff] }
 0x1ab   : > { %v1776_v44 = vpop.f32.mrf.mxu0 }
 0x1ac   : > { %1921 = vmatmul.bf16.gmra.mxu1 %v4165_v8  ;;  %2107 = vmatmul.bf16.gmra.mxu2 %v4747_v55  ;;  %v4518_v25 = vadd.f32 %v1773_v26, %v1632_v56  ;;  %v4752_v26 = vld [vmem:[#allocation16_spill] sm:$0xff] }
 0x1ad   : > { %2294 = vmatmul.bf16.gmra.mxu3 %v4748_v5 }
 0x1ae   : > { %2480 = vmatmul.bf16.gmra.mxu0 %v4749_v30 }
 0x1af   : > { %v1403_v27 = vpop.f32.mrf.mxu2 }
 0x1b0   : > { %v1447_v34 = vadd.f32 %v1403_v27, %v1250_v59  ;;  %v1589_v28 = vpop.f32.mrf.mxu3  ;;  %v4756_v27 = vld [vmem:[#allocation14_spill] sm:$0xff] }
 0x1b1   : > { %v1251_v61 = vpop.f32.mrf.mxu1 }
 0x1b2   : > { %v1633_v43 = vadd.f32 %v1589_v28, %v1447_v34  ;;  %v1252_v8 = vadd.f32 %v1251_v61, %v4751_v2 }
 0x1b3   : > { %v1778_v29 = vpop.f32.mrf.mxu0 }
 0x1b4   : > { %v4523_v20 = vadd.f32 %v1776_v44, %v1633_v43 }
 0x1b7   : > { %v1405_v21 = vpop.f32.mrf.mxu2 }
 0x1b8   : > { %v1448_v17 = vadd.f32 %v1405_v21, %v1252_v8  ;;  %v1591_v22 = vpop.f32.mrf.mxu3  ;;  %v4757_v8 = vld [vmem:[#allocation20_spill] sm:$0xff] }
 0x1b9   : > { %v1254_v23 = vpop.f32.mrf.mxu1 }
 0x1ba   : > { %v1634_v33 = vadd.f32 %v1591_v22, %v1448_v17  ;;  %v1255_v47 = vadd.f32 %v1254_v23, %v4755_v46  ;;  %v4758_v17 = vld [vmem:[#allocation2_spill] sm:$0xff]  ;;  %v4759_v22 = vld [vmem:[#allocation25_spill] sm:$0xff] }
 0x1bb   : > { %v1781_v13 = vpop.f32.mrf.mxu0  ;;  %v4760_v23 = vld [vmem:[#allocation17_spill] sm:$0xff] }
 0x1bc   : > { %1926 = vmatmul.bf16.gmra.mxu1 %v4749_v30  ;;  %2112 = vmatmul.bf16.gmra.mxu2 %v4752_v26  ;;  %v4528_v0 = vadd.f32 %v1778_v29, %v1634_v33 }
 0x1bd   : > { %2299 = vmatmul.bf16.gmra.mxu3 %v4753_v42 }
 0x1be   : > { %2485 = vmatmul.bf16.gmra.mxu0 %v4754_v3 }
 0x1bf   : > { %v1408_v37 = vpop.f32.mrf.mxu2 }
 0x1c0   : > { %v1449_v56 = vadd.f32 %v1408_v37, %v1255_v47  ;;  %v1594_v44 = vpop.f32.mrf.mxu3 }
 0x1c1   : > { %v1256_v55 = vpop.f32.mrf.mxu1 }
 0x1c2   : > { %v1635_v5 = vadd.f32 %v1594_v44, %v1449_v56  ;;  %v1257_v30 = vadd.f32 %v1256_v55, %v4756_v27  ;;  %v4761_v44 = vld [vmem:[#allocation18_spill] sm:$0xff] }
 0x1c3   : > { %v1783_v6 = vpop.f32.mrf.mxu0 }
 0x1c4   : > { %v4533_v59 = vadd.f32 %v1781_v13, %v1635_v5 }
 0x1c7   : > { %v1410_v34 = vpop.f32.mrf.mxu2 }
 0x1c8   : > { %v1450_v28 = vadd.f32 %v1410_v34, %v1257_v30  ;;  %v1596_v61 = vpop.f32.mrf.mxu3 }
 0x1c9   : > { %v1259_v43 = vpop.f32.mrf.mxu1 }
 0x1ca   : > { %v1636_v29 = vadd.f32 %v1596_v61, %v1450_v28  ;;  %v1260_v33 = vadd.f32 %v1259_v43, %v4760_v23  ;;  %v4762_v61 = vld [vmem:[#allocation4_spill] sm:$0xff]  ;;  %v4763_v43 = vld [vmem:[#allocation22_spill] sm:$0xff] }
 0x1cb   : > { %v1786_v2 = vpop.f32.mrf.mxu0 }
 0x1cc   : > { %1931 = vmatmul.bf16.gmra.mxu1 %v4754_v3  ;;  %2117 = vmatmul.bf16.gmra.mxu2 %v4757_v8  ;;  %v4538_v21 = vadd.f32 %v1783_v6, %v1636_v29 }
 0x1cd   : > { %2304 = vmatmul.bf16.gmra.mxu3 %v4758_v17 }
 0x1ce   : > { %2490 = vmatmul.bf16.gmra.mxu0 %v4759_v22 }
 0x1cf   : > { %v1413_v13 = vpop.f32.mrf.mxu2 }
 0x1d0   : > { %v1451_v26 = vadd.f32 %v1413_v13, %v1260_v33  ;;  %v1599_v42 = vpop.f32.mrf.mxu3 }
 0x1d1   : > { %v1261_v46 = vpop.f32.mrf.mxu1 }
 0x1d2   : > { %v1637_v47 = vadd.f32 %v1599_v42, %v1451_v26  ;;  %v1262_v3 = vadd.f32 %v1261_v46, %v4761_v44  ;;  %v4764_v42 = vld [vmem:[#allocation24_spill] sm:$0xff] }
 0x1d3   : > { %v1788_v37 = vpop.f32.mrf.mxu0 }
 0x1d4   : > { %v4543_v56 = vadd.f32 %v1786_v2, %v1637_v47 }
 0x1d7   : > { %v1415_v55 = vpop.f32.mrf.mxu2 }
 0x1d8   : > { %v1452_v5 = vadd.f32 %v1415_v55, %v1262_v3  ;;  %v1601_v6 = vpop.f32.mrf.mxu3 }
 0x1d9   : > { %v1264_v27 = vpop.f32.mrf.mxu1 }
 0x1da   : > { %v1638_v30 = vadd.f32 %v1601_v6, %v1452_v5  ;;  %v1265_v29 = vadd.f32 %v1264_v27, %v4763_v43  ;;  %v4765_v5 = vld [vmem:[#allocation7_spill] sm:$0xff]  ;;  %v4766_v6 = vld [vmem:[#allocation26_spill] sm:$0xff] }
 0x1db   : > { %v1791_v34 = vpop.f32.mrf.mxu0 }
 0x1dc   : > { %1936 = vmatmul.bf16.gmra.mxu1 %v4759_v22  ;;  %2122 = vmatmul.bf16.gmra.mxu2 %v4270_v48  ;;  %v4548_v28 = vadd.f32 %v1788_v37, %v1638_v30 }
 0x1dd   : > { %2309 = vmatmul.bf16.gmra.mxu3 %v4762_v61 }
 0x1de   : > { %2495 = vmatmul.bf16.gmra.mxu0 %v4295_v19 }
 0x1df   : > { %v1418_v2 = vpop.f32.mrf.mxu2 }
 0x1e0   : > { %v1453_v8 = vadd.f32 %v1418_v2, %v1265_v29  ;;  %v1604_v17 = vpop.f32.mrf.mxu3 }
 0x1e1   : > { %v1266_v23 = vpop.f32.mrf.mxu1 }
 0x1e2   : > { %v1639_v33 = vadd.f32 %v1604_v17, %v1453_v8  ;;  %v1267_v22 = vadd.f32 %v1266_v23, %v4764_v42  ;;  %v4767_v8 = vld [vmem:[#allocation27_spill] sm:$0xff] }
 0x1e3   : > { %v1793_v13 = vpop.f32.mrf.mxu0 }
 0x1e4   : > { %v4553_v26 = vadd.f32 %v1791_v34, %v1639_v33 }
 0x1e7   : > { %v1420_v46 = vpop.f32.mrf.mxu2 }
 0x1e8   : > { %v1454_v48 = vadd.f32 %v1420_v46, %v1267_v22  ;;  %v1606_v47 = vpop.f32.mrf.mxu3 }
 0x1e9   : > { %v1902_v37 = vpop.f32.mrf.mxu1 }
 0x1ea   : > { %v1640_v44 = vadd.f32 %v1606_v47, %v1454_v48  ;;  %v1982_v27 = vadd.f32 %v1902_v37, %v4766_v6 }
 0x1eb   : > { %v2461_v3 = vpop.f32.mrf.mxu0 }
 0x1ec   : > { %1941 = vmatmul.bf16.gmra.mxu1 %v4295_v19  ;;  %2127 = vmatmul.bf16.gmra.mxu2 %v4300_v52  ;;  %v4558_v55 = vadd.f32 %v1793_v13, %v1640_v44 }
 0x1ed   : > { %2314 = vmatmul.bf16.gmra.mxu3 %v4765_v5 }
 0x1ee   : > { %2500 = vmatmul.bf16.gmra.mxu0 %v4315_v39 }
 0x1ef   : > { %v2088_v30 = vpop.f32.mrf.mxu2 }
 0x1f0   : > { %v2275_v34 = vpop.f32.mrf.mxu3  ;;  %v2168_v61 = vadd.f32 %v2088_v30, %v1982_v27 }
 0x1f1   : > { %v1904_v43 = vpop.f32.mrf.mxu1 }
 0x1f2   : > { %v2355_v2 = vadd.f32 %v2275_v34, %v2168_v61  ;;  %v1983_v17 = vadd.f32 %v1904_v43, %v4767_v8 }
 0x1f3   : > { %v2463_v29 = vpop.f32.mrf.mxu0 }
 0x1f4   : > { %v2541_v33 = vadd.f32 %v2461_v3, %v2355_v2  ;;  %v4768_v2 = vld [vmem:[#allocation28_spill] sm:$0xff] }
 0x1f6   : > { %v2675_v48 = vmul.f32 %v2541_v33, %v2541_v33 }
 0x1f7   : > { %v2090_v19 = vpop.f32.mrf.mxu2 }
 0x1f8   : > { %v2169_v23 = vadd.f32 %v2090_v19, %v1983_v17  ;;  %v2277_v52 = vpop.f32.mrf.mxu3 }
 0x1f9   : > { %v1907_v13 = vpop.f32.mrf.mxu1 }
 0x1fa   : > { %v2356_v42 = vadd.f32 %v2277_v52, %v2169_v23  ;;  %v1984_v3 = vadd.f32 %v1907_v13, %v4311_v9 }
 0x1fb   : > { %v2466_v22 = vpop.f32.mrf.mxu0 }
 0x1fc   : > { %v2542_v46 = vadd.f32 %v2463_v29, %v2356_v42  ;;  %1946 = vmatmul.bf16.gmra.mxu1 %v4315_v39  ;;  %2132 = vmatmul.bf16.gmra.mxu2 %v4320_v4  ;;  %v4769_v42 = vld [vmem:[#allocation3_spill] sm:$0xff] }
 0x1fd   : > { %2319 = vmatmul.bf16.gmra.mxu3 %v4023_v35 }
 0x1fe   : > { %2505 = vmatmul.bf16.gmra.mxu0 %v4347_v32  ;;  %v3502_v47 = vpack.c.bf16 %v2542_v46, %v2541_v33  ;;  %v2637_v37 = vadd.f32 %v2542_v46, %v2541_v33  ;;  %v2676_v44 = vmul.f32 %v2542_v46, %v2542_v46 }
 0x1ff   : > { %v2093_v39 = vpop.f32.mrf.mxu2 }
 0x200   : > { %3503 = vst [vmem:[%s4571_s22] sm:$0xff] %v3502_v47   ;;  %v2707_v4 = vadd.f32 %v2676_v44, %v2675_v48  ;;  %v2170_v5 = vadd.f32 %v2093_v39, %v1984_v3  ;;  %v2280_v6 = vpop.f32.mrf.mxu3  ;;  %v4770_v47 = vld [vmem:[#allocation29_spill] sm:$0xff] }
 0x201   : > { %v1909_v27 = vpop.f32.mrf.mxu1 }
 0x202   : > { %v2357_v30 = vadd.f32 %v2280_v6, %v2170_v5  ;;  %v1985_v35 = vadd.f32 %v1909_v27, %v4768_v2 }
 0x203   : > { %v2468_v34 = vpop.f32.mrf.mxu0 }
 0x204   : > { %v2543_v61 = vadd.f32 %v2466_v22, %v2357_v30 }
 0x206   : > { %v2638_v43 = vadd.f32 %v2637_v37, %v2543_v61  ;;  %v2677_v29 = vmul.f32 %v2543_v61, %v2543_v61 }
 0x207   : > { %v2095_v8 = vpop.f32.mrf.mxu2 }
 0x208   : > { %v2708_v17 = vadd.f32 %v2707_v4, %v2677_v29  ;;  %v2171_v19 = vadd.f32 %v2095_v8, %v1985_v35  ;;  %v2282_v23 = vpop.f32.mrf.mxu3 }
 0x209   : > { %v1912_v52 = vpop.f32.mrf.mxu1 }
 0x20a   : > { %v2358_v9 = vadd.f32 %v2282_v23, %v2171_v19  ;;  %v1986_v37 = vadd.f32 %v1912_v52, %v4770_v47 }
 0x20b   : > { %v2471_v33 = vpop.f32.mrf.mxu0 }
 0x20c   : > { %v2544_v13 = vadd.f32 %v2468_v34, %v2358_v9  ;;  %1951 = vmatmul.bf16.gmra.mxu1 %v4347_v32  ;;  %2137 = vmatmul.bf16.gmra.mxu2 %v4352_v49  ;;  %v4771_v34 = vld [vmem:[#allocation30_spill] sm:$0xff]  ;;  %v4773_v9 = vld [vmem:[#allocation5_spill] sm:$0xff] }
 0x20d   : > { %2324 = vmatmul.bf16.gmra.mxu3 %v4769_v42 }
 0x20e   : > { %2510 = vmatmul.bf16.gmra.mxu0 %v4367_v38  ;;  %v3507_v22 = vpack.c.bf16 %v2544_v13, %v2543_v61  ;;  %v2639_v46 = vadd.f32 %v2638_v43, %v2544_v13  ;;  %v2678_v48 = vmul.f32 %v2544_v13, %v2544_v13 }
 0x20f   : > { %v2098_v44 = vpop.f32.mrf.mxu2 }
 0x210   : > { %3595 = vst [vmem:[%s4571_s22 + $0x8] sm:$0xff] %v3507_v22   ;;  %v2709_v3 = vadd.f32 %v2708_v17, %v2678_v48  ;;  %v2172_v39 = vadd.f32 %v2098_v44, %v1986_v37  ;;  %v2285_v4 = vpop.f32.mrf.mxu3  ;;  %v4772_v17 = vld [vmem:[#allocation32_spill] sm:$0xff] }
 0x211   : > { %v1914_v5 = vpop.f32.mrf.mxu1 }
 0x212   : > { %v2359_v6 = vadd.f32 %v2285_v4, %v2172_v39  ;;  %v1987_v29 = vadd.f32 %v1914_v5, %v4771_v34 }
 0x213   : > { %v2473_v27 = vpop.f32.mrf.mxu0 }
 0x214   : > { %v2545_v32 = vadd.f32 %v2471_v33, %v2359_v6  ;;  %v4774_v33 = vld [vmem:[#allocation36_spill] sm:$0xff] }
 0x216   : > { %v2640_v30 = vadd.f32 %v2639_v46, %v2545_v32  ;;  %v2679_v49 = vmul.f32 %v2545_v32, %v2545_v32  ;;  %v4775_v46 = vld [vmem:[#allocation31_spill] sm:$0xff] }
 0x217   : > { %v2100_v2 = vpop.f32.mrf.mxu2 }
 0x218   : > { %v2710_v35 = vadd.f32 %v2709_v3, %v2679_v49  ;;  %v2173_v61 = vadd.f32 %v2100_v2, %v1987_v29  ;;  %v2287_v43 = vpop.f32.mrf.mxu3  ;;  %v4776_v49 = vld [vmem:[#allocation33_spill] sm:$0xff] }
 0x219   : > { %v1917_v8 = vpop.f32.mrf.mxu1 }
 0x21a   : > { %v2360_v19 = vadd.f32 %v2287_v43, %v2173_v61  ;;  %v1988_v48 = vadd.f32 %v1917_v8, %v4775_v46  ;;  %v3594_v43 = vld [vmem:[%s3772_s20 + $0x8] sm:$0xff]  }
 0x21b   : > { %v2476_v23 = vpop.f32.mrf.mxu0 }
 0x21c   : > { %v2546_v52 = vadd.f32 %v2473_v27, %v2360_v19  ;;  %1956 = vmatmul.bf16.gmra.mxu1 %v4367_v38  ;;  %2142 = vmatmul.bf16.gmra.mxu2 %v4772_v17  ;;  %v4777_v17 = vld [vmem:[#allocation8_spill] sm:$0xff] }
 0x21d   : > { %2329 = vmatmul.bf16.gmra.mxu3 %v4773_v9 }
 0x21e   : > { %2515 = vmatmul.bf16.gmra.mxu0 %v4774_v33  ;;  %v3512_v13 = vpack.c.bf16 %v2546_v52, %v2545_v32  ;;  %v2641_v42 = vadd.f32 %v2640_v30, %v2546_v52  ;;  %v2680_v22 = vmul.f32 %v2546_v52, %v2546_v52  ;;  %v3497_v52 = vunpack.c.l.bf16 %v3594_v43 }
 0x21f   : > { %v2103_v47 = vpop.f32.mrf.mxu2 }
 0x220   : > { %3596 = vst [vmem:[%s4571_s22 + $0x10] sm:$0xff] %v3512_v13   ;;  %v2711_v37 = vadd.f32 %v2710_v35, %v2680_v22  ;;  %v2174_v44 = vadd.f32 %v2103_v47, %v1988_v48  ;;  %v2290_v3 = vpop.f32.mrf.mxu3  ;;  %v4778_v22 = vld [vmem:[#allocation34_spill] sm:$0xff] }
 0x221   : > { %v1919_v39 = vpop.f32.mrf.mxu1 }
 0x222   : > { %v2361_v4 = vadd.f32 %v2290_v3, %v2174_v44  ;;  %v1989_v34 = vadd.f32 %v1919_v39, %v4776_v49  ;;  %v4780_v49 = vld [vmem:[#allocation37_spill] sm:$0xff] }
 0x223   : > { %v2478_v38 = vpop.f32.mrf.mxu0 }
 0x224   : > { %v2547_v5 = vadd.f32 %v2476_v23, %v2361_v4  ;;  %v3498_v23 = vunpack.c.h.bf16 %v3594_v43 }
 0x226   : > { %v2642_v6 = vadd.f32 %v2641_v42, %v2547_v5  ;;  %v2681_v27 = vmul.f32 %v2547_v5, %v2547_v5 }
 0x227   : > { %v2105_v29 = vpop.f32.mrf.mxu2 }
 0x228   : > { %v2712_v32 = vadd.f32 %v2711_v37, %v2681_v27  ;;  %v2175_v30 = vadd.f32 %v2105_v29, %v1989_v34  ;;  %v2292_v2 = vpop.f32.mrf.mxu3 }
 0x229   : > { %v1922_v61 = vpop.f32.mrf.mxu1 }
 0x22a   : > { %v2362_v8 = vadd.f32 %v2292_v2, %v2175_v30  ;;  %v1990_v46 = vadd.f32 %v1922_v61, %v4778_v22  ;;  %v4781_v30 = vld [vmem:[#allocation38_spill] sm:$0xff] }
 0x22b   : > { %v2481_v19 = vpop.f32.mrf.mxu0 }
 0x22c   : > { %v2548_v35 = vadd.f32 %v2478_v38, %v2362_v8  ;;  %1961 = vmatmul.bf16.gmra.mxu1 %v4774_v33  ;;  %2147 = vmatmul.bf16.gmra.mxu2 %v4411_v60  ;;  %v4779_v33 = vld [vmem:[#allocation35_spill] sm:$0xff] }
 0x22d   : > { %2334 = vmatmul.bf16.gmra.mxu3 %v4777_v17  ;;  %v606_v39 = vmul.f32 %v4779_v33, %v3497_v52  ;;  %v607_v60 = vmul.f32 %v4779_v33, %v3498_v23 }
 0x22e   : > { %2520 = vmatmul.bf16.gmra.mxu0 %v4434_v10  ;;  %v3517_v9 = vpack.c.bf16 %v2548_v35, %v2547_v5  ;;  %v2643_v13 = vadd.f32 %v2642_v6, %v2548_v35  ;;  %v2682_v42 = vmul.f32 %v2548_v35, %v2548_v35 }
 0x22f   : > { %v2108_v48 = vpop.f32.mrf.mxu2  ;;  %v608_v34 = vadd.f32 %v4780_v49, %v606_v39  ;;  %v609_v5 = vadd.f32 %v4780_v49, %v607_v60 }
 0x230   : > { %3597 = vst [vmem:[%s4571_s22 + $0x18] sm:$0xff] %v3517_v9   ;;  %v2713_v47 = vadd.f32 %v2712_v32, %v2682_v42  ;;  %v2176_v37 = vadd.f32 %v2108_v48, %v1990_v46  ;;  %v2295_v44 = vpop.f32.mrf.mxu3 }
 0x231   : > { %v1924_v3 = vpop.f32.mrf.mxu1  ;;  %v610_v17 = vmax.f32 %v608_v34, 0.0  ;;  %v611_v52 = vmax.f32 %v609_v5, 0.0 }
 0x232   : > { %v2363_v4 = vadd.f32 %v2295_v44, %v2176_v37  ;;  %v1991_v2 = vadd.f32 %v1924_v3, %v4781_v30 }
 0x233   : > { %v2483_v38 = vpop.f32.mrf.mxu0 }
 0x234   : > { %v2549_v27 = vadd.f32 %v2481_v19, %v2363_v4  ;;  %v612_v19 = vmul.f32 0.0, %v610_v17 }
 0x236   : > { %v2644_v6 = vadd.f32 %v2643_v13, %v2549_v27  ;;  %v2683_v29 = vmul.f32 %v2549_v27, %v2549_v27  ;;  %v613_v13 = vmul.f32 0.0, %v611_v52 }
 0x237   : > { %v2110_v61 = vpop.f32.mrf.mxu2 }
 0x238   : > { %v2714_v32 = vadd.f32 %v2713_v47, %v2683_v29  ;;  %v2177_v43 = vadd.f32 %v2110_v61, %v1991_v2  ;;  %v2297_v8 = vpop.f32.mrf.mxu3  ;;  %v615_v60 = vpack.c.bf16 %v613_v13, %v613_v13 }
 0x239   : > { %v1927_v35 = vpop.f32.mrf.mxu1 }
 0x23a   : > { %v2364_v23 = vadd.f32 %v2297_v8, %v2177_v43  ;;  %v1992_v47 = vadd.f32 %v1927_v35, %v4429_v45 }
 0x23b   : > { %v2486_v9 = vpop.f32.mrf.mxu0 }
 0x23c   : > { %v2550_v42 = vadd.f32 %v2483_v38, %v2364_v23  ;;  %1966 = vmatmul.bf16.gmra.mxu1 %v4434_v10  ;;  %2152 = vmatmul.bf16.gmra.mxu2 %v4438_v58  ;;  %v614_v10 = vpack.c.bf16 %v612_v19, %v612_v19 }
 0x23d   : > { %2339 = vmatmul.bf16.gmra.mxu3 %v4025_v36  ;;  %v903_v36 = vrot.slane %v822_v15, 1 }
 0x23e   : > { %2525 = vmatmul.bf16.gmra.mxu0 %v4460_v63  ;;  %v3522_v22 = vpack.c.bf16 %v2550_v42, %v2549_v27  ;;  %v2645_v46 = vadd.f32 %v2644_v6, %v2550_v42  ;;  %v2684_v48 = vmul.f32 %v2550_v42, %v2550_v42  ;;  %v686_v49 = vunpack.c.l.b16 %v614_v10 }
 0x23f   : > { %v2113_v37 = vpop.f32.mrf.mxu2  ;;  %v687_v27 = vunpack.c.l.b16 %v615_v60  ;;  %v904_v6 = vor.u32 %v903_v36, %v819_v11 }
 0x240   : > { %3598 = vst [vmem:[%s4571_s22 + $0x20] sm:$0xff] %v3522_v22   ;;  %v2715_v44 = vadd.f32 %v2714_v32, %v2684_v48  ;;  %v2178_v3 = vadd.f32 %v2113_v37, %v1992_v47  ;;  %v2300_v33 = vpop.f32.mrf.mxu3 }
 0x241   : > { %v1929_v39 = vpop.f32.mrf.mxu1  ;;  %v705_v43 = vpack.c.b16 %v687_v27, %v686_v49  ;;  %v944_v15 = vsel %vm4041_vm5, %v904_v6, 0 }
 0x242   : > { %v2365_v58 = vadd.f32 %v2300_v33, %v2178_v3  ;;  %v1993_v45 = vadd.f32 %v1929_v39, %v4444_v16 }
 0x243   : > { %v2488_v4 = vpop.f32.mrf.mxu0  ;;  %v826_v16 = vshrl.u32 %v705_v43, 16  ;;  %v829_v11 = vshll.u32 %v705_v43, 16 }
 0x244   : > { %v2551_v38 = vadd.f32 %v2486_v9, %v2365_v58 }
 0x245   : > { %v828_v47 = vrot.slane %v826_v16, 7 }
 0x246   : > { %v2646_v34 = vadd.f32 %v2645_v46, %v2551_v38  ;;  %v2685_v5 = vmul.f32 %v2551_v38, %v2551_v38 }
 0x247   : > { %v2115_v29 = vpop.f32.mrf.mxu2 }
 0x248   : > { %v2716_v30 = vadd.f32 %v2715_v44, %v2685_v5  ;;  %v2179_v2 = vadd.f32 %v2115_v29, %v1993_v45  ;;  %v2302_v61 = vpop.f32.mrf.mxu3 }
 0x249   : > { %v1932_v32 = vpop.f32.mrf.mxu1 }
 0x24a   : > { %v2366_v8 = vadd.f32 %v2302_v61, %v2179_v2  ;;  %v1994_v42 = vadd.f32 %v1932_v32, %v4453_v7 }
 0x24b   : > { %v2491_v35 = vpop.f32.mrf.mxu0 }
 0x24c   : > { %v2552_v17 = vadd.f32 %v2488_v4, %v2366_v8  ;;  %1971 = vmatmul.bf16.gmra.mxu1 %v4460_v63  ;;  %2157 = vmatmul.bf16.gmra.mxu2 %v4464_v40  ;;  %v905_v40 = vrot.slane %v829_v11, 1 }
 0x24d   : > { %2344 = vmatmul.bf16.gmra.mxu3 %v4440_v31  ;;  %v831_v31 = vor.u32 %v829_v11, %v828_v47 }
 0x24e   : > { %2530 = vmatmul.bf16.gmra.mxu0 %v944_v15  ;;  %v3527_v52 = vpack.c.bf16 %v2552_v17, %v2551_v38  ;;  %v2647_v23 = vadd.f32 %v2646_v34, %v2552_v17  ;;  %v2686_v9 = vmul.f32 %v2552_v17, %v2552_v17  ;;  %v906_v10 = vor.u32 %v905_v40, %v826_v16 }
 0x24f   : > { %v2118_v19 = vpop.f32.mrf.mxu2  ;;  %v870_v38 = vsel %vm4037_vm4, 0, %v831_v31 }
 0x250   : > { %3599 = vst [vmem:[%s4571_s22 + $0x28] sm:$0xff] %v3527_v52   ;;  %v2717_v13 = vadd.f32 %v2716_v30, %v2686_v9  ;;  %v2180_v22 = vadd.f32 %v2118_v19, %v1994_v42  ;;  %v2305_v46 = vpop.f32.mrf.mxu3  ;;  %v945_v34 = vsel %vm4041_vm5, %v906_v10, 0 }
 0x251   : > { %v1934_v48 = vpop.f32.mrf.mxu1 }
 0x252   : > { %v2367_v63 = vadd.f32 %v2305_v46, %v2180_v22  ;;  %v1995_v39 = vadd.f32 %v1934_v48, %v4468_v57 }
 0x253   : > { %v2493_v37 = vpop.f32.mrf.mxu0 }
 0x254   : > { %v2553_v44 = vadd.f32 %v2491_v35, %v2367_v63 }
 0x256   : > { %v2648_v3 = vadd.f32 %v2647_v23, %v2553_v44  ;;  %v2687_v33 = vmul.f32 %v2553_v44, %v2553_v44 }
 0x257   : > { %v2120_v60 = vpop.f32.mrf.mxu2 }
 0x258   : > { %v2718_v58 = vadd.f32 %v2717_v13, %v2687_v33  ;;  %v2181_v7 = vadd.f32 %v2120_v60, %v1995_v39  ;;  %v2307_v4 = vpop.f32.mrf.mxu3 }
 0x259   : > { %v1937_v36 = vpop.f32.mrf.mxu1 }
 0x25a   : > { %v2368_v49 = vadd.f32 %v2307_v4, %v2181_v7  ;;  %v1996_v29 = vadd.f32 %v1937_v36, %v4473_v18 }
 0x25b   : > { %v2496_v27 = vpop.f32.mrf.mxu0 }
 0x25c   : > { %v2554_v5 = vadd.f32 %v2493_v37, %v2368_v49  ;;  %1976 = vmatmul.bf16.gmra.mxu1 %v944_v15  ;;  %2162 = vmatmul.bf16.gmra.mxu2 %v870_v38 }
 0x25d   : > { %2349 = vmatmul.bf16.gmra.mxu3 %v705_v43 }
 0x25e   : > { %2535 = vmatmul.bf16.gmra.mxu0 %v945_v34  ;;  %v3532_v57 = vpack.c.bf16 %v2554_v5, %v2553_v44  ;;  %v2649_v45 = vadd.f32 %v2648_v3, %v2554_v5  ;;  %v2688_v6 = vmul.f32 %v2554_v5, %v2554_v5 }
 0x25f   : > { %v2123_v30 = vpop.f32.mrf.mxu2 }
 0x260   : > { %3600 = vst [vmem:[%s4571_s22 + $0x30] sm:$0xff] %v3532_v57   ;;  %v2719_v2 = vadd.f32 %v2718_v58, %v2688_v6  ;;  %v2182_v50 = vadd.f32 %v2123_v30, %v1996_v29  ;;  %v2310_v61 = vpop.f32.mrf.mxu3 }
 0x261   : > { %v1939_v32 = vpop.f32.mrf.mxu1 }
 0x262   : > { %v2369_v8 = vadd.f32 %v2310_v61, %v2182_v50  ;;  %v1997_v43 = vadd.f32 %v1939_v32, %v4478_v24 }
 0x263   : > { %v2498_v35 = vpop.f32.mrf.mxu0 }
 0x264   : > { %v2555_v53 = vadd.f32 %v2496_v27, %v2369_v8 }
 0x266   : > { %v2650_v17 = vadd.f32 %v2649_v45, %v2555_v53  ;;  %v2689_v15 = vmul.f32 %v2555_v53, %v2555_v53 }
 0x267   : > { %v2125_v16 = vpop.f32.mrf.mxu2 }
 0x268   : > { %v2720_v11 = vadd.f32 %v2719_v2, %v2689_v15  ;;  %v2183_v52 = vadd.f32 %v2125_v16, %v1997_v43  ;;  %v2312_v23 = vpop.f32.mrf.mxu3 }
 0x269   : > { %v1942_v9 = vpop.f32.mrf.mxu1 }
 0x26a   : > { %v2370_v18 = vadd.f32 %v2312_v23, %v2183_v52  ;;  %v1998_v48 = vadd.f32 %v1942_v9, %v4483_v41 }
 0x26b   : > { %v2501_v42 = vpop.f32.mrf.mxu0 }
 0x26c   : > { %v2556_v19 = vadd.f32 %v2498_v35, %v2370_v18 }
 0x26e   : > { %v3537_v13 = vpack.c.bf16 %v2556_v19, %v2555_v53  ;;  %v2651_v22 = vadd.f32 %v2650_v17, %v2556_v19  ;;  %v2690_v46 = vmul.f32 %v2556_v19, %v2556_v19 }
 0x26f   : > { %v2128_v47 = vpop.f32.mrf.mxu2 }
 0x270   : > { %3601 = vst [vmem:[%s4571_s22 + $0x38] sm:$0xff] %v3537_v13   ;;  %v2721_v63 = vadd.f32 %v2720_v11, %v2690_v46  ;;  %v2184_v37 = vadd.f32 %v2128_v47, %v1998_v48  ;;  %v2315_v40 = vpop.f32.mrf.mxu3 }
 0x271   : > { %v1944_v44 = vpop.f32.mrf.mxu1 }
 0x272   : > { %v2371_v24 = vadd.f32 %v2315_v40, %v2184_v37  ;;  %v1999_v10 = vadd.f32 %v1944_v44, %v4488_v54 }
 0x273   : > { %v2503_v31 = vpop.f32.mrf.mxu0 }
 0x274   : > { %v2557_v3 = vadd.f32 %v2501_v42, %v2371_v24 }
 0x276   : > { %v2652_v33 = vadd.f32 %v2651_v22, %v2557_v3  ;;  %v2691_v39 = vmul.f32 %v2557_v3, %v2557_v3 }
 0x277   : > { %v2130_v60 = vpop.f32.mrf.mxu2 }
 0x278   : > { %v2722_v58 = vadd.f32 %v2721_v63, %v2691_v39  ;;  %v2185_v7 = vadd.f32 %v2130_v60, %v1999_v10  ;;  %v2317_v4 = vpop.f32.mrf.mxu3 }
 0x279   : > { %v1947_v36 = vpop.f32.mrf.mxu1 }
 0x27a   : > { %v2372_v41 = vadd.f32 %v2317_v4, %v2185_v7  ;;  %v2000_v57 = vadd.f32 %v1947_v36, %v4493_v62 }
 0x27b   : > { %v2506_v38 = vpop.f32.mrf.mxu0 }
 0x27c   : > { %v2558_v49 = vadd.f32 %v2503_v31, %v2372_v41 }
 0x27e   : > { %v3542_v27 = vpack.c.bf16 %v2558_v49, %v2557_v3  ;;  %v2653_v34 = vadd.f32 %v2652_v33, %v2558_v49  ;;  %v2692_v5 = vmul.f32 %v2558_v49, %v2558_v49 }
 0x27f   : > { %v2133_v45 = vpop.f32.mrf.mxu2 }
 0x280   : > { %3602 = vst [vmem:[%s4571_s22 + $0x40] sm:$0xff] %v3542_v27   ;;  %v2723_v6 = vadd.f32 %v2722_v58, %v2692_v5  ;;  %v2186_v29 = vadd.f32 %v2133_v45, %v2000_v57  ;;  %v2320_v30 = vpop.f32.mrf.mxu3 }
 0x281   : > { %v1949_v2 = vpop.f32.mrf.mxu1 }
 0x282   : > { %v2373_v54 = vadd.f32 %v2320_v30, %v2186_v29  ;;  %v2001_v35 = vadd.f32 %v1949_v2, %v4498_v12 }
 0x283   : > { %v2508_v50 = vpop.f32.mrf.mxu0 }
 0x284   : > { %v2559_v61 = vadd.f32 %v2506_v38, %v2373_v54 }
 0x286   : > { %v2654_v32 = vadd.f32 %v2653_v34, %v2559_v61  ;;  %v2693_v8 = vmul.f32 %v2559_v61, %v2559_v61 }
 0x287   : > { %v2135_v53 = vpop.f32.mrf.mxu2 }
 0x288   : > { %v2724_v17 = vadd.f32 %v2723_v6, %v2693_v8  ;;  %v2187_v15 = vadd.f32 %v2135_v53, %v2001_v35  ;;  %v2322_v43 = vpop.f32.mrf.mxu3 }
 0x289   : > { %v1952_v16 = vpop.f32.mrf.mxu1 }
 0x28a   : > { %v2374_v62 = vadd.f32 %v2322_v43, %v2187_v15  ;;  %v2002_v42 = vadd.f32 %v1952_v16, %v4503_v1 }
 0x28b   : > { %v2511_v11 = vpop.f32.mrf.mxu0 }
 0x28c   : > { %v2560_v52 = vadd.f32 %v2508_v50, %v2374_v62 }
 0x28e   : > { %v3547_v23 = vpack.c.bf16 %v2560_v52, %v2559_v61  ;;  %v2655_v9 = vadd.f32 %v2654_v32, %v2560_v52  ;;  %v2694_v18 = vmul.f32 %v2560_v52, %v2560_v52 }
 0x28f   : > { %v2138_v19 = vpop.f32.mrf.mxu2 }
 0x290   : > { %3603 = vst [vmem:[%s4571_s22 + $0x48] sm:$0xff] %v3547_v23   ;;  %v2725_v13 = vadd.f32 %v2724_v17, %v2694_v18  ;;  %v2188_v22 = vadd.f32 %v2138_v19, %v2002_v42  ;;  %v2325_v46 = vpop.f32.mrf.mxu3 }
 0x291   : > { %v1954_v48 = vpop.f32.mrf.mxu1 }
 0x292   : > { %v2375_v12 = vadd.f32 %v2325_v46, %v2188_v22  ;;  %v2003_v44 = vadd.f32 %v1954_v48, %v4508_v51 }
 0x293   : > { %v2513_v47 = vpop.f32.mrf.mxu0 }
 0x294   : > { %v2561_v63 = vadd.f32 %v2511_v11, %v2375_v12 }
 0x296   : > { %v2656_v37 = vadd.f32 %v2655_v9, %v2561_v63  ;;  %v2695_v40 = vmul.f32 %v2561_v63, %v2561_v63 }
 0x297   : > { %v2140_v24 = vpop.f32.mrf.mxu2 }
 0x298   : > { %v2726_v31 = vadd.f32 %v2725_v13, %v2695_v40  ;;  %v2189_v3 = vadd.f32 %v2140_v24, %v2003_v44  ;;  %v2327_v33 = vpop.f32.mrf.mxu3 }
 0x299   : > { %v1957_v39 = vpop.f32.mrf.mxu1 }
 0x29a   : > { %v2376_v1 = vadd.f32 %v2327_v33, %v2189_v3  ;;  %v2004_v36 = vadd.f32 %v1957_v39, %v4513_v14 }
 0x29b   : > { %v2516_v10 = vpop.f32.mrf.mxu0 }
 0x29c   : > { %v2562_v60 = vadd.f32 %v2513_v47, %v2376_v1 }
 0x29e   : > { %v3552_v58 = vpack.c.bf16 %v2562_v60, %v2561_v63  ;;  %v2657_v7 = vadd.f32 %v2656_v37, %v2562_v60  ;;  %v2696_v4 = vmul.f32 %v2562_v60, %v2562_v60 }
 0x29f   : > { %v2143_v41 = vpop.f32.mrf.mxu2 }
 0x2a0   : > { %3604 = vst [vmem:[%s4571_s22 + $0x50] sm:$0xff] %v3552_v58   ;;  %v2727_v38 = vadd.f32 %v2726_v31, %v2696_v4  ;;  %v2190_v49 = vadd.f32 %v2143_v41, %v2004_v36  ;;  %v2330_v27 = vpop.f32.mrf.mxu3 }
 0x2a1   : > { %v1959_v34 = vpop.f32.mrf.mxu1 }
 0x2a2   : > { %v2377_v51 = vadd.f32 %v2330_v27, %v2190_v49  ;;  %v2005_v29 = vadd.f32 %v1959_v34, %v4518_v25 }
 0x2a3   : > { %v2518_v5 = vpop.f32.mrf.mxu0 }
 0x2a4   : > { %v2563_v57 = vadd.f32 %v2516_v10, %v2377_v51 }
 0x2a6   : > { %v2658_v45 = vadd.f32 %v2657_v7, %v2563_v57  ;;  %v2697_v6 = vmul.f32 %v2563_v57, %v2563_v57 }
 0x2a7   : > { %v2145_v30 = vpop.f32.mrf.mxu2 }
 0x2a8   : > { %v2728_v2 = vadd.f32 %v2727_v38, %v2697_v6  ;;  %v2191_v54 = vadd.f32 %v2145_v30, %v2005_v29  ;;  %v2332_v50 = vpop.f32.mrf.mxu3 }
 0x2a9   : > { %v1962_v61 = vpop.f32.mrf.mxu1 }
 0x2aa   : > { %v2378_v14 = vadd.f32 %v2332_v50, %v2191_v54  ;;  %v2006_v15 = vadd.f32 %v1962_v61, %v4523_v20 }
 0x2ab   : > { %v2521_v32 = vpop.f32.mrf.mxu0 }
 0x2ac   : > { %v2564_v8 = vadd.f32 %v2518_v5, %v2378_v14 }
 0x2ae   : > { %v3557_v35 = vpack.c.bf16 %v2564_v8, %v2563_v57  ;;  %v2659_v53 = vadd.f32 %v2658_v45, %v2564_v8  ;;  %v2698_v17 = vmul.f32 %v2564_v8, %v2564_v8 }
 0x2af   : > { %v2148_v43 = vpop.f32.mrf.mxu2 }
 0x2b0   : > { %3605 = vst [vmem:[%s4571_s22 + $0x58] sm:$0xff] %v3557_v35   ;;  %v2729_v16 = vadd.f32 %v2728_v2, %v2698_v17  ;;  %v2192_v62 = vadd.f32 %v2148_v43, %v2006_v15  ;;  %v2335_v11 = vpop.f32.mrf.mxu3 }
 0x2b1   : > { %v1964_v52 = vpop.f32.mrf.mxu1 }
 0x2b2   : > { %v2379_v25 = vadd.f32 %v2335_v11, %v2192_v62  ;;  %v2007_v19 = vadd.f32 %v1964_v52, %v4528_v0 }
 0x2b3   : > { %v2523_v23 = vpop.f32.mrf.mxu0 }
 0x2b4   : > { %v2565_v9 = vadd.f32 %v2521_v32, %v2379_v25 }
 0x2b6   : > { %v2660_v18 = vadd.f32 %v2659_v53, %v2565_v9  ;;  %v2699_v42 = vmul.f32 %v2565_v9, %v2565_v9 }
 0x2b7   : > { %v2150_v13 = vpop.f32.mrf.mxu2 }
 0x2b8   : > { %v2730_v22 = vadd.f32 %v2729_v16, %v2699_v42  ;;  %v2193_v46 = vadd.f32 %v2150_v13, %v2007_v19  ;;  %v2337_v48 = vpop.f32.mrf.mxu3 }
 0x2b9   : > { %v1967_v12 = vpop.f32.mrf.mxu1 }
 0x2ba   : > { %v2380_v20 = vadd.f32 %v2337_v48, %v2193_v46  ;;  %v2008_v24 = vadd.f32 %v1967_v12, %v4533_v59 }
 0x2bb   : > { %v2526_v47 = vpop.f32.mrf.mxu0 }
 0x2bc   : > { %v2566_v63 = vadd.f32 %v2523_v23, %v2380_v20 }
 0x2be   : > { %v3562_v37 = vpack.c.bf16 %v2566_v63, %v2565_v9  ;;  %v2661_v40 = vadd.f32 %v2660_v18, %v2566_v63  ;;  %v2700_v44 = vmul.f32 %v2566_v63, %v2566_v63 }
 0x2bf   : > { %v2153_v31 = vpop.f32.mrf.mxu2 }
 0x2c0   : > { %3606 = vst [vmem:[%s4571_s22 + $0x60] sm:$0xff] %v3562_v37   ;;  %v2731_v3 = vadd.f32 %v2730_v22, %v2700_v44  ;;  %v2194_v33 = vadd.f32 %v2153_v31, %v2008_v24  ;;  %v2340_v39 = vpop.f32.mrf.mxu3 }
 0x2c1   : > { %v1969_v1 = vpop.f32.mrf.mxu1 }
 0x2c2   : > { %v2381_v0 = vadd.f32 %v2340_v39, %v2194_v33  ;;  %v2009_v4 = vadd.f32 %v1969_v1, %v4538_v21 }
 0x2c3   : > { %v2528_v10 = vpop.f32.mrf.mxu0 }
 0x2c4   : > { %v2567_v60 = vadd.f32 %v2526_v47, %v2381_v0 }
 0x2c6   : > { %v2662_v58 = vadd.f32 %v2661_v40, %v2567_v60  ;;  %v2701_v7 = vmul.f32 %v2567_v60, %v2567_v60 }
 0x2c7   : > { %v2155_v36 = vpop.f32.mrf.mxu2 }
 0x2c8   : > { %v2732_v41 = vadd.f32 %v2731_v3, %v2701_v7  ;;  %v2195_v38 = vadd.f32 %v2155_v36, %v2009_v4  ;;  %v2342_v49 = vpop.f32.mrf.mxu3 }
 0x2c9   : > { %v1972_v27 = vpop.f32.mrf.mxu1 }
 0x2ca   : > { %v2382_v59 = vadd.f32 %v2342_v49, %v2195_v38  ;;  %v2010_v6 = vadd.f32 %v1972_v27, %v4543_v56 }
 0x2cb   : > { %v2531_v51 = vpop.f32.mrf.mxu0 }
 0x2cc   : > { %v2568_v34 = vadd.f32 %v2528_v10, %v2382_v59 }
 0x2ce   : > { %v3567_v5 = vpack.c.bf16 %v2568_v34, %v2567_v60  ;;  %v2663_v57 = vadd.f32 %v2662_v58, %v2568_v34  ;;  %v2702_v45 = vmul.f32 %v2568_v34, %v2568_v34 }
 0x2cf   : > { %v2158_v29 = vpop.f32.mrf.mxu2 }
 0x2d0   : > { %3607 = vst [vmem:[%s4571_s22 + $0x68] sm:$0xff] %v3567_v5   ;;  %v2733_v30 = vadd.f32 %v2732_v41, %v2702_v45  ;;  %v2196_v2 = vadd.f32 %v2158_v29, %v2010_v6  ;;  %v2345_v54 = vpop.f32.mrf.mxu3 }
 0x2d1   : > { %v1974_v50 = vpop.f32.mrf.mxu1 }
 0x2d2   : > { %v2383_v21 = vadd.f32 %v2345_v54, %v2196_v2  ;;  %v2011_v8 = vadd.f32 %v1974_v50, %v4548_v28 }
 0x2d3   : > { %v2533_v35 = vpop.f32.mrf.mxu0 }
 0x2d4   : > { %v2569_v61 = vadd.f32 %v2531_v51, %v2383_v21 }
 0x2d6   : > { %v2664_v14 = vadd.f32 %v2663_v57, %v2569_v61  ;;  %v2703_v32 = vmul.f32 %v2569_v61, %v2569_v61 }
 0x2d7   : > { %v2160_v53 = vpop.f32.mrf.mxu2 }
 0x2d8   : > { %v2734_v17 = vadd.f32 %v2733_v30, %v2703_v32  ;;  %v2197_v15 = vadd.f32 %v2160_v53, %v2011_v8  ;;  %v2347_v43 = vpop.f32.mrf.mxu3 }
 0x2d9   : > { %v1977_v16 = vpop.f32.mrf.mxu1 }
 0x2da   : > { %v2384_v56 = vadd.f32 %v2347_v43, %v2197_v15  ;;  %v2012_v23 = vadd.f32 %v1977_v16, %v4553_v26 }
 0x2db   : > { %v2536_v13 = vpop.f32.mrf.mxu0 }
 0x2dc   : > { %v2570_v62 = vadd.f32 %v2533_v35, %v2384_v56 }
 0x2de   : > { %v3572_v11 = vpack.c.bf16 %v2570_v62, %v2569_v61  ;;  %v2665_v52 = vadd.f32 %v2664_v14, %v2570_v62  ;;  %v2704_v25 = vmul.f32 %v2570_v62, %v2570_v62 }
 0x2df   : > { %v2163_v9 = vpop.f32.mrf.mxu2 }
 0x2e0   : > { %3608 = vst [vmem:[%s4571_s22 + $0x70] sm:$0xff] %v3572_v11   ;;  %v2735_v18 = vadd.f32 %v2734_v17, %v2704_v25  ;;  %v2198_v42 = vadd.f32 %v2163_v9, %v2012_v23  ;;  %v2350_v19 = vpop.f32.mrf.mxu3 }
 0x2e1   : > { %v1979_v22 = vpop.f32.mrf.mxu1 }
 0x2e2   : > { %v2385_v28 = vadd.f32 %v2350_v19, %v2198_v42  ;;  %v2013_v20 = vadd.f32 %v1979_v22, %v4558_v55 }
 0x2e3   : > { %v2538_v26 = vpop.f32.mrf.mxu0 }
 0x2e4   : > { %v2571_v46 = vadd.f32 %v2536_v13, %v2385_v28 }
 0x2e6   : > { %v2666_v48 = vadd.f32 %v2665_v52, %v2571_v46  ;;  %v2705_v12 = vmul.f32 %v2571_v46, %v2571_v46 }
 0x2e7   : > { %v2165_v47 = vpop.f32.mrf.mxu2 }
 0x2e8   : > { %v2736_v63 = vadd.f32 %v2735_v18, %v2705_v12  ;;  %v2199_v37 = vadd.f32 %v2165_v47, %v2013_v20  ;;  %v2352_v40 = vpop.f32.mrf.mxu3 }
 0x2ea   : > { %v2386_v44 = vadd.f32 %v2352_v40, %v2199_v37 }
 0x2ec   : > { %v2572_v24 = vadd.f32 %v2538_v26, %v2386_v44 }
 0x2ee   : > { %v3577_v31 = vpack.c.bf16 %v2572_v24, %v2571_v46  ;;  %v2667_v3 = vadd.f32 %v2666_v48, %v2572_v24  ;;  %v2706_v33 = vmul.f32 %v2572_v24, %v2572_v24 }
 0x2f0   : > { %3609 = vst [vmem:[%s4571_s22 + $0x78] sm:$0xff] %v3577_v31   ;;  %v2668_v39 = vrot.slane %v2667_v3, 4  ;;  %v2737_v1 = vadd.f32 %v2736_v63, %v2706_v33 }
 0x2f2   : > { %v2669_v0 = vadd.f32 %v2668_v39, %v2667_v3  ;;  %v2738_v10 = vrot.slane %v2737_v1, 4 }
 0x2f4   : > { %v2670_v60 = vrot.slane %v2669_v0, 2  ;;  %v2739_v58 = vadd.f32 %v2738_v10, %v2737_v1 }
 0x2f6   : > { %v2671_v55 = vadd.f32 %v2670_v60, %v2669_v0  ;;  %v2740_v7 = vrot.slane %v2739_v58, 2 }
 0x2f8   : > { %v2672_v4 = vrot.slane %v2671_v55, 1  ;;  %v2741_v36 = vadd.f32 %v2740_v7, %v2739_v58 }
 0x2fa   : > { %v2673_v41 = vadd.f32 %v2672_v4, %v2671_v55  ;;  %v2742_v38 = vrot.slane %v2741_v36, 1 }
 0x2fc   : > { %2674 = vst [vmem:[%s376_s23] sm:$0x1] %v2673_v41  ;;  %v2743_v49 = vadd.f32 %v2742_v38, %v2741_v36 }
 0x2fe   : > { %2744 = vst [vmem:[%s382_s30] sm:$0x1] %v2743_v49 }
 0x2ff PF: > { %s18_s26 = sadd.s32 1, %s3684_s26   ;;  %s4782_s24 = smov %s3680_s25 }
 0x300   : > { %p15_p5 = scmp.ge.s32.totalorder %s18_s26, 4   ;;  %s4783_s25 = smov %s4785_s27 }
 0x302   :  { %17 = sbr.rel (!%p15_p5) target bundleno = 2 (0x2), region = 105 }

</bundles_post_ra>
